<compile_context>
chip_gen: v6e
topology: v6e:2x2x1
jax: 0.10.0
libtpu: 0.0.40
codegen_flags: <defaults>
</compile_context>

<pallas_src>
import functools

import jax
import jax.numpy as jnp
from jax import lax
from jax.experimental import pallas as pl
from jax.experimental.pallas import tpu as pltpu

# Peak per-step usage is ~3 MiB; 32 MiB is a safe explicit cap on every generation
# (v7x has 64 MiB physical VMEM per TensorCore).
_VMEM_LIMIT = 32 * 1024 * 1024


# ---------------------------------------------------------------------------
# Fused im2col-matmul conv + bias + ReLU + 2x2 max-pool, one row-strip per grid step
# ---------------------------------------------------------------------------
def _conv_relu_pool_kernel(x_ref, w_ref, b_ref, o_ref, y_scr, hm_scr, *, rows, W):
    # x_ref : [1, rows*W, K]            im2col rows (K = 9*Cin) for this strip
    # w_ref : [K, Cout]                 taps stacked (dy, dx)-major, ci fastest
    # b_ref : [1, Cout]
    # o_ref : [1, (rows//2)*(W//2), Cout]  pooled rows in (hp, wp) order (NHWC)
    # y_scr : [rows*W, Cout]            conv+bias+ReLU for the strip (VMEM only)
    # hm_scr: [(rows//2)*W, Cout]       h-direction max

    # One lane-dense MXU matmul per strip (all 9 taps folded into K).
    y = jnp.dot(x_ref[0], w_ref[...], preferred_element_type=jnp.float32)
    y_scr[...] = jnp.maximum(y + b_ref[...], 0.0)

    # 2x2 max-pool, stage 1 (h direction): contiguous stride-1 slices only.
    for hp in range(rows // 2):                      # small static loop (rows//2 == 8)
        top = y_scr[pl.ds(2 * hp * W, W), :]
        bot = y_scr[pl.ds((2 * hp + 1) * W, W), :]
        hm_scr[pl.ds(hp * W, W), :] = jnp.maximum(top, bot)

    # Stage 2 (w direction): ONE pair of stride-2 loads covers the whole strip,
    # because flattened row r = hp*W + w has (r even) <=> (w even) since W is even.
    P = (rows // 2) * (W // 2)
    o_ref[0] = jnp.maximum(hm_scr[pl.ds(0, P, stride=2), :],
                           hm_scr[pl.ds(1, P, stride=2), :])


def _im2col_3x3(x_nhwc):
    """SAME-padded 3x3 patches: [B, H, W, C] -> [B, H*W, 9*C].
    Rows in (h, w) order; last dim ordered (dy, dx, ci) to match w_hwio.reshape(9C, Cout)."""
    B, H, W, C = x_nhwc.shape
    xp = jnp.pad(x_nhwc, ((0, 0), (1, 1), (1, 1), (0, 0)))
    cols = [xp[:, dy:dy + H, dx:dx + W, :] for dy in range(3) for dx in range(3)]
    return jnp.concatenate(cols, axis=-1).reshape(B, H * W, 9 * C)


def conv3x3_relu_pool(x_nhwc, w_hwio, b, *, strip_rows=16):
    """3x3/pad-1 conv + bias + ReLU + 2x2 max-pool.
    x_nhwc: [B, H, W, Cin] -> [B, (H//2)*(W//2), Cout], rows in (hp, wp) order."""
    B, H, W, Cin = x_nhwc.shape
    Cout = w_hwio.shape[-1]
    assert H % strip_rows == 0 and strip_rows % 2 == 0 and W % 2 == 0
    K = 9 * Cin
    n_strips = H // strip_rows
    rows_out = (strip_rows // 2) * (W // 2)

    xcol = _im2col_3x3(x_nhwc)                       # lane-dense K operand (small)
    wmat = w_hwio.reshape(K, Cout)

    kernel = functools.partial(_conv_relu_pool_kernel, rows=strip_rows, W=W)
    return pl.pallas_call(
        kernel,
        out_shape=jax.ShapeDtypeStruct((B, (H // 2) * (W // 2), Cout), jnp.float32),
        grid_spec=pltpu.PrefetchScalarGridSpec(
            num_scalar_prefetch=0,
            grid=(B, n_strips),
            in_specs=[
                pl.BlockSpec((1, strip_rows * W, K), lambda i, s: (i, s, 0)),
                pl.BlockSpec((K, Cout), lambda i, s: (0, 0)),
                pl.BlockSpec((1, Cout), lambda i, s: (0, 0)),
            ],
            out_specs=pl.BlockSpec((1, rows_out, Cout), lambda i, s: (i, s, 0)),
            scratch_shapes=[
                pltpu.VMEM((strip_rows * W, Cout), jnp.float32),
                pltpu.VMEM(((strip_rows // 2) * W, Cout), jnp.float32),
            ],
        ),
        compiler_params=pltpu.CompilerParams(
            dimension_semantics=("parallel", "parallel"),   # images x strips across TCs
            vmem_limit_bytes=_VMEM_LIMIT,
        ),
    )(xcol, wmat, b.reshape(1, Cout))


# ---------------------------------------------------------------------------
# MLP head: fc1 (K-tiled over grid, f32 accumulator) + ReLU + fc2
# ---------------------------------------------------------------------------
def _mlp_kernel(x_ref, w1_ref, b1_ref, w2_ref, b2_ref, o_ref, acc_ref):
    k = pl.program_id(1)

    @pl.when(k == 0)
    def _():
        acc_ref[...] = jnp.zeros_like(acc_ref)

    acc_ref[...] += jnp.dot(x_ref[...], w1_ref[...], preferred_element_type=jnp.float32)

    @pl.when(k == pl.num_programs(1) - 1)
    def _():
        h = jnp.maximum(acc_ref[...] + b1_ref[...], 0.0)
        o_ref[...] = (jnp.dot(h, w2_ref[...], preferred_element_type=jnp.float32)
                      + b2_ref[...]).astype(o_ref.dtype)


def mlp_head(xf, w1, b1, w2, b2, *, tk=2048, tb=256):
    B, K = xf.shape
    H1 = w1.shape[1]
    Nout = w2.shape[1]
    tb = min(tb, B)
    assert B % tb == 0 and K % tk == 0
    return pl.pallas_call(
        _mlp_kernel,
        out_shape=jax.ShapeDtypeStruct((B, Nout), jnp.float32),
        grid_spec=pltpu.PrefetchScalarGridSpec(
            num_scalar_prefetch=0,
            grid=(B // tb, K // tk),
            in_specs=[
                pl.BlockSpec((tb, tk), lambda i, k: (i, k)),
                pl.BlockSpec((tk, H1), lambda i, k: (k, 0)),
                pl.BlockSpec((1, H1), lambda i, k: (0, 0)),
                pl.BlockSpec((H1, Nout), lambda i, k: (0, 0)),
                pl.BlockSpec((1, Nout), lambda i, k: (0, 0)),
            ],
            out_specs=pl.BlockSpec((tb, Nout), lambda i, k: (i, 0)),
            scratch_shapes=[pltpu.VMEM((tb, H1), jnp.float32)],
        ),
        compiler_params=pltpu.CompilerParams(
            dimension_semantics=("parallel", "arbitrary"),
            vmem_limit_bytes=_VMEM_LIMIT,
        ),
    )(xf, w1, b1.reshape(1, H1), w2, b2.reshape(1, Nout))


# ---------------------------------------------------------------------------
# Full forward pass
# ---------------------------------------------------------------------------
@jax.jit
def anime_cnn_forward(x_nchw, p):
    B = x_nchw.shape[0]
    x = jnp.transpose(x_nchw, (0, 2, 3, 1))                       # NHWC [B, 64, 64, 3]
    y1 = conv3x3_relu_pool(x, p["w_conv1"], p["b_conv1"])         # [B, 32*32, 32]
    y2 = conv3x3_relu_pool(y1.reshape(B, 32, 32, 32),
                           p["w_conv2"], p["b_conv2"])            # [B, 16*16, 64]
    feat = y2.reshape(B, 16 * 16 * 64)                            # rows already (h, w, c)
    return mlp_head(feat, p["w_fc1_hwc"], p["b_fc1"], p["w_fc2"], p["b_fc2"])


# ---------------------------------------------------------------------------
# Deterministic parameter init (shapes from AnimeCNN.__init__) + pure-JAX reference
# ---------------------------------------------------------------------------
def init_params(key):
    ks = jax.random.split(key, 8)

    def u(k, shape, fan_in):
        bound = 1.0 / jnp.sqrt(float(fan_in))
        return jax.random.uniform(k, shape, jnp.float32, -bound, bound)

    return {
        "w_conv1": u(ks[0], (3, 3, 3, 32), 3 * 9),      # HWIO
        "b_conv1": u(ks[1], (32,), 3 * 9),
        "w_conv2": u(ks[2], (3, 3, 32, 64), 32 * 9),
        "b_conv2": u(ks[3], (64,), 32 * 9),
        "w_fc1":   u(ks[4], (64 * 16 * 16, 128), 64 * 16 * 16),   # rows in torch (c,h,w) order
        "b_fc1":   u(ks[5], (128,), 64 * 16 * 16),
        "w_fc2":   u(ks[6], (128, 2), 128),
        "b_fc2":   u(ks[7], (2,), 128),
    }


def prepare_params(p):
    """One-time layout prep: permute w_fc1 rows from torch's (c, h, w) flatten order to
    the kernel's (h, w, c) order so the runtime NCHW-flatten transpose disappears."""
    q = dict(p)
    q["w_fc1_hwc"] = (p["w_fc1"].reshape(64, 16, 16, 128)
                      .transpose(1, 2, 0, 3)
                      .reshape(64 * 16 * 16, 128))
    return q


def reference_forward(x_nchw, p):
    x = jnp.transpose(x_nchw, (0, 2, 3, 1))

    def conv(x, w, b):
        y = lax.conv_general_dilated(x, w, (1, 1), "SAME",
                                     dimension_numbers=("NHWC", "HWIO", "NHWC"),
                                     precision=lax.Precision.HIGHEST)
        return jnp.maximum(y + b, 0.0)

    def pool(x):
        B, H, W, C = x.shape
        return jnp.max(x.reshape(B, H // 2, 2, W // 2, 2, C), axis=(2, 4))

    x = pool(conv(x, p["w_conv1"], p["b_conv1"]))
    x = pool(conv(x, p["w_conv2"], p["b_conv2"]))
    B = x.shape[0]
    feat = x.transpose(0, 3, 1, 2).reshape(B, -1)                 # torch (c, h, w) flatten
    h = jnp.maximum(jnp.dot(feat, p["w_fc1"], precision=lax.Precision.HIGHEST)
                    + p["b_fc1"], 0.0)
    return jnp.dot(h, p["w_fc2"], precision=lax.Precision.HIGHEST) + p["b_fc2"]


if __name__ == "__main__":
    key = jax.random.PRNGKey(0)
    pkey, xkey = jax.random.split(key)
    params = init_params(pkey)
    kparams = prepare_params(params)
    x = jax.random.normal(xkey, (2, 3, 64, 64), jnp.float32)       # 64x64 forced by fc1 shape

    out = jax.block_until_ready(anime_cnn_forward(x, kparams))
    ref = jax.block_until_ready(reference_forward(x, params))

    assert out.shape == (2, 2), out.shape
    assert jnp.allclose(out, ref, rtol=2e-4, atol=2e-4), (out, ref)
    print("KERNEL_OK")
</pallas_src>

<mosaic_0001>
module attributes {stable_mosaic.version = 11 : i64} {
  func.func @_conv_relu_pool_kernel(%arg0: i32, %arg1: i32, %arg2: memref<1x1024x27xf32, #tpu.memory_space<vmem>>, %arg3: memref<27x32xf32, #tpu.memory_space<vmem>>, %arg4: memref<1x32xf32, #tpu.memory_space<vmem>>, %arg5: memref<1x256x32xf32, #tpu.memory_space<vmem>>, %arg6: memref<1024x32xf32, #tpu.memory_space<vmem>>, %arg7: memref<512x32xf32, #tpu.memory_space<vmem>>) attributes {dimension_semantics = [#tpu.dimension_semantics<parallel>, #tpu.dimension_semantics<parallel>], iteration_bounds = array<i64: 2, 4>, scalar_prefetch = 0 : i64, scratch_operands = 2 : i64, tpu.core_type = #tpu.core_type<tc>, window_params = [{transform_indices = @transform_0, window_bounds = array<i64: 1, 1024, 27>}, {pipeline_mode = #tpu.pipeline_mode<synchronous>, transform_indices = @transform_1, window_bounds = array<i64: 27, 32>}, {pipeline_mode = #tpu.pipeline_mode<synchronous>, transform_indices = @transform_2, window_bounds = array<i64: 1, 32>}, {transform_indices = @transform_3, window_bounds = array<i64: 1, 256, 32>}]} {
    %c0 = arith.constant 0 : index
    %c0_0 = arith.constant 0 : index
    %c0_1 = arith.constant 0 : index
    %0 = vector.load %arg2[%c0, %c0_0, %c0_1] : memref<1x1024x27xf32, #tpu.memory_space<vmem>>, vector<1x1024x27xf32>
    %1 = vector.shape_cast %0 : vector<1x1024x27xf32> to vector<1024x27xf32>
    %c0_2 = arith.constant 0 : index
    %c0_3 = arith.constant 0 : index
    %2 = vector.load %arg3[%c0_2, %c0_3] : memref<27x32xf32, #tpu.memory_space<vmem>>, vector<27x32xf32>
    %cst = arith.constant dense<0.000000e+00> : vector<1024x32xf32>
    %3 = tpu.matmul %1, %2, %cst {dimension_numbers = #tpu.dot_dimension_numbers<[1], [0], [0], [1], [0, 0, 1, 1], [], []>} : vector<1024x27xf32>, vector<27x32xf32>, vector<1024x32xf32> -> vector<1024x32xf32>
    %c0_4 = arith.constant 0 : index
    %c0_5 = arith.constant 0 : index
    %4 = vector.load %arg4[%c0_4, %c0_5] : memref<1x32xf32, #tpu.memory_space<vmem>>, vector<1x32xf32>
    %5 = vector.broadcast %4 : vector<1x32xf32> to vector<1024x32xf32>
    %6 = arith.addf %3, %5 : vector<1024x32xf32>
    %cst_6 = arith.constant 0.000000e+00 : f32
    %7 = vector.broadcast %cst_6 : f32 to vector<1024x32xf32>
    %8 = arith.maximumf %6, %7 : vector<1024x32xf32>
    %c0_7 = arith.constant 0 : index
    %c0_8 = arith.constant 0 : index
    %9 = vector.load %arg6[%c0_7, %c0_8] : memref<1024x32xf32, #tpu.memory_space<vmem>>, vector<1024x32xf32>
    tpu.vector_store %arg6[%c0_7, %c0_8], %8 {strides = array<i32>} : memref<1024x32xf32, #tpu.memory_space<vmem>>, vector<1024x32xf32>,
    %c0_9 = arith.constant 0 : index
    %c0_10 = arith.constant 0 : index
    %10 = vector.load %arg6[%c0_9, %c0_10] : memref<1024x32xf32, #tpu.memory_space<vmem>>, vector<64x32xf32>
    %c64 = arith.constant 64 : index
    %c0_11 = arith.constant 0 : index
    %11 = vector.load %arg6[%c64, %c0_11] : memref<1024x32xf32, #tpu.memory_space<vmem>>, vector<64x32xf32>
    %12 = arith.maximumf %10, %11 : vector<64x32xf32>
    %c0_12 = arith.constant 0 : index
    %c0_13 = arith.constant 0 : index
    %13 = vector.load %arg7[%c0_12, %c0_13] : memref<512x32xf32, #tpu.memory_space<vmem>>, vector<64x32xf32>
    tpu.vector_store %arg7[%c0_12, %c0_13], %12 {strides = array<i32>} : memref<512x32xf32, #tpu.memory_space<vmem>>, vector<64x32xf32>,
    %c128 = arith.constant 128 : index
    %c0_14 = arith.constant 0 : index
    %14 = vector.load %arg6[%c128, %c0_14] : memref<1024x32xf32, #tpu.memory_space<vmem>>, vector<64x32xf32>
    %c192 = arith.constant 192 : index
    %c0_15 = arith.constant 0 : index
    %15 = vector.load %arg6[%c192, %c0_15] : memref<1024x32xf32, #tpu.memory_space<vmem>>, vector<64x32xf32>
    %16 = arith.maximumf %14, %15 : vector<64x32xf32>
    %c64_16 = arith.constant 64 : index
    %c0_17 = arith.constant 0 : index
    %17 = vector.load %arg7[%c64_16, %c0_17] : memref<512x32xf32, #tpu.memory_space<vmem>>, vector<64x32xf32>
    tpu.vector_store %arg7[%c64_16, %c0_17], %16 {strides = array<i32>} : memref<512x32xf32, #tpu.memory_space<vmem>>, vector<64x32xf32>,
    %c256 = arith.constant 256 : index
    %c0_18 = arith.constant 0 : index
    %18 = vector.load %arg6[%c256, %c0_18] : memref<1024x32xf32, #tpu.memory_space<vmem>>, vector<64x32xf32>
    %c320 = arith.constant 320 : index
    %c0_19 = arith.constant 0 : index
    %19 = vector.load %arg6[%c320, %c0_19] : memref<1024x32xf32, #tpu.memory_space<vmem>>, vector<64x32xf32>
    %20 = arith.maximumf %18, %19 : vector<64x32xf32>
    %c128_20 = arith.constant 128 : index
    %c0_21 = arith.constant 0 : index
    %21 = vector.load %arg7[%c128_20, %c0_21] : memref<512x32xf32, #tpu.memory_space<vmem>>, vector<64x32xf32>
    tpu.vector_store %arg7[%c128_20, %c0_21], %20 {strides = array<i32>} : memref<512x32xf32, #tpu.memory_space<vmem>>, vector<64x32xf32>,
    %c384 = arith.constant 384 : index
    %c0_22 = arith.constant 0 : index
    %22 = vector.load %arg6[%c384, %c0_22] : memref<1024x32xf32, #tpu.memory_space<vmem>>, vector<64x32xf32>
    %c448 = arith.constant 448 : index
    %c0_23 = arith.constant 0 : index
    %23 = vector.load %arg6[%c448, %c0_23] : memref<1024x32xf32, #tpu.memory_space<vmem>>, vector<64x32xf32>
    %24 = arith.maximumf %22, %23 : vector<64x32xf32>
    %c192_24 = arith.constant 192 : index
    %c0_25 = arith.constant 0 : index
    %25 = vector.load %arg7[%c192_24, %c0_25] : memref<512x32xf32, #tpu.memory_space<vmem>>, vector<64x32xf32>
    tpu.vector_store %arg7[%c192_24, %c0_25], %24 {strides = array<i32>} : memref<512x32xf32, #tpu.memory_space<vmem>>, vector<64x32xf32>,
    %c512 = arith.constant 512 : index
    %c0_26 = arith.constant 0 : index
    %26 = vector.load %arg6[%c512, %c0_26] : memref<1024x32xf32, #tpu.memory_space<vmem>>, vector<64x32xf32>
    %c576 = arith.constant 576 : index
    %c0_27 = arith.constant 0 : index
    %27 = vector.load %arg6[%c576, %c0_27] : memref<1024x32xf32, #tpu.memory_space<vmem>>, vector<64x32xf32>
    %28 = arith.maximumf %26, %27 : vector<64x32xf32>
    %c256_28 = arith.constant 256 : index
    %c0_29 = arith.constant 0 : index
    %29 = vector.load %arg7[%c256_28, %c0_29] : memref<512x32xf32, #tpu.memory_space<vmem>>, vector<64x32xf32>
    tpu.vector_store %arg7[%c256_28, %c0_29], %28 {strides = array<i32>} : memref<512x32xf32, #tpu.memory_space<vmem>>, vector<64x32xf32>,
    %c640 = arith.constant 640 : index
    %c0_30 = arith.constant 0 : index
    %30 = vector.load %arg6[%c640, %c0_30] : memref<1024x32xf32, #tpu.memory_space<vmem>>, vector<64x32xf32>
    %c704 = arith.constant 704 : index
    %c0_31 = arith.constant 0 : index
    %31 = vector.load %arg6[%c704, %c0_31] : memref<1024x32xf32, #tpu.memory_space<vmem>>, vector<64x32xf32>
    %32 = arith.maximumf %30, %31 : vector<64x32xf32>
    %c320_32 = arith.constant 320 : index
    %c0_33 = arith.constant 0 : index
    %33 = vector.load %arg7[%c320_32, %c0_33] : memref<512x32xf32, #tpu.memory_space<vmem>>, vector<64x32xf32>
    tpu.vector_store %arg7[%c320_32, %c0_33], %32 {strides = array<i32>} : memref<512x32xf32, #tpu.memory_space<vmem>>, vector<64x32xf32>,
    %c768 = arith.constant 768 : index
    %c0_34 = arith.constant 0 : index
    %34 = vector.load %arg6[%c768, %c0_34] : memref<1024x32xf32, #tpu.memory_space<vmem>>, vector<64x32xf32>
    %c832 = arith.constant 832 : index
    %c0_35 = arith.constant 0 : index
    %35 = vector.load %arg6[%c832, %c0_35] : memref<1024x32xf32, #tpu.memory_space<vmem>>, vector<64x32xf32>
    %36 = arith.maximumf %34, %35 : vector<64x32xf32>
    %c384_36 = arith.constant 384 : index
    %c0_37 = arith.constant 0 : index
    %37 = vector.load %arg7[%c384_36, %c0_37] : memref<512x32xf32, #tpu.memory_space<vmem>>, vector<64x32xf32>
    tpu.vector_store %arg7[%c384_36, %c0_37], %36 {strides = array<i32>} : memref<512x32xf32, #tpu.memory_space<vmem>>, vector<64x32xf32>,
    %c896 = arith.constant 896 : index
    %c0_38 = arith.constant 0 : index
    %38 = vector.load %arg6[%c896, %c0_38] : memref<1024x32xf32, #tpu.memory_space<vmem>>, vector<64x32xf32>
    %c960 = arith.constant 960 : index
    %c0_39 = arith.constant 0 : index
    %39 = vector.load %arg6[%c960, %c0_39] : memref<1024x32xf32, #tpu.memory_space<vmem>>, vector<64x32xf32>
    %40 = arith.maximumf %38, %39 : vector<64x32xf32>
    %c448_40 = arith.constant 448 : index
    %c0_41 = arith.constant 0 : index
    %41 = vector.load %arg7[%c448_40, %c0_41] : memref<512x32xf32, #tpu.memory_space<vmem>>, vector<64x32xf32>
    tpu.vector_store %arg7[%c448_40, %c0_41], %40 {strides = array<i32>} : memref<512x32xf32, #tpu.memory_space<vmem>>, vector<64x32xf32>,
    %c0_42 = arith.constant 0 : index
    %c0_43 = arith.constant 0 : index
    %42 = tpu.strided_load %arg7[%c0_42, %c0_43] {strides = array<i32: 2, 1>} : memref<512x32xf32, #tpu.memory_space<vmem>>, vector<256x32xf32>
    %c1 = arith.constant 1 : index
    %c0_44 = arith.constant 0 : index
    %43 = tpu.strided_load %arg7[%c1, %c0_44] {strides = array<i32: 2, 1>} : memref<512x32xf32, #tpu.memory_space<vmem>>, vector<256x32xf32>
    %44 = arith.maximumf %42, %43 : vector<256x32xf32>
    %c0_45 = arith.constant 0 : index
    %c0_46 = arith.constant 0 : index
    %c0_47 = arith.constant 0 : index
    %45 = vector.load %arg5[%c0_45, %c0_46, %c0_47] : memref<1x256x32xf32, #tpu.memory_space<vmem>>, vector<1x256x32xf32>
    %46 = vector.shape_cast %45 : vector<1x256x32xf32> to vector<256x32xf32>
    %47 = vector.shape_cast %44 : vector<256x32xf32> to vector<1x256x32xf32>
    tpu.vector_store %arg5[%c0_45, %c0_46, %c0_47], %47 {strides = array<i32>} : memref<1x256x32xf32, #tpu.memory_space<vmem>>, vector<1x256x32xf32>,
    return
  }
  func.func @transform_0(%arg0: i32, %arg1: i32) -> (i32, i32, i32) {
    %c0_i32 = arith.constant 0 : i32
    %c0_i32_0 = arith.constant 0 : i32
    return %arg0, %arg1, %c0_i32 : i32, i32, i32
  }
  func.func @transform_1(%arg0: i32, %arg1: i32) -> (i32, i32) {
    %c0_i32 = arith.constant 0 : i32
    %c0_i32_0 = arith.constant 0 : i32
    %c0_i32_1 = arith.constant 0 : i32
    return %c0_i32, %c0_i32_0 : i32, i32
  }
  func.func @transform_2(%arg0: i32, %arg1: i32) -> (i32, i32) {
    %c0_i32 = arith.constant 0 : i32
    %c0_i32_0 = arith.constant 0 : i32
    %c0_i32_1 = arith.constant 0 : i32
    return %c0_i32, %c0_i32_0 : i32, i32
  }
  func.func @transform_3(%arg0: i32, %arg1: i32) -> (i32, i32, i32) {
    %c0_i32 = arith.constant 0 : i32
    %c0_i32_0 = arith.constant 0 : i32
    return %arg0, %arg1, %c0_i32 : i32, i32, i32
  }
}

module attributes {stable_mosaic.version = 11 : i64} {
  func.func @_conv_relu_pool_kernel(%arg0: i32, %arg1: i32, %arg2: memref<1x512x288xf32, #tpu.memory_space<vmem>>, %arg3: memref<288x64xf32, #tpu.memory_space<vmem>>, %arg4: memref<1x64xf32, #tpu.memory_space<vmem>>, %arg5: memref<1x128x64xf32, #tpu.memory_space<vmem>>, %arg6: memref<512x64xf32, #tpu.memory_space<vmem>>, %arg7: memref<256x64xf32, #tpu.memory_space<vmem>>) attributes {dimension_semantics = [#tpu.dimension_semantics<parallel>, #tpu.dimension_semantics<parallel>], iteration_bounds = array<i64: 2, 2>, scalar_prefetch = 0 : i64, scratch_operands = 2 : i64, tpu.core_type = #tpu.core_type<tc>, window_params = [{transform_indices = @transform_0, window_bounds = array<i64: 1, 512, 288>}, {pipeline_mode = #tpu.pipeline_mode<synchronous>, transform_indices = @transform_1, window_bounds = array<i64: 288, 64>}, {pipeline_mode = #tpu.pipeline_mode<synchronous>, transform_indices = @transform_2, window_bounds = array<i64: 1, 64>}, {transform_indices = @transform_3, window_bounds = array<i64: 1, 128, 64>}]} {
    %c0 = arith.constant 0 : index
    %c0_0 = arith.constant 0 : index
    %c0_1 = arith.constant 0 : index
    %0 = vector.load %arg2[%c0, %c0_0, %c0_1] : memref<1x512x288xf32, #tpu.memory_space<vmem>>, vector<1x512x288xf32>
    %1 = vector.shape_cast %0 : vector<1x512x288xf32> to vector<512x288xf32>
    %c0_2 = arith.constant 0 : index
    %c0_3 = arith.constant 0 : index
    %2 = vector.load %arg3[%c0_2, %c0_3] : memref<288x64xf32, #tpu.memory_space<vmem>>, vector<288x64xf32>
    %cst = arith.constant dense<0.000000e+00> : vector<512x64xf32>
    %3 = tpu.matmul %1, %2, %cst {dimension_numbers = #tpu.dot_dimension_numbers<[1], [0], [0], [1], [0, 0, 1, 1], [], []>} : vector<512x288xf32>, vector<288x64xf32>, vector<512x64xf32> -> vector<512x64xf32>
    %c0_4 = arith.constant 0 : index
    %c0_5 = arith.constant 0 : index
    %4 = vector.load %arg4[%c0_4, %c0_5] : memref<1x64xf32, #tpu.memory_space<vmem>>, vector<1x64xf32>
    %5 = vector.broadcast %4 : vector<1x64xf32> to vector<512x64xf32>
    %6 = arith.addf %3, %5 : vector<512x64xf32>
    %cst_6 = arith.constant 0.000000e+00 : f32
    %7 = vector.broadcast %cst_6 : f32 to vector<512x64xf32>
    %8 = arith.maximumf %6, %7 : vector<512x64xf32>
    %c0_7 = arith.constant 0 : index
    %c0_8 = arith.constant 0 : index
    %9 = vector.load %arg6[%c0_7, %c0_8] : memref<512x64xf32, #tpu.memory_space<vmem>>, vector<512x64xf32>
    tpu.vector_store %arg6[%c0_7, %c0_8], %8 {strides = array<i32>} : memref<512x64xf32, #tpu.memory_space<vmem>>, vector<512x64xf32>,
    %c0_9 = arith.constant 0 : index
    %c0_10 = arith.constant 0 : index
    %10 = vector.load %arg6[%c0_9, %c0_10] : memref<512x64xf32, #tpu.memory_space<vmem>>, vector<32x64xf32>
    %c32 = arith.constant 32 : index
    %c0_11 = arith.constant 0 : index
    %11 = vector.load %arg6[%c32, %c0_11] : memref<512x64xf32, #tpu.memory_space<vmem>>, vector<32x64xf32>
    %12 = arith.maximumf %10, %11 : vector<32x64xf32>
    %c0_12 = arith.constant 0 : index
    %c0_13 = arith.constant 0 : index
    %13 = vector.load %arg7[%c0_12, %c0_13] : memref<256x64xf32, #tpu.memory_space<vmem>>, vector<32x64xf32>
    tpu.vector_store %arg7[%c0_12, %c0_13], %12 {strides = array<i32>} : memref<256x64xf32, #tpu.memory_space<vmem>>, vector<32x64xf32>,
    %c64 = arith.constant 64 : index
    %c0_14 = arith.constant 0 : index
    %14 = vector.load %arg6[%c64, %c0_14] : memref<512x64xf32, #tpu.memory_space<vmem>>, vector<32x64xf32>
    %c96 = arith.constant 96 : index
    %c0_15 = arith.constant 0 : index
    %15 = vector.load %arg6[%c96, %c0_15] : memref<512x64xf32, #tpu.memory_space<vmem>>, vector<32x64xf32>
    %16 = arith.maximumf %14, %15 : vector<32x64xf32>
    %c32_16 = arith.constant 32 : index
    %c0_17 = arith.constant 0 : index
    %17 = vector.load %arg7[%c32_16, %c0_17] : memref<256x64xf32, #tpu.memory_space<vmem>>, vector<32x64xf32>
    tpu.vector_store %arg7[%c32_16, %c0_17], %16 {strides = array<i32>} : memref<256x64xf32, #tpu.memory_space<vmem>>, vector<32x64xf32>,
    %c128 = arith.constant 128 : index
    %c0_18 = arith.constant 0 : index
    %18 = vector.load %arg6[%c128, %c0_18] : memref<512x64xf32, #tpu.memory_space<vmem>>, vector<32x64xf32>
    %c160 = arith.constant 160 : index
    %c0_19 = arith.constant 0 : index
    %19 = vector.load %arg6[%c160, %c0_19] : memref<512x64xf32, #tpu.memory_space<vmem>>, vector<32x64xf32>
    %20 = arith.maximumf %18, %19 : vector<32x64xf32>
    %c64_20 = arith.constant 64 : index
    %c0_21 = arith.constant 0 : index
    %21 = vector.load %arg7[%c64_20, %c0_21] : memref<256x64xf32, #tpu.memory_space<vmem>>, vector<32x64xf32>
    tpu.vector_store %arg7[%c64_20, %c0_21], %20 {strides = array<i32>} : memref<256x64xf32, #tpu.memory_space<vmem>>, vector<32x64xf32>,
    %c192 = arith.constant 192 : index
    %c0_22 = arith.constant 0 : index
    %22 = vector.load %arg6[%c192, %c0_22] : memref<512x64xf32, #tpu.memory_space<vmem>>, vector<32x64xf32>
    %c224 = arith.constant 224 : index
    %c0_23 = arith.constant 0 : index
    %23 = vector.load %arg6[%c224, %c0_23] : memref<512x64xf32, #tpu.memory_space<vmem>>, vector<32x64xf32>
    %24 = arith.maximumf %22, %23 : vector<32x64xf32>
    %c96_24 = arith.constant 96 : index
    %c0_25 = arith.constant 0 : index
    %25 = vector.load %arg7[%c96_24, %c0_25] : memref<256x64xf32, #tpu.memory_space<vmem>>, vector<32x64xf32>
    tpu.vector_store %arg7[%c96_24, %c0_25], %24 {strides = array<i32>} : memref<256x64xf32, #tpu.memory_space<vmem>>, vector<32x64xf32>,
    %c256 = arith.constant 256 : index
    %c0_26 = arith.constant 0 : index
    %26 = vector.load %arg6[%c256, %c0_26] : memref<512x64xf32, #tpu.memory_space<vmem>>, vector<32x64xf32>
    %c288 = arith.constant 288 : index
    %c0_27 = arith.constant 0 : index
    %27 = vector.load %arg6[%c288, %c0_27] : memref<512x64xf32, #tpu.memory_space<vmem>>, vector<32x64xf32>
    %28 = arith.maximumf %26, %27 : vector<32x64xf32>
    %c128_28 = arith.constant 128 : index
    %c0_29 = arith.constant 0 : index
    %29 = vector.load %arg7[%c128_28, %c0_29] : memref<256x64xf32, #tpu.memory_space<vmem>>, vector<32x64xf32>
    tpu.vector_store %arg7[%c128_28, %c0_29], %28 {strides = array<i32>} : memref<256x64xf32, #tpu.memory_space<vmem>>, vector<32x64xf32>,
    %c320 = arith.constant 320 : index
    %c0_30 = arith.constant 0 : index
    %30 = vector.load %arg6[%c320, %c0_30] : memref<512x64xf32, #tpu.memory_space<vmem>>, vector<32x64xf32>
    %c352 = arith.constant 352 : index
    %c0_31 = arith.constant 0 : index
    %31 = vector.load %arg6[%c352, %c0_31] : memref<512x64xf32, #tpu.memory_space<vmem>>, vector<32x64xf32>
    %32 = arith.maximumf %30, %31 : vector<32x64xf32>
    %c160_32 = arith.constant 160 : index
    %c0_33 = arith.constant 0 : index
    %33 = vector.load %arg7[%c160_32, %c0_33] : memref<256x64xf32, #tpu.memory_space<vmem>>, vector<32x64xf32>
    tpu.vector_store %arg7[%c160_32, %c0_33], %32 {strides = array<i32>} : memref<256x64xf32, #tpu.memory_space<vmem>>, vector<32x64xf32>,
    %c384 = arith.constant 384 : index
    %c0_34 = arith.constant 0 : index
    %34 = vector.load %arg6[%c384, %c0_34] : memref<512x64xf32, #tpu.memory_space<vmem>>, vector<32x64xf32>
    %c416 = arith.constant 416 : index
    %c0_35 = arith.constant 0 : index
    %35 = vector.load %arg6[%c416, %c0_35] : memref<512x64xf32, #tpu.memory_space<vmem>>, vector<32x64xf32>
    %36 = arith.maximumf %34, %35 : vector<32x64xf32>
    %c192_36 = arith.constant 192 : index
    %c0_37 = arith.constant 0 : index
    %37 = vector.load %arg7[%c192_36, %c0_37] : memref<256x64xf32, #tpu.memory_space<vmem>>, vector<32x64xf32>
    tpu.vector_store %arg7[%c192_36, %c0_37], %36 {strides = array<i32>} : memref<256x64xf32, #tpu.memory_space<vmem>>, vector<32x64xf32>,
    %c448 = arith.constant 448 : index
    %c0_38 = arith.constant 0 : index
    %38 = vector.load %arg6[%c448, %c0_38] : memref<512x64xf32, #tpu.memory_space<vmem>>, vector<32x64xf32>
    %c480 = arith.constant 480 : index
    %c0_39 = arith.constant 0 : index
    %39 = vector.load %arg6[%c480, %c0_39] : memref<512x64xf32, #tpu.memory_space<vmem>>, vector<32x64xf32>
    %40 = arith.maximumf %38, %39 : vector<32x64xf32>
    %c224_40 = arith.constant 224 : index
    %c0_41 = arith.constant 0 : index
    %41 = vector.load %arg7[%c224_40, %c0_41] : memref<256x64xf32, #tpu.memory_space<vmem>>, vector<32x64xf32>
    tpu.vector_store %arg7[%c224_40, %c0_41], %40 {strides = array<i32>} : memref<256x64xf32, #tpu.memory_space<vmem>>, vector<32x64xf32>,
    %c0_42 = arith.constant 0 : index
    %c0_43 = arith.constant 0 : index
    %42 = tpu.strided_load %arg7[%c0_42, %c0_43] {strides = array<i32: 2, 1>} : memref<256x64xf32, #tpu.memory_space<vmem>>, vector<128x64xf32>
    %c1 = arith.constant 1 : index
    %c0_44 = arith.constant 0 : index
    %43 = tpu.strided_load %arg7[%c1, %c0_44] {strides = array<i32: 2, 1>} : memref<256x64xf32, #tpu.memory_space<vmem>>, vector<128x64xf32>
    %44 = arith.maximumf %42, %43 : vector<128x64xf32>
    %c0_45 = arith.constant 0 : index
    %c0_46 = arith.constant 0 : index
    %c0_47 = arith.constant 0 : index
    %45 = vector.load %arg5[%c0_45, %c0_46, %c0_47] : memref<1x128x64xf32, #tpu.memory_space<vmem>>, vector<1x128x64xf32>
    %46 = vector.shape_cast %45 : vector<1x128x64xf32> to vector<128x64xf32>
    %47 = vector.shape_cast %44 : vector<128x64xf32> to vector<1x128x64xf32>
    tpu.vector_store %arg5[%c0_45, %c0_46, %c0_47], %47 {strides = array<i32>} : memref<1x128x64xf32, #tpu.memory_space<vmem>>, vector<1x128x64xf32>,
    return
  }
  func.func @transform_0(%arg0: i32, %arg1: i32) -> (i32, i32, i32) {
    %c0_i32 = arith.constant 0 : i32
    %c0_i32_0 = arith.constant 0 : i32
    return %arg0, %arg1, %c0_i32 : i32, i32, i32
  }
  func.func @transform_1(%arg0: i32, %arg1: i32) -> (i32, i32) {
    %c0_i32 = arith.constant 0 : i32
    %c0_i32_0 = arith.constant 0 : i32
    %c0_i32_1 = arith.constant 0 : i32
    return %c0_i32, %c0_i32_0 : i32, i32
  }
  func.func @transform_2(%arg0: i32, %arg1: i32) -> (i32, i32) {
    %c0_i32 = arith.constant 0 : i32
    %c0_i32_0 = arith.constant 0 : i32
    %c0_i32_1 = arith.constant 0 : i32
    return %c0_i32, %c0_i32_0 : i32, i32
  }
  func.func @transform_3(%arg0: i32, %arg1: i32) -> (i32, i32, i32) {
    %c0_i32 = arith.constant 0 : i32
    %c0_i32_0 = arith.constant 0 : i32
    return %arg0, %arg1, %c0_i32 : i32, i32, i32
  }
}

module attributes {stable_mosaic.version = 11 : i64} {
  func.func @_mlp_kernel(%arg0: i32, %arg1: i32, %arg2: memref<2x2048xf32, #tpu.memory_space<vmem>>, %arg3: memref<2048x128xf32, #tpu.memory_space<vmem>>, %arg4: memref<1x128xf32, #tpu.memory_space<vmem>>, %arg5: memref<128x2xf32, #tpu.memory_space<vmem>>, %arg6: memref<1x2xf32, #tpu.memory_space<vmem>>, %arg7: memref<2x2xf32, #tpu.memory_space<vmem>>, %arg8: memref<2x128xf32, #tpu.memory_space<vmem>>) attributes {dimension_semantics = [#tpu.dimension_semantics<parallel>, #tpu.dimension_semantics<arbitrary>], iteration_bounds = array<i64: 1, 8>, scalar_prefetch = 0 : i64, scratch_operands = 1 : i64, tpu.core_type = #tpu.core_type<tc>, window_params = [{transform_indices = @transform_0, window_bounds = array<i64: 2, 2048>}, {transform_indices = @transform_1, window_bounds = array<i64: 2048, 128>}, {pipeline_mode = #tpu.pipeline_mode<synchronous>, transform_indices = @transform_2, window_bounds = array<i64: 1, 128>}, {pipeline_mode = #tpu.pipeline_mode<synchronous>, transform_indices = @transform_3, window_bounds = array<i64: 128, 2>}, {pipeline_mode = #tpu.pipeline_mode<synchronous>, transform_indices = @transform_4, window_bounds = array<i64: 1, 2>}, {transform_indices = @transform_5, window_bounds = array<i64: 2, 2>}]} {
    %c0_i32 = arith.constant 0 : i32
    %0 = arith.cmpi eq, %arg1, %c0_i32 : i32
    %1 = arith.extui %0 : i1 to i32
    %c0_i32_0 = arith.constant 0 : i32
    %2 = arith.cmpi ne, %1, %c0_i32_0 : i32
    scf.if %2 {
      %cst_9 = arith.constant 0.000000e+00 : f32
      %12 = vector.broadcast %cst_9 : f32 to vector<2x128xf32>
      %c0_10 = arith.constant 0 : index
      %c0_11 = arith.constant 0 : index
      %13 = vector.load %arg8[%c0_10, %c0_11] : memref<2x128xf32, #tpu.memory_space<vmem>>, vector<2x128xf32>
      tpu.vector_store %arg8[%c0_10, %c0_11], %12 {strides = array<i32>} : memref<2x128xf32, #tpu.memory_space<vmem>>, vector<2x128xf32>,
    } else {
    }
    %c0 = arith.constant 0 : index
    %c0_1 = arith.constant 0 : index
    %3 = vector.load %arg8[%c0, %c0_1] : memref<2x128xf32, #tpu.memory_space<vmem>>, vector<2x128xf32>
    %c0_2 = arith.constant 0 : index
    %c0_3 = arith.constant 0 : index
    %4 = vector.load %arg2[%c0_2, %c0_3] : memref<2x2048xf32, #tpu.memory_space<vmem>>, vector<2x2048xf32>
    %c0_4 = arith.constant 0 : index
    %c0_5 = arith.constant 0 : index
    %5 = vector.load %arg3[%c0_4, %c0_5] : memref<2048x128xf32, #tpu.memory_space<vmem>>, vector<2048x128xf32>
    %cst = arith.constant dense<0.000000e+00> : vector<2x128xf32>
    %6 = tpu.matmul %4, %5, %cst {dimension_numbers = #tpu.dot_dimension_numbers<[1], [0], [0], [1], [0, 0, 1, 1], [], []>} : vector<2x2048xf32>, vector<2048x128xf32>, vector<2x128xf32> -> vector<2x128xf32>
    %7 = arith.addf %3, %6 : vector<2x128xf32>
    %c0_6 = arith.constant 0 : index
    %c0_7 = arith.constant 0 : index
    %8 = vector.load %arg8[%c0_6, %c0_7] : memref<2x128xf32, #tpu.memory_space<vmem>>, vector<2x128xf32>
    tpu.vector_store %arg8[%c0_6, %c0_7], %7 {strides = array<i32>} : memref<2x128xf32, #tpu.memory_space<vmem>>, vector<2x128xf32>,
    %c7_i32 = arith.constant 7 : i32
    %9 = arith.cmpi eq, %arg1, %c7_i32 : i32
    %10 = arith.extui %9 : i1 to i32
    %c0_i32_8 = arith.constant 0 : i32
    %11 = arith.cmpi ne, %10, %c0_i32_8 : i32
    scf.if %11 {
      %c0_9 = arith.constant 0 : index
      %c0_10 = arith.constant 0 : index
      %12 = vector.load %arg8[%c0_9, %c0_10] : memref<2x128xf32, #tpu.memory_space<vmem>>, vector<2x128xf32>
      %c0_11 = arith.constant 0 : index
      %c0_12 = arith.constant 0 : index
      %13 = vector.load %arg4[%c0_11, %c0_12] : memref<1x128xf32, #tpu.memory_space<vmem>>, vector<1x128xf32>
      %14 = vector.broadcast %13 : vector<1x128xf32> to vector<2x128xf32>
      %15 = arith.addf %12, %14 : vector<2x128xf32>
      %cst_13 = arith.constant 0.000000e+00 : f32
      %16 = vector.broadcast %cst_13 : f32 to vector<2x128xf32>
      %17 = arith.maximumf %15, %16 : vector<2x128xf32>
      %c0_14 = arith.constant 0 : index
      %c0_15 = arith.constant 0 : index
      %18 = vector.load %arg5[%c0_14, %c0_15] : memref<128x2xf32, #tpu.memory_space<vmem>>, vector<128x2xf32>
      %cst_16 = arith.constant dense<0.000000e+00> : vector<2x2xf32>
      %19 = tpu.matmul %17, %18, %cst_16 {dimension_numbers = #tpu.dot_dimension_numbers<[1], [0], [0], [1], [0, 0, 1, 1], [], []>} : vector<2x128xf32>, vector<128x2xf32>, vector<2x2xf32> -> vector<2x2xf32>
      %c0_17 = arith.constant 0 : index
      %c0_18 = arith.constant 0 : index
      %20 = vector.load %arg6[%c0_17, %c0_18] : memref<1x2xf32, #tpu.memory_space<vmem>>, vector<1x2xf32>
      %21 = vector.broadcast %20 : vector<1x2xf32> to vector<2x2xf32>
      %22 = arith.addf %19, %21 : vector<2x2xf32>
      %c0_19 = arith.constant 0 : index
      %c0_20 = arith.constant 0 : index
      %23 = vector.load %arg7[%c0_19, %c0_20] : memref<2x2xf32, #tpu.memory_space<vmem>>, vector<2x2xf32>
      tpu.vector_store %arg7[%c0_19, %c0_20], %22 {strides = array<i32>} : memref<2x2xf32, #tpu.memory_space<vmem>>, vector<2x2xf32>,
    } else {
    }
    return
  }
  func.func @transform_0(%arg0: i32, %arg1: i32) -> (i32, i32) {
    %c0_i32 = arith.constant 0 : i32
    return %arg0, %arg1 : i32, i32
  }
  func.func @transform_1(%arg0: i32, %arg1: i32) -> (i32, i32) {
    %c0_i32 = arith.constant 0 : i32
    %c0_i32_0 = arith.constant 0 : i32
    return %arg1, %c0_i32 : i32, i32
  }
  func.func @transform_2(%arg0: i32, %arg1: i32) -> (i32, i32) {
    %c0_i32 = arith.constant 0 : i32
    %c0_i32_0 = arith.constant 0 : i32
    %c0_i32_1 = arith.constant 0 : i32
    return %c0_i32, %c0_i32_0 : i32, i32
  }
  func.func @transform_3(%arg0: i32, %arg1: i32) -> (i32, i32) {
    %c0_i32 = arith.constant 0 : i32
    %c0_i32_0 = arith.constant 0 : i32
    %c0_i32_1 = arith.constant 0 : i32
    return %c0_i32, %c0_i32_0 : i32, i32
  }
  func.func @transform_4(%arg0: i32, %arg1: i32) -> (i32, i32) {
    %c0_i32 = arith.constant 0 : i32
    %c0_i32_0 = arith.constant 0 : i32
    %c0_i32_1 = arith.constant 0 : i32
    return %c0_i32, %c0_i32_0 : i32, i32
  }
  func.func @transform_5(%arg0: i32, %arg1: i32) -> (i32, i32) {
    %c0_i32 = arith.constant 0 : i32
    %c0_i32_0 = arith.constant 0 : i32
    return %arg0, %c0_i32 : i32, i32
  }
}

</mosaic_0001>

<bundles_post_ra>
// kernel: anime_cnn_forward.3
= control target key start
LH: loop header
LB: loop body
LE: loop exit
PB: predicated region body
PF: predicated region fallthrough
CT: control target
= control target key end

     0   :  { %s2821_s12 = smov 0   ;;  %s2823_s13 = smov 0   ;;  %s3562_s0 = inlined_call_operand.vmem [shape: f32[2,4096,27], index: 0, kind: input, shape index: {}]   ;;  %s3563_s1 = inlined_call_operand.vmem [shape: f32[27,32], index: 1, kind: input, shape index: {}]   ;;  %s3564_s2 = inlined_call_operand.vmem [shape: f32[1,32], index: 2, kind: input, shape index: {}]   ;;  %s3565_s3 = inlined_call_operand.vmem [shape: f32[2,1024,32], index: 3, kind: output, shape index: {}]  }
   0x1   :  { %s2825_s14 = smov 0   ;;  %s2827_s15 = smov 0  }
   0x2   :  { %s2829_s16 = smov 0  }
   0x3 LB: > { %s22_s17 = sadd.s32 1, %s2791_s14  ;;  %s25_s18 = sadd.s32 1, %s2795_s15  ;;  %s2799_s16 = sphi %s2829_s16, %s13_s16   ;;  %s2795_s15 = sphi %s2827_s15, %s3570_s15   ;;  %s2791_s14 = sphi %s2825_s14, %s3569_s14   ;;  %s2787_s13 = sphi %s2823_s13, %s3568_s13   ;;  %s2783_s12 = sphi %s2821_s12, %s3567_s12  }
   0x4   : > { %p23_p0 = scmp.ge.s32.totalorder %s22_s17, 4  ;;  %p2241_p1 = scmp.ge.s32.totalorder %s2799_s16, 1 }
   0x5   : > { %p158_p2 = scmp.lt.s32.totalorder %s2799_s16, 9 }
   0x6   : > { %s3572_s17 = smov (%p23_p0, %s22_s17), 0  ;;  %s3574_s18 = smov (!%p23_p0, %s25_s18), %s2795_s15 }
   0x7   : > { %p159_p3 = pnand %p2241_p1, %p158_p2  ;;  %p27_p4 = scmp.ge.s32.totalorder %s3574_s18, 2 }
   0x8   : > { %s2242_s23 = sshll.u32 (!%p159_p3), %s2783_s12, 7  ;;  %p191_p5 = scmp.lt.s32.totalorder (!%p159_p3), %s2787_s13, 1 }
   0x9   : > { %s3576_s18 = smov (%p27_p4, %s3574_s18), 0  ;;  %162 = sbr.rel (%p159_p3) target bundleno = 369 (0x171), region = 32 }
   0xa   : > { %p193_p6 = scmp.lt.s32.totalorder (!%p159_p3), %s2242_s23, 511  ;;  %s2245_s9 = sshll.u32 (!%p159_p3), %s2783_s12, 5 }
   0xb   : > { %p3186_p7 = scmp.lt.s32.totalorder (!%p159_p3), %s2245_s9, 127 }
   0xe   : > { %v341_v0 = vld [vmem:[%s3563_s1 + $0x18] sm:$0x7]  ;;  %vm734_vm0 = vcmask 1042432   ;;  %v340_v1 = vld [vmem:[%s3563_s1 + $0x10] sm:$0xff]  ;;  %v339_v2 = vld [vmem:[%s3563_s1 + $0x8] sm:$0xff]  ;;  %s3578_s13 = smov (!%p191_p5, %s2787_s13), 1 }
   0xf   : > { %2512 = vmatprep.subr.msk.mxu0 %vm734_vm0, %v341_v0  ;;  %2712 = vmatprep.subr.msk.mxu1 %vm734_vm0, %v341_v0  ;;  %v338_v3 = vld [vmem:[%s3563_s1] sm:$0xff]  ;;  %s3580_s23 = smov (!%p193_p6, %s2242_s23), 511  ;;  %s2243_s28 = sshll.u32 %s3578_s13, 9  ;;  %vm349_vm1 = vcmask 220160   ;;  %vm1571_vm2 = vcmask 261120  }
  0x10   : > { %2513 = vmatpush3.msk.msra.mxu0 %vm734_vm0, %v341_v0  ;;  %2716 = vmatpush3.msk.msra.mxu1 %vm734_vm0, %v341_v0  ;;  %s196_s29 = sadd.s32 %s2243_s28, %s3580_s23  ;;  %s3582_s9 = smov (!%p3186_p7, %s2245_s9), 127 }
  0x11   : > { %2514 = vmatprep.subr.mxu0 %v340_v1  ;;  %2713 = vmatprep.subr.mxu1 %v340_v1  ;;  %s2244_s30 = sshll.u32 %s196_s29, 3  ;;  %s2246_s11 = sshll.u32 %s3578_s13, 7 }
  0x12   : > { %2515 = vmatpush3.msra.mxu0 %v340_v1  ;;  %2717 = vmatpush3.msra.mxu1 %v340_v1  ;;  %s2872_s6 = scalar_lea.vmem %s3562_s0, %s2244_s30  ;;  %s3214_s12 = sadd.s32 %s2246_s11, %s3582_s9 }
  0x13   : > { %2516 = vmatprep.subr.mxu0 %v339_v2  ;;  %2714 = vmatprep.subr.mxu1 %v339_v2  ;;  %v210_v4 = vld [vmem:[%s2872_s6] sm:$0xff]  ;;  %v211_v6 = vld [vmem:[%s2872_s6 + $0x8] sm:$0xff]  ;;  %v212_v8 = vld [vmem:[%s2872_s6 + $0x10] sm:$0xff]  ;;  %s2247_s13 = sshll.u32 %s3214_s12, 3 }
  0x14   : > { %2517 = vmatpush3.msra.mxu0 %v339_v2  ;;  %2718 = vmatpush3.msra.mxu1 %v339_v2  ;;  %v274_v5 = vld [vmem:[%s2872_s6 + $0x200] sm:$0xff]  ;;  %v275_v7 = vld [vmem:[%s2872_s6 + $0x208] sm:$0xff]  ;;  %v276_v9 = vld [vmem:[%s2872_s6 + $0x210] sm:$0xff]  ;;  %s3242_s21 = scalar_lea.vmem %s3565_s3, %s2247_s13 }
  0x15   : > { %2518 = vmatprep.subr.mxu0 %v338_v3  ;;  %2715 = vmatprep.subr.mxu1 %v338_v3  ;;  %v213_v10 = vld [vmem:[%s2872_s6 + $0x18] sm:$0xff]  ;;  %v214_v12 = vld [vmem:[%s2872_s6 + $0x20] sm:$0xff]  ;;  %v215_v14 = vld [vmem:[%s2872_s6 + $0x28] sm:$0xff] }
  0x16   : > { %2519 = vmatpush3.msra.mxu0 %v338_v3  ;;  %2719 = vmatpush3.msra.mxu1 %v338_v3  ;;  %v277_v11 = vld [vmem:[%s2872_s6 + $0x218] sm:$0xff]  ;;  %v278_v13 = vld [vmem:[%s2872_s6 + $0x220] sm:$0xff]  ;;  %v279_v15 = vld [vmem:[%s2872_s6 + $0x228] sm:$0xff] }
  0x17   : > { %2520 = vmatprep.mubr.msk.f32.mxu0 %vm349_vm1, %v210_v4  ;;  %2616 = vmatprep.mubr.msk.f32.mxu1 %vm349_vm1, %v274_v5  ;;  %v216_v16 = vld [vmem:[%s2872_s6 + $0x30] sm:$0xff]  ;;  %v217_v18 = vld [vmem:[%s2872_s6 + $0x38] sm:$0xff]  ;;  %v218_v20 = vld [vmem:[%s2872_s6 + $0x40] sm:$0xff] }
  0x18   : > { %2521 = vmatmul.mubr.msk.f32.vlgmr.msra.gmra.mxu0 %vm349_vm1, %v211_v6  ;;  %2617 = vmatmul.mubr.msk.f32.vlgmr.msra.gmra.mxu1 %vm349_vm1, %v275_v7  ;;  %v280_v17 = vld [vmem:[%s2872_s6 + $0x230] sm:$0xff]  ;;  %v281_v19 = vld [vmem:[%s2872_s6 + $0x238] sm:$0xff]  ;;  %v282_v21 = vld [vmem:[%s2872_s6 + $0x240] sm:$0xff] }
  0x19   : > { %2523 = vmatprep.mubr.msk.f32.mxu0 %vm349_vm1, %v212_v8  ;;  %2619 = vmatprep.mubr.msk.f32.mxu1 %vm349_vm1, %v276_v9  ;;  %v219_v22 = vld [vmem:[%s2872_s6 + $0x48] sm:$0xff]  ;;  %v220_v24 = vld [vmem:[%s2872_s6 + $0x50] sm:$0xff]  ;;  %v221_v26 = vld [vmem:[%s2872_s6 + $0x58] sm:$0xff] }
  0x1a   : > { %v283_v23 = vld [vmem:[%s2872_s6 + $0x248] sm:$0xff]  ;;  %v284_v25 = vld [vmem:[%s2872_s6 + $0x250] sm:$0xff]  ;;  %v285_v27 = vld [vmem:[%s2872_s6 + $0x258] sm:$0xff] }
  0x1b   : > { %v222_v28 = vld [vmem:[%s2872_s6 + $0x60] sm:$0xff]  ;;  %v223_v30 = vld [vmem:[%s2872_s6 + $0x68] sm:$0xff]  ;;  %v224_v32 = vld [vmem:[%s2872_s6 + $0x70] sm:$0xff] }
  0x1c   : > { %2524 = vmatmul.mubr.msk.f32.gmra.mxu0 %vm349_vm1, %v213_v10  ;;  %2620 = vmatmul.mubr.msk.f32.gmra.mxu1 %vm349_vm1, %v277_v11  ;;  %v286_v29 = vld [vmem:[%s2872_s6 + $0x260] sm:$0xff]  ;;  %v287_v31 = vld [vmem:[%s2872_s6 + $0x268] sm:$0xff]  ;;  %v288_v33 = vld [vmem:[%s2872_s6 + $0x270] sm:$0xff] }
  0x1d   : > { %2526 = vmatprep.mubr.msk.f32.mxu0 %vm349_vm1, %v214_v12  ;;  %2622 = vmatprep.mubr.msk.f32.mxu1 %vm349_vm1, %v278_v13  ;;  %v225_v34 = vld [vmem:[%s2872_s6 + $0x78] sm:$0xff]  ;;  %v226_v36 = vld [vmem:[%s2872_s6 + $0x80] sm:$0xff]  ;;  %v227_v38 = vld [vmem:[%s2872_s6 + $0x88] sm:$0xff] }
  0x1e   : > { %v289_v35 = vld [vmem:[%s2872_s6 + $0x278] sm:$0xff]  ;;  %v290_v37 = vld [vmem:[%s2872_s6 + $0x280] sm:$0xff]  ;;  %v291_v39 = vld [vmem:[%s2872_s6 + $0x288] sm:$0xff] }
  0x1f   : > { %v228_v40 = vld [vmem:[%s2872_s6 + $0x90] sm:$0xff]  ;;  %v229_v42 = vld [vmem:[%s2872_s6 + $0x98] sm:$0xff]  ;;  %v230_v44 = vld [vmem:[%s2872_s6 + $0xa0] sm:$0xff] }
  0x20   : > { %2527 = vmatmul.mubr.msk.f32.gmra.mxu0 %vm349_vm1, %v215_v14  ;;  %2623 = vmatmul.mubr.msk.f32.gmra.mxu1 %vm349_vm1, %v279_v15  ;;  %v292_v41 = vld [vmem:[%s2872_s6 + $0x290] sm:$0xff]  ;;  %v293_v43 = vld [vmem:[%s2872_s6 + $0x298] sm:$0xff]  ;;  %v294_v45 = vld [vmem:[%s2872_s6 + $0x2a0] sm:$0xff] }
  0x21   : > { %2529 = vmatprep.mubr.msk.f32.mxu0 %vm349_vm1, %v216_v16  ;;  %2625 = vmatprep.mubr.msk.f32.mxu1 %vm349_vm1, %v280_v17  ;;  %v231_v46 = vld [vmem:[%s2872_s6 + $0xa8] sm:$0xff]  ;;  %v232_v48 = vld [vmem:[%s2872_s6 + $0xb0] sm:$0xff]  ;;  %v233_v50 = vld [vmem:[%s2872_s6 + $0xb8] sm:$0xff] }
  0x22   : > { %v295_v47 = vld [vmem:[%s2872_s6 + $0x2a8] sm:$0xff]  ;;  %v296_v49 = vld [vmem:[%s2872_s6 + $0x2b0] sm:$0xff]  ;;  %v297_v51 = vld [vmem:[%s2872_s6 + $0x2b8] sm:$0xff] }
  0x23   : > { %v234_v52 = vld [vmem:[%s2872_s6 + $0xc0] sm:$0xff]  ;;  %v235_v54 = vld [vmem:[%s2872_s6 + $0xc8] sm:$0xff]  ;;  %v236_v56 = vld [vmem:[%s2872_s6 + $0xd0] sm:$0xff] }
  0x24   : > { %2530 = vmatmul.mubr.msk.f32.gmra.mxu0 %vm349_vm1, %v217_v18  ;;  %2626 = vmatmul.mubr.msk.f32.gmra.mxu1 %vm349_vm1, %v281_v19  ;;  %v298_v53 = vld [vmem:[%s2872_s6 + $0x2c0] sm:$0xff]  ;;  %v299_v55 = vld [vmem:[%s2872_s6 + $0x2c8] sm:$0xff]  ;;  %v300_v57 = vld [vmem:[%s2872_s6 + $0x2d0] sm:$0xff] }
  0x25   : > { %2532 = vmatprep.mubr.msk.f32.mxu0 %vm349_vm1, %v218_v20  ;;  %2628 = vmatprep.mubr.msk.f32.mxu1 %vm349_vm1, %v282_v21  ;;  %v237_v58 = vld [vmem:[%s2872_s6 + $0xd8] sm:$0xff]  ;;  %v238_v60 = vld [vmem:[%s2872_s6 + $0xe0] sm:$0xff]  ;;  %v239_v62 = vld [vmem:[%s2872_s6 + $0xe8] sm:$0xff] }
  0x26   : > { %v301_v59 = vld [vmem:[%s2872_s6 + $0x2d8] sm:$0xff]  ;;  %v302_v61 = vld [vmem:[%s2872_s6 + $0x2e0] sm:$0xff]  ;;  %v303_v63 = vld [vmem:[%s2872_s6 + $0x2e8] sm:$0xff] }
  0x27   : > { %v240_v0 = vld [vmem:[%s2872_s6 + $0xf0] sm:$0xff]  ;;  %v241_v2 = vld [vmem:[%s2872_s6 + $0xf8] sm:$0xff]  ;;  %v242_v4 = vld [vmem:[%s2872_s6 + $0x100] sm:$0xff] }
  0x28   : > { %2533 = vmatmul.mubr.msk.f32.gmra.mxu0 %vm349_vm1, %v219_v22  ;;  %2629 = vmatmul.mubr.msk.f32.gmra.mxu1 %vm349_vm1, %v283_v23  ;;  %v304_v1 = vld [vmem:[%s2872_s6 + $0x2f0] sm:$0xff]  ;;  %v305_v3 = vld [vmem:[%s2872_s6 + $0x2f8] sm:$0xff]  ;;  %v306_v5 = vld [vmem:[%s2872_s6 + $0x300] sm:$0xff] }
  0x29   : > { %2535 = vmatprep.mubr.msk.f32.mxu0 %vm349_vm1, %v220_v24  ;;  %2631 = vmatprep.mubr.msk.f32.mxu1 %vm349_vm1, %v284_v25  ;;  %v243_v6 = vld [vmem:[%s2872_s6 + $0x108] sm:$0xff]  ;;  %v244_v8 = vld [vmem:[%s2872_s6 + $0x110] sm:$0xff]  ;;  %v245_v10 = vld [vmem:[%s2872_s6 + $0x118] sm:$0xff] }
  0x2a   : > { %v307_v7 = vld [vmem:[%s2872_s6 + $0x308] sm:$0xff]  ;;  %v308_v9 = vld [vmem:[%s2872_s6 + $0x310] sm:$0xff]  ;;  %v309_v11 = vld [vmem:[%s2872_s6 + $0x318] sm:$0xff] }
  0x2b   : > { %v246_v12 = vld [vmem:[%s2872_s6 + $0x120] sm:$0xff]  ;;  %v247_v14 = vld [vmem:[%s2872_s6 + $0x128] sm:$0xff]  ;;  %v248_v16 = vld [vmem:[%s2872_s6 + $0x130] sm:$0xff] }
  0x2c   : > { %2536 = vmatmul.mubr.msk.f32.gmra.mxu0 %vm349_vm1, %v221_v26  ;;  %2632 = vmatmul.mubr.msk.f32.gmra.mxu1 %vm349_vm1, %v285_v27  ;;  %v310_v13 = vld [vmem:[%s2872_s6 + $0x320] sm:$0xff]  ;;  %v311_v15 = vld [vmem:[%s2872_s6 + $0x328] sm:$0xff]  ;;  %v312_v17 = vld [vmem:[%s2872_s6 + $0x330] sm:$0xff] }
  0x2d   : > { %2538 = vmatprep.mubr.msk.f32.mxu0 %vm349_vm1, %v222_v28  ;;  %2634 = vmatprep.mubr.msk.f32.mxu1 %vm349_vm1, %v286_v29  ;;  %v249_v18 = vld [vmem:[%s2872_s6 + $0x138] sm:$0xff]  ;;  %v250_v20 = vld [vmem:[%s2872_s6 + $0x140] sm:$0xff]  ;;  %v251_v22 = vld [vmem:[%s2872_s6 + $0x148] sm:$0xff] }
  0x2e   : > { %v313_v19 = vld [vmem:[%s2872_s6 + $0x338] sm:$0xff]  ;;  %v314_v21 = vld [vmem:[%s2872_s6 + $0x340] sm:$0xff]  ;;  %v315_v23 = vld [vmem:[%s2872_s6 + $0x348] sm:$0xff] }
  0x2f   : > { %v252_v24 = vld [vmem:[%s2872_s6 + $0x150] sm:$0xff]  ;;  %v253_v26 = vld [vmem:[%s2872_s6 + $0x158] sm:$0xff]  ;;  %v254_v28 = vld [vmem:[%s2872_s6 + $0x160] sm:$0xff] }
  0x30   : > { %2539 = vmatmul.mubr.msk.f32.gmra.mxu0 %vm349_vm1, %v223_v30  ;;  %2635 = vmatmul.mubr.msk.f32.gmra.mxu1 %vm349_vm1, %v287_v31  ;;  %v316_v25 = vld [vmem:[%s2872_s6 + $0x350] sm:$0xff]  ;;  %v317_v27 = vld [vmem:[%s2872_s6 + $0x358] sm:$0xff]  ;;  %v318_v29 = vld [vmem:[%s2872_s6 + $0x360] sm:$0xff] }
  0x31   : > { %2541 = vmatprep.mubr.msk.f32.mxu0 %vm349_vm1, %v224_v32  ;;  %2637 = vmatprep.mubr.msk.f32.mxu1 %vm349_vm1, %v288_v33  ;;  %v255_v30 = vld [vmem:[%s2872_s6 + $0x168] sm:$0xff]  ;;  %v256_v32 = vld [vmem:[%s2872_s6 + $0x170] sm:$0xff] }
  0x32   : > { %v319_v31 = vld [vmem:[%s2872_s6 + $0x368] sm:$0xff]  ;;  %v320_v33 = vld [vmem:[%s2872_s6 + $0x370] sm:$0xff] }
  0x34   : > { %2542 = vmatmul.mubr.msk.f32.gmra.mxu0 %vm349_vm1, %v225_v34  ;;  %2638 = vmatmul.mubr.msk.f32.gmra.mxu1 %vm349_vm1, %v289_v35  ;;  %v257_v34 = vld [vmem:[%s2872_s6 + $0x178] sm:$0xff] }
  0x35   : > { %2544 = vmatprep.mubr.msk.f32.mxu0 %vm349_vm1, %v226_v36  ;;  %2640 = vmatprep.mubr.msk.f32.mxu1 %vm349_vm1, %v290_v37  ;;  %v321_v35 = vld [vmem:[%s2872_s6 + $0x378] sm:$0xff]  ;;  %v258_v36 = vld [vmem:[%s2872_s6 + $0x180] sm:$0xff] }
  0x36   : > { %v322_v37 = vld [vmem:[%s2872_s6 + $0x380] sm:$0xff] }
  0x38   : > { %2545 = vmatmul.mubr.msk.f32.gmra.mxu0 %vm349_vm1, %v227_v38  ;;  %2641 = vmatmul.mubr.msk.f32.gmra.mxu1 %vm349_vm1, %v291_v39  ;;  %v259_v38 = vld [vmem:[%s2872_s6 + $0x188] sm:$0xff] }
  0x39   : > { %2547 = vmatprep.mubr.msk.f32.mxu0 %vm349_vm1, %v228_v40  ;;  %2643 = vmatprep.mubr.msk.f32.mxu1 %vm349_vm1, %v292_v41  ;;  %v323_v39 = vld [vmem:[%s2872_s6 + $0x388] sm:$0xff]  ;;  %v260_v40 = vld [vmem:[%s2872_s6 + $0x190] sm:$0xff] }
  0x3a   : > { %v324_v41 = vld [vmem:[%s2872_s6 + $0x390] sm:$0xff] }
  0x3c   : > { %2548 = vmatmul.mubr.msk.f32.gmra.mxu0 %vm349_vm1, %v229_v42  ;;  %2644 = vmatmul.mubr.msk.f32.gmra.mxu1 %vm349_vm1, %v293_v43  ;;  %v261_v42 = vld [vmem:[%s2872_s6 + $0x198] sm:$0xff] }
  0x3d   : > { %2550 = vmatprep.mubr.msk.f32.mxu0 %vm349_vm1, %v230_v44  ;;  %2646 = vmatprep.mubr.msk.f32.mxu1 %vm349_vm1, %v294_v45  ;;  %v325_v43 = vld [vmem:[%s2872_s6 + $0x398] sm:$0xff]  ;;  %v262_v44 = vld [vmem:[%s2872_s6 + $0x1a0] sm:$0xff] }
  0x3e   : > { %v326_v45 = vld [vmem:[%s2872_s6 + $0x3a0] sm:$0xff] }
  0x40   : > { %2551 = vmatmul.mubr.msk.f32.gmra.mxu0 %vm349_vm1, %v231_v46  ;;  %2647 = vmatmul.mubr.msk.f32.gmra.mxu1 %vm349_vm1, %v295_v47  ;;  %v263_v46 = vld [vmem:[%s2872_s6 + $0x1a8] sm:$0xff] }
  0x41   : > { %2553 = vmatprep.mubr.msk.f32.mxu0 %vm349_vm1, %v232_v48  ;;  %2649 = vmatprep.mubr.msk.f32.mxu1 %vm349_vm1, %v296_v49  ;;  %v327_v47 = vld [vmem:[%s2872_s6 + $0x3a8] sm:$0xff]  ;;  %v264_v48 = vld [vmem:[%s2872_s6 + $0x1b0] sm:$0xff] }
  0x42   : > { %v328_v49 = vld [vmem:[%s2872_s6 + $0x3b0] sm:$0xff] }
  0x44   : > { %2554 = vmatmul.mubr.msk.f32.gmra.mxu0 %vm349_vm1, %v233_v50  ;;  %2650 = vmatmul.mubr.msk.f32.gmra.mxu1 %vm349_vm1, %v297_v51  ;;  %v265_v50 = vld [vmem:[%s2872_s6 + $0x1b8] sm:$0xff] }
  0x45   : > { %2556 = vmatprep.mubr.msk.f32.mxu0 %vm349_vm1, %v234_v52  ;;  %2652 = vmatprep.mubr.msk.f32.mxu1 %vm349_vm1, %v298_v53  ;;  %v329_v51 = vld [vmem:[%s2872_s6 + $0x3b8] sm:$0xff]  ;;  %v266_v52 = vld [vmem:[%s2872_s6 + $0x1c0] sm:$0xff] }
  0x46   : > { %v330_v53 = vld [vmem:[%s2872_s6 + $0x3c0] sm:$0xff] }
  0x48   : > { %2557 = vmatmul.mubr.msk.f32.gmra.mxu0 %vm349_vm1, %v235_v54  ;;  %2653 = vmatmul.mubr.msk.f32.gmra.mxu1 %vm349_vm1, %v299_v55  ;;  %v267_v54 = vld [vmem:[%s2872_s6 + $0x1c8] sm:$0xff] }
  0x49   : > { %2559 = vmatprep.mubr.msk.f32.mxu0 %vm349_vm1, %v236_v56  ;;  %2655 = vmatprep.mubr.msk.f32.mxu1 %vm349_vm1, %v300_v57  ;;  %v331_v55 = vld [vmem:[%s2872_s6 + $0x3c8] sm:$0xff]  ;;  %v268_v56 = vld [vmem:[%s2872_s6 + $0x1d0] sm:$0xff] }
  0x4a   : > { %v332_v57 = vld [vmem:[%s2872_s6 + $0x3d0] sm:$0xff] }
  0x4c   : > { %2560 = vmatmul.mubr.msk.f32.gmra.mxu0 %vm349_vm1, %v237_v58  ;;  %2656 = vmatmul.mubr.msk.f32.gmra.mxu1 %vm349_vm1, %v301_v59  ;;  %v269_v58 = vld [vmem:[%s2872_s6 + $0x1d8] sm:$0xff] }
  0x4d   : > { %2562 = vmatprep.mubr.msk.f32.mxu0 %vm349_vm1, %v238_v60  ;;  %2658 = vmatprep.mubr.msk.f32.mxu1 %vm349_vm1, %v302_v61  ;;  %v333_v59 = vld [vmem:[%s2872_s6 + $0x3d8] sm:$0xff]  ;;  %v270_v60 = vld [vmem:[%s2872_s6 + $0x1e0] sm:$0xff] }
  0x4e   : > { %v334_v61 = vld [vmem:[%s2872_s6 + $0x3e0] sm:$0xff] }
  0x50   : > { %2563 = vmatmul.mubr.msk.f32.gmra.mxu0 %vm349_vm1, %v239_v62  ;;  %2659 = vmatmul.mubr.msk.f32.gmra.mxu1 %vm349_vm1, %v303_v63  ;;  %v271_v62 = vld [vmem:[%s2872_s6 + $0x1e8] sm:$0xff] }
  0x51   : > { %2565 = vmatprep.mubr.msk.f32.mxu0 %vm349_vm1, %v240_v0  ;;  %2661 = vmatprep.mubr.msk.f32.mxu1 %vm349_vm1, %v304_v1  ;;  %v335_v63 = vld [vmem:[%s2872_s6 + $0x3e8] sm:$0xff]  ;;  %v272_v0 = vld [vmem:[%s2872_s6 + $0x1f0] sm:$0xff] }
  0x52   : > { %v336_v1 = vld [vmem:[%s2872_s6 + $0x3f0] sm:$0xff] }
  0x54   : > { %2566 = vmatmul.mubr.msk.f32.gmra.mxu0 %vm349_vm1, %v241_v2  ;;  %2662 = vmatmul.mubr.msk.f32.gmra.mxu1 %vm349_vm1, %v305_v3  ;;  %v273_v2 = vld [vmem:[%s2872_s6 + $0x1f8] sm:$0xff] }
  0x55   : > { %2568 = vmatprep.mubr.msk.f32.mxu0 %vm349_vm1, %v242_v4  ;;  %2664 = vmatprep.mubr.msk.f32.mxu1 %vm349_vm1, %v306_v5  ;;  %v337_v3 = vld [vmem:[%s2872_s6 + $0x3f8] sm:$0xff]  ;;  %v3133_v4 = vld [vmem:[%s3564_s2] ss:$0 sm:$0xff] }
  0x58   : > { %2569 = vmatmul.mubr.msk.f32.gmra.mxu0 %vm349_vm1, %v243_v6  ;;  %2665 = vmatmul.mubr.msk.f32.gmra.mxu1 %vm349_vm1, %v307_v7 }
  0x59   : > { %2571 = vmatprep.mubr.msk.f32.mxu0 %vm349_vm1, %v244_v8  ;;  %2667 = vmatprep.mubr.msk.f32.mxu1 %vm349_vm1, %v308_v9 }
  0x5c   : > { %2572 = vmatmul.mubr.msk.f32.gmra.mxu0 %vm349_vm1, %v245_v10  ;;  %2668 = vmatmul.mubr.msk.f32.gmra.mxu1 %vm349_vm1, %v309_v11 }
  0x5d   : > { %2574 = vmatprep.mubr.msk.f32.mxu0 %vm349_vm1, %v246_v12  ;;  %2670 = vmatprep.mubr.msk.f32.mxu1 %vm349_vm1, %v310_v13 }
  0x60   : > { %2575 = vmatmul.mubr.msk.f32.gmra.mxu0 %vm349_vm1, %v247_v14  ;;  %2671 = vmatmul.mubr.msk.f32.gmra.mxu1 %vm349_vm1, %v311_v15 }
  0x61   : > { %2577 = vmatprep.mubr.msk.f32.mxu0 %vm349_vm1, %v248_v16  ;;  %2673 = vmatprep.mubr.msk.f32.mxu1 %vm349_vm1, %v312_v17 }
  0x64   : > { %2578 = vmatmul.mubr.msk.f32.gmra.mxu0 %vm349_vm1, %v249_v18  ;;  %2674 = vmatmul.mubr.msk.f32.gmra.mxu1 %vm349_vm1, %v313_v19 }
  0x65   : > { %2580 = vmatprep.mubr.msk.f32.mxu0 %vm349_vm1, %v250_v20  ;;  %2676 = vmatprep.mubr.msk.f32.mxu1 %vm349_vm1, %v314_v21 }
  0x68   : > { %2581 = vmatmul.mubr.msk.f32.gmra.mxu0 %vm349_vm1, %v251_v22  ;;  %2677 = vmatmul.mubr.msk.f32.gmra.mxu1 %vm349_vm1, %v315_v23 }
  0x69   : > { %2583 = vmatprep.mubr.msk.f32.mxu0 %vm349_vm1, %v252_v24  ;;  %2679 = vmatprep.mubr.msk.f32.mxu1 %vm349_vm1, %v316_v25 }
  0x6c   : > { %2584 = vmatmul.mubr.msk.f32.gmra.mxu0 %vm349_vm1, %v253_v26  ;;  %2680 = vmatmul.mubr.msk.f32.gmra.mxu1 %vm349_vm1, %v317_v27 }
  0x6d   : > { %2586 = vmatprep.mubr.msk.f32.mxu0 %vm349_vm1, %v254_v28  ;;  %2682 = vmatprep.mubr.msk.f32.mxu1 %vm349_vm1, %v318_v29 }
  0x70   : > { %2587 = vmatmul.mubr.msk.f32.gmra.mxu0 %vm349_vm1, %v255_v30  ;;  %2683 = vmatmul.mubr.msk.f32.gmra.mxu1 %vm349_vm1, %v319_v31 }
  0x71   : > { %2589 = vmatprep.mubr.msk.f32.mxu0 %vm349_vm1, %v256_v32  ;;  %2685 = vmatprep.mubr.msk.f32.mxu1 %vm349_vm1, %v320_v33 }
  0x74   : > { %2590 = vmatmul.mubr.msk.f32.gmra.mxu0 %vm349_vm1, %v257_v34  ;;  %2686 = vmatmul.mubr.msk.f32.gmra.mxu1 %vm349_vm1, %v321_v35 }
  0x75   : > { %2592 = vmatprep.mubr.msk.f32.mxu0 %vm349_vm1, %v258_v36  ;;  %2688 = vmatprep.mubr.msk.f32.mxu1 %vm349_vm1, %v322_v37 }
  0x78   : > { %2593 = vmatmul.mubr.msk.f32.gmra.mxu0 %vm349_vm1, %v259_v38  ;;  %2689 = vmatmul.mubr.msk.f32.gmra.mxu1 %vm349_vm1, %v323_v39 }
  0x79   : > { %2595 = vmatprep.mubr.msk.f32.mxu0 %vm349_vm1, %v260_v40  ;;  %2691 = vmatprep.mubr.msk.f32.mxu1 %vm349_vm1, %v324_v41 }
  0x7c   : > { %2596 = vmatmul.mubr.msk.f32.gmra.mxu0 %vm349_vm1, %v261_v42  ;;  %2692 = vmatmul.mubr.msk.f32.gmra.mxu1 %vm349_vm1, %v325_v43 }
  0x7d   : > { %2598 = vmatprep.mubr.msk.f32.mxu0 %vm349_vm1, %v262_v44  ;;  %2694 = vmatprep.mubr.msk.f32.mxu1 %vm349_vm1, %v326_v45 }
  0x80   : > { %2599 = vmatmul.mubr.msk.f32.gmra.mxu0 %vm349_vm1, %v263_v46  ;;  %2695 = vmatmul.mubr.msk.f32.gmra.mxu1 %vm349_vm1, %v327_v47 }
  0x81   : > { %2601 = vmatprep.mubr.msk.f32.mxu0 %vm349_vm1, %v264_v48  ;;  %2697 = vmatprep.mubr.msk.f32.mxu1 %vm349_vm1, %v328_v49 }
  0x84   : > { %2602 = vmatmul.mubr.msk.f32.gmra.mxu0 %vm349_vm1, %v265_v50  ;;  %2698 = vmatmul.mubr.msk.f32.gmra.mxu1 %vm349_vm1, %v329_v51 }
  0x85   : > { %2604 = vmatprep.mubr.msk.f32.mxu0 %vm349_vm1, %v266_v52  ;;  %2700 = vmatprep.mubr.msk.f32.mxu1 %vm349_vm1, %v330_v53 }
  0x88   : > { %2605 = vmatmul.mubr.msk.f32.gmra.mxu0 %vm349_vm1, %v267_v54  ;;  %2701 = vmatmul.mubr.msk.f32.gmra.mxu1 %vm349_vm1, %v331_v55 }
  0x89   : > { %2607 = vmatprep.mubr.msk.f32.mxu0 %vm349_vm1, %v268_v56  ;;  %2703 = vmatprep.mubr.msk.f32.mxu1 %vm349_vm1, %v332_v57 }
  0x8c   : > { %2608 = vmatmul.mubr.msk.f32.gmra.mxu0 %vm349_vm1, %v269_v58  ;;  %2704 = vmatmul.mubr.msk.f32.gmra.mxu1 %vm349_vm1, %v333_v59 }
  0x8d   : > { %2610 = vmatprep.mubr.msk.f32.mxu0 %vm349_vm1, %v270_v60  ;;  %2706 = vmatprep.mubr.msk.f32.mxu1 %vm349_vm1, %v334_v61 }
  0x90   : > { %2611 = vmatmul.mubr.msk.f32.gmra.mxu0 %vm349_vm1, %v271_v62  ;;  %2707 = vmatmul.mubr.msk.f32.gmra.mxu1 %vm349_vm1, %v335_v63 }
  0x91   : > { %2613 = vmatprep.mubr.msk.f32.mxu0 %vm349_vm1, %v272_v0  ;;  %2709 = vmatprep.mubr.msk.f32.mxu1 %vm349_vm1, %v336_v1 }
  0x94   : > { %2614 = vmatmul.mubr.msk.f32.gmra.mxu0 %vm349_vm1, %v273_v2  ;;  %2710 = vmatmul.mubr.msk.f32.gmra.mxu1 %vm349_vm1, %v337_v3 }
  0xd8   : > { %v2522_v5 = vpop.f32.mrf.mxu0  ;;  %v2618_v6 = vpop.f32.mrf.mxu1 }
  0xd9   : > { %v810_v7 = vadd.f32 %v2522_v5, %v3133_v4  ;;  %v1130_v8 = vadd.f32 %v2618_v6, %v3133_v4 }
  0xda   : > { %v804_v9 = vpop.f32.mrf.mxu0  ;;  %v1124_v10 = vpop.f32.mrf.mxu1 }
  0xdb   : > { %v1444_v11 = vmax.f32 %v810_v7, 0.0  ;;  %v1508_v12 = vmax.f32 %v1130_v8, 0.0  ;;  %v805_v13 = vadd.f32 %v3133_v4, %v804_v9  ;;  %v1125_v14 = vadd.f32 %v3133_v4, %v1124_v10 }
  0xdc   : > { %v2525_v15 = vpop.f32.mrf.mxu0  ;;  %v2621_v16 = vpop.f32.mrf.mxu1 }
  0xdd   : > { %1573 = vst.msk [vmem:[#allocation2 + $0x8] sm:$0xff] %vm1571_vm2, %v1444_v11  ;;  %1637 = vst.msk [vmem:[#allocation2 + $0x208] sm:$0xff] %vm1571_vm2, %v1508_v12  ;;  %v1443_v17 = vmax.f32 %v805_v13, 0.0  ;;  %v1507_v18 = vmax.f32 %v1125_v14, 0.0  ;;  %v820_v19 = vadd.f32 %v2525_v15, %v3133_v4  ;;  %v1140_v20 = vadd.f32 %v2621_v16, %v3133_v4 }
  0xde   : > { %v814_v21 = vpop.f32.mrf.mxu0  ;;  %v1134_v22 = vpop.f32.mrf.mxu1 }
  0xdf   : > { %1572 = vst.msk [vmem:[#allocation2] sm:$0xff] %vm1571_vm2, %v1443_v17  ;;  %1636 = vst.msk [vmem:[#allocation2 + $0x200] sm:$0xff] %vm1571_vm2, %v1507_v18  ;;  %v1446_v23 = vmax.f32 %v820_v19, 0.0  ;;  %v1510_v24 = vmax.f32 %v1140_v20, 0.0  ;;  %v815_v25 = vadd.f32 %v3133_v4, %v814_v21  ;;  %v1135_v26 = vadd.f32 %v3133_v4, %v1134_v22 }
  0xe0   : > { %v2528_v27 = vpop.f32.mrf.mxu0  ;;  %v2624_v28 = vpop.f32.mrf.mxu1 }
  0xe1   : > { %1575 = vst.msk [vmem:[#allocation2 + $0x18] sm:$0xff] %vm1571_vm2, %v1446_v23  ;;  %1639 = vst.msk [vmem:[#allocation2 + $0x218] sm:$0xff] %vm1571_vm2, %v1510_v24  ;;  %v1445_v29 = vmax.f32 %v815_v25, 0.0  ;;  %v1509_v30 = vmax.f32 %v1135_v26, 0.0  ;;  %v830_v31 = vadd.f32 %v2528_v27, %v3133_v4  ;;  %v1150_v32 = vadd.f32 %v2624_v28, %v3133_v4 }
  0xe2   : > { %v824_v33 = vpop.f32.mrf.mxu0  ;;  %v1144_v34 = vpop.f32.mrf.mxu1 }
  0xe3   : > { %1574 = vst.msk [vmem:[#allocation2 + $0x10] sm:$0xff] %vm1571_vm2, %v1445_v29  ;;  %1638 = vst.msk [vmem:[#allocation2 + $0x210] sm:$0xff] %vm1571_vm2, %v1509_v30  ;;  %v1448_v35 = vmax.f32 %v830_v31, 0.0  ;;  %v1512_v36 = vmax.f32 %v1150_v32, 0.0  ;;  %v825_v37 = vadd.f32 %v3133_v4, %v824_v33  ;;  %v1145_v38 = vadd.f32 %v3133_v4, %v1144_v34 }
  0xe4   : > { %v2531_v39 = vpop.f32.mrf.mxu0  ;;  %v2627_v40 = vpop.f32.mrf.mxu1  ;;  %v1701_v20 = vld [vmem:[#allocation2 + $0x8] sm:$0xff] }
  0xe5   : > { %1577 = vst.msk [vmem:[#allocation2 + $0x28] sm:$0xff] %vm1571_vm2, %v1448_v35  ;;  %1641 = vst.msk [vmem:[#allocation2 + $0x228] sm:$0xff] %vm1571_vm2, %v1512_v36  ;;  %v1447_v41 = vmax.f32 %v825_v37, 0.0  ;;  %v1511_v42 = vmax.f32 %v1145_v38, 0.0  ;;  %v840_v43 = vadd.f32 %v2531_v39, %v3133_v4  ;;  %v1160_v44 = vadd.f32 %v2627_v40, %v3133_v4  ;;  %v1829_v25 = vld [vmem:[#allocation2 + $0x208] sm:$0xff] }
  0xe6   : > { %v834_v45 = vpop.f32.mrf.mxu0  ;;  %v1154_v46 = vpop.f32.mrf.mxu1  ;;  %v1700_v30 = vld [vmem:[#allocation2] sm:$0xff] }
  0xe7   : > { %1576 = vst.msk [vmem:[#allocation2 + $0x20] sm:$0xff] %vm1571_vm2, %v1447_v41  ;;  %1640 = vst.msk [vmem:[#allocation2 + $0x220] sm:$0xff] %vm1571_vm2, %v1511_v42  ;;  %v1450_v47 = vmax.f32 %v840_v43, 0.0  ;;  %v1514_v48 = vmax.f32 %v1160_v44, 0.0  ;;  %v835_v49 = vadd.f32 %v3133_v4, %v834_v45  ;;  %v1155_v50 = vadd.f32 %v3133_v4, %v1154_v46  ;;  %v1828_v35 = vld [vmem:[#allocation2 + $0x200] sm:$0xff] }
  0xe8   : > { %v2534_v51 = vpop.f32.mrf.mxu0  ;;  %v2630_v52 = vpop.f32.mrf.mxu1  ;;  %v1703_v42 = vld [vmem:[#allocation2 + $0x18] sm:$0xff] }
  0xe9   : > { %1579 = vst.msk [vmem:[#allocation2 + $0x38] sm:$0xff] %vm1571_vm2, %v1450_v47  ;;  %1643 = vst.msk [vmem:[#allocation2 + $0x238] sm:$0xff] %vm1571_vm2, %v1514_v48  ;;  %v1449_v53 = vmax.f32 %v835_v49, 0.0  ;;  %v1513_v54 = vmax.f32 %v1155_v50, 0.0  ;;  %v850_v55 = vadd.f32 %v2534_v51, %v3133_v4  ;;  %v1170_v56 = vadd.f32 %v2630_v52, %v3133_v4  ;;  %v1831_v47 = vld [vmem:[#allocation2 + $0x218] sm:$0xff] }
  0xea   : > { %v844_v57 = vpop.f32.mrf.mxu0  ;;  %v1164_v58 = vpop.f32.mrf.mxu1 }
  0xeb   : > { %1578 = vst.msk [vmem:[#allocation2 + $0x30] sm:$0xff] %vm1571_vm2, %v1449_v53  ;;  %1642 = vst.msk [vmem:[#allocation2 + $0x230] sm:$0xff] %vm1571_vm2, %v1513_v54  ;;  %v1452_v59 = vmax.f32 %v850_v55, 0.0  ;;  %v1516_v60 = vmax.f32 %v1170_v56, 0.0  ;;  %v845_v61 = vadd.f32 %v3133_v4, %v844_v57  ;;  %v1165_v62 = vadd.f32 %v3133_v4, %v1164_v58  ;;  %v1702_v54 = vld [vmem:[#allocation2 + $0x10] sm:$0xff] }
  0xec   : > { %v2537_v63 = vpop.f32.mrf.mxu0  ;;  %v2633_v0 = vpop.f32.mrf.mxu1 }
  0xed   : > { %1581 = vst.msk [vmem:[#allocation2 + $0x48] sm:$0xff] %vm1571_vm2, %v1452_v59  ;;  %1645 = vst.msk [vmem:[#allocation2 + $0x248] sm:$0xff] %vm1571_vm2, %v1516_v60  ;;  %v1451_v1 = vmax.f32 %v845_v61, 0.0  ;;  %v1515_v2 = vmax.f32 %v1165_v62, 0.0  ;;  %v860_v3 = vadd.f32 %v2537_v63, %v3133_v4  ;;  %v1180_v5 = vadd.f32 %v2633_v0, %v3133_v4  ;;  %v1830_v59 = vld [vmem:[#allocation2 + $0x210] sm:$0xff] }
  0xee   : > { %v854_v6 = vpop.f32.mrf.mxu0  ;;  %v1174_v7 = vpop.f32.mrf.mxu1 }
  0xef   : > { %1580 = vst.msk [vmem:[#allocation2 + $0x40] sm:$0xff] %vm1571_vm2, %v1451_v1  ;;  %1644 = vst.msk [vmem:[#allocation2 + $0x240] sm:$0xff] %vm1571_vm2, %v1515_v2  ;;  %v1454_v8 = vmax.f32 %v860_v3, 0.0  ;;  %v1518_v9 = vmax.f32 %v1180_v5, 0.0  ;;  %v855_v10 = vadd.f32 %v3133_v4, %v854_v6  ;;  %v1175_v11 = vadd.f32 %v3133_v4, %v1174_v7  ;;  %v1705_v2 = vld [vmem:[#allocation2 + $0x28] sm:$0xff] }
  0xf0   : > { %v2540_v12 = vpop.f32.mrf.mxu0  ;;  %v2636_v13 = vpop.f32.mrf.mxu1 }
  0xf1   : > { %1583 = vst.msk [vmem:[#allocation2 + $0x58] sm:$0xff] %vm1571_vm2, %v1454_v8  ;;  %1647 = vst.msk [vmem:[#allocation2 + $0x258] sm:$0xff] %vm1571_vm2, %v1518_v9  ;;  %v1453_v14 = vmax.f32 %v855_v10, 0.0  ;;  %v1517_v15 = vmax.f32 %v1175_v11, 0.0  ;;  %v870_v16 = vadd.f32 %v2540_v12, %v3133_v4  ;;  %v1190_v17 = vadd.f32 %v2636_v13, %v3133_v4  ;;  %v1833_v8 = vld [vmem:[#allocation2 + $0x228] sm:$0xff] }
  0xf2   : > { %v864_v18 = vpop.f32.mrf.mxu0  ;;  %v1184_v19 = vpop.f32.mrf.mxu1 }
  0xf3   : > { %1582 = vst.msk [vmem:[#allocation2 + $0x50] sm:$0xff] %vm1571_vm2, %v1453_v14  ;;  %1646 = vst.msk [vmem:[#allocation2 + $0x250] sm:$0xff] %vm1571_vm2, %v1517_v15  ;;  %v1456_v21 = vmax.f32 %v870_v16, 0.0  ;;  %v1520_v22 = vmax.f32 %v1190_v17, 0.0  ;;  %v865_v23 = vadd.f32 %v3133_v4, %v864_v18  ;;  %v1185_v24 = vadd.f32 %v3133_v4, %v1184_v19  ;;  %v1704_v15 = vld [vmem:[#allocation2 + $0x20] sm:$0xff] }
  0xf4   : > { %v1709_v26 = vld [vmem:[#allocation2 + $0x48] sm:$0xff]  ;;  %v2543_v28 = vpop.f32.mrf.mxu0  ;;  %v2639_v29 = vpop.f32.mrf.mxu1 }
  0xf5   : > { %v1837_v27 = vld [vmem:[#allocation2 + $0x248] sm:$0xff]  ;;  %v1717_v31 = vmax.f32 %v1701_v20, %v1709_v26  ;;  %1585 = vst.msk [vmem:[#allocation2 + $0x68] sm:$0xff] %vm1571_vm2, %v1456_v21  ;;  %1649 = vst.msk [vmem:[#allocation2 + $0x268] sm:$0xff] %vm1571_vm2, %v1520_v22  ;;  %v1455_v33 = vmax.f32 %v865_v23, 0.0  ;;  %v1519_v34 = vmax.f32 %v1185_v24, 0.0  ;;  %v880_v38 = vadd.f32 %v2543_v28, %v3133_v4  ;;  %v1832_v20 = vld [vmem:[#allocation2 + $0x220] sm:$0xff] }
  0xf6   : > { %v1845_v32 = vmax.f32 %v1829_v25, %v1837_v27  ;;  %v1708_v36 = vld [vmem:[#allocation2 + $0x40] sm:$0xff]  ;;  %v1200_v39 = vadd.f32 %v2639_v29, %v3133_v4  ;;  %v874_v40 = vpop.f32.mrf.mxu0  ;;  %v1194_v41 = vpop.f32.mrf.mxu1  ;;  %v1707_v27 = vld [vmem:[#allocation2 + $0x38] sm:$0xff] }
  0xf7   : > { %v1836_v37 = vld [vmem:[#allocation2 + $0x240] sm:$0xff]  ;;  %1725 = vst.msk [vmem:[#allocation3 + $0x8] sm:$0xff] %vm1571_vm2, %v1717_v31  ;;  %v1716_v43 = vmax.f32 %v1700_v30, %v1708_v36  ;;  %1584 = vst.msk [vmem:[#allocation2 + $0x60] sm:$0xff] %vm1571_vm2, %v1455_v33  ;;  %v875_v45 = vadd.f32 %v3133_v4, %v874_v40  ;;  %v1195_v46 = vadd.f32 %v3133_v4, %v1194_v41  ;;  %v1458_v50 = vmax.f32 %v880_v38, 0.0  ;;  %v1835_v28 = vld [vmem:[#allocation2 + $0x238] sm:$0xff] }
  0xf8   : > { %1853 = vst.msk [vmem:[#allocation3 + $0x108] sm:$0xff] %vm1571_vm2, %v1845_v32  ;;  %v1844_v44 = vmax.f32 %v1828_v35, %v1836_v37  ;;  %1648 = vst.msk [vmem:[#allocation2 + $0x260] sm:$0xff] %vm1571_vm2, %v1519_v34  ;;  %v1711_v48 = vld [vmem:[#allocation2 + $0x58] sm:$0xff]  ;;  %v1522_v51 = vmax.f32 %v1200_v39, 0.0  ;;  %v2546_v52 = vpop.f32.mrf.mxu0  ;;  %v2642_v53 = vpop.f32.mrf.mxu1  ;;  %v1706_v33 = vld [vmem:[#allocation2 + $0x30] sm:$0xff] }
  0xf9   : > { %v1839_v49 = vld [vmem:[#allocation2 + $0x258] sm:$0xff]  ;;  %1724 = vst.msk [vmem:[#allocation3] sm:$0xff] %vm1571_vm2, %v1716_v43  ;;  %v1719_v55 = vmax.f32 %v1703_v42, %v1711_v48  ;;  %v1457_v57 = vmax.f32 %v875_v45, 0.0  ;;  %v1521_v58 = vmax.f32 %v1195_v46, 0.0  ;;  %1587 = vst.msk [vmem:[#allocation2 + $0x78] sm:$0xff] %vm1571_vm2, %v1458_v50  ;;  %v890_v62 = vadd.f32 %v2546_v52, %v3133_v4  ;;  %v1834_v46 = vld [vmem:[#allocation2 + $0x230] sm:$0xff] }
  0xfa   : > { %1852 = vst.msk [vmem:[#allocation3 + $0x100] sm:$0xff] %vm1571_vm2, %v1844_v44  ;;  %v1847_v56 = vmax.f32 %v1831_v47, %v1839_v49  ;;  %v1710_v60 = vld [vmem:[#allocation2 + $0x50] sm:$0xff]  ;;  %1651 = vst.msk [vmem:[#allocation2 + $0x278] sm:$0xff] %vm1571_vm2, %v1522_v51  ;;  %v1210_v63 = vadd.f32 %v2642_v53, %v3133_v4  ;;  %v884_v0 = vpop.f32.mrf.mxu0  ;;  %v1204_v1 = vpop.f32.mrf.mxu1 }
  0xfb   : > { %v1838_v61 = vld [vmem:[#allocation2 + $0x250] sm:$0xff]  ;;  %1727 = vst.msk [vmem:[#allocation3 + $0x18] sm:$0xff] %vm1571_vm2, %v1719_v55  ;;  %v1718_v3 = vmax.f32 %v1702_v54, %v1710_v60  ;;  %1586 = vst.msk [vmem:[#allocation2 + $0x70] sm:$0xff] %vm1571_vm2, %v1457_v57  ;;  %v885_v6 = vadd.f32 %v3133_v4, %v884_v0  ;;  %v1205_v7 = vadd.f32 %v3133_v4, %v1204_v1  ;;  %v1460_v11 = vmax.f32 %v890_v62, 0.0 }
  0xfc   : > { %1855 = vst.msk [vmem:[#allocation3 + $0x118] sm:$0xff] %vm1571_vm2, %v1847_v56  ;;  %v1846_v5 = vmax.f32 %v1830_v59, %v1838_v61  ;;  %1650 = vst.msk [vmem:[#allocation2 + $0x270] sm:$0xff] %vm1571_vm2, %v1521_v58  ;;  %v1713_v9 = vld [vmem:[#allocation2 + $0x68] sm:$0xff]  ;;  %v1524_v12 = vmax.f32 %v1210_v63, 0.0  ;;  %v2549_v13 = vpop.f32.mrf.mxu0  ;;  %v2645_v14 = vpop.f32.mrf.mxu1 }
  0xfd   : > { %v1841_v10 = vld [vmem:[#allocation2 + $0x268] sm:$0xff]  ;;  %1726 = vst.msk [vmem:[#allocation3 + $0x10] sm:$0xff] %vm1571_vm2, %v1718_v3  ;;  %v1721_v16 = vmax.f32 %v1705_v2, %v1713_v9  ;;  %v1459_v18 = vmax.f32 %v885_v6, 0.0  ;;  %v1523_v19 = vmax.f32 %v1205_v7, 0.0  ;;  %1589 = vst.msk [vmem:[#allocation2 + $0x88] sm:$0xff] %vm1571_vm2, %v1460_v11  ;;  %v900_v23 = vadd.f32 %v2549_v13, %v3133_v4 }
  0xfe   : > { %1854 = vst.msk [vmem:[#allocation3 + $0x110] sm:$0xff] %vm1571_vm2, %v1846_v5  ;;  %v1849_v17 = vmax.f32 %v1833_v8, %v1841_v10  ;;  %v1712_v21 = vld [vmem:[#allocation2 + $0x60] sm:$0xff]  ;;  %1653 = vst.msk [vmem:[#allocation2 + $0x288] sm:$0xff] %vm1571_vm2, %v1524_v12  ;;  %v1220_v24 = vadd.f32 %v2645_v14, %v3133_v4  ;;  %v894_v25 = vpop.f32.mrf.mxu0  ;;  %v1214_v26 = vpop.f32.mrf.mxu1 }
  0xff   : > { %v1840_v22 = vld [vmem:[#allocation2 + $0x260] sm:$0xff]  ;;  %1729 = vst.msk [vmem:[#allocation3 + $0x28] sm:$0xff] %vm1571_vm2, %v1721_v16  ;;  %v1720_v29 = vmax.f32 %v1704_v15, %v1712_v21  ;;  %1588 = vst.msk [vmem:[#allocation2 + $0x80] sm:$0xff] %vm1571_vm2, %v1459_v18  ;;  %v895_v31 = vadd.f32 %v3133_v4, %v894_v25  ;;  %v1215_v32 = vadd.f32 %v3133_v4, %v1214_v26  ;;  %v1462_v43 = vmax.f32 %v900_v23, 0.0 }
 0x100   : > { %1857 = vst.msk [vmem:[#allocation3 + $0x128] sm:$0xff] %vm1571_vm2, %v1849_v17  ;;  %v1848_v30 = vmax.f32 %v1832_v20, %v1840_v22  ;;  %1652 = vst.msk [vmem:[#allocation2 + $0x280] sm:$0xff] %vm1571_vm2, %v1523_v19  ;;  %v1956_v34 = vld [vmem:[#allocation3] ss:$2 sm:$0xff]  ;;  %v2020_v35 = vld [vmem:[#allocation3 + $0x1] ss:$2 sm:$0xff]  ;;  %v2552_v37 = vpop.f32.mrf.mxu0  ;;  %v2648_v38 = vpop.f32.mrf.mxu1 }
 0x101   : > { %v1988_v36 = vld [vmem:[#allocation3 + $0x100] ss:$2 sm:$0xff]  ;;  %v2083_v39 = vmax.f32 %v1956_v34, %v2020_v35  ;;  %v2052_v40 = vld [vmem:[#allocation3 + $0x101] ss:$2 sm:$0xff]  ;;  %1728 = vst.msk [vmem:[#allocation3 + $0x20] sm:$0xff] %vm1571_vm2, %v1720_v29  ;;  %v1715_v41 = vld [vmem:[#allocation2 + $0x78] sm:$0xff]  ;;  %v910_v45 = vadd.f32 %v2552_v37, %v3133_v4  ;;  %v1230_v62 = vadd.f32 %v2648_v38, %v3133_v4 }
 0x102   : > { %1856 = vst.msk [vmem:[#allocation3 + $0x120] sm:$0xff] %vm1571_vm2, %v1848_v30  ;;  %v1843_v42 = vld [vmem:[#allocation2 + $0x278] sm:$0xff]  ;;  %v1526_v44 = vmax.f32 %v1220_v24, 0.0  ;;  %v2099_v47 = vmax.f32 %v1988_v36, %v2052_v40  ;;  %v1723_v48 = vmax.f32 %v1707_v27, %v1715_v41  ;;  %v1714_v50 = vld [vmem:[#allocation2 + $0x70] sm:$0xff]  ;;  %v1461_v52 = vmax.f32 %v895_v31, 0.0  ;;  %v904_v53 = vpop.f32.mrf.mxu0  ;;  %v1224_v54 = vpop.f32.mrf.mxu1  ;;  %1591 = vst.msk [vmem:[#allocation2 + $0x98] sm:$0xff] %vm1571_vm2, %v1462_v43 }
 0x103   : > { %v1851_v49 = vmax.f32 %v1835_v28, %v1843_v42  ;;  %v1842_v51 = vld [vmem:[#allocation2 + $0x270] sm:$0xff]  ;;  %2115 = vst.msk [vmem:[%s3242_s21] sm:$0xff] %vm1571_vm2, %v2083_v39  ;;  %v1722_v55 = vmax.f32 %v1706_v33, %v1714_v50  ;;  %v1525_v57 = vmax.f32 %v1215_v32, 0.0  ;;  %v1464_v58 = vmax.f32 %v910_v45, 0.0 }
 0x104   : > { %v1850_v56 = vmax.f32 %v1834_v46, %v1842_v51  ;;  %1655 = vst.msk [vmem:[#allocation2 + $0x298] sm:$0xff] %vm1571_vm2, %v1526_v44  ;;  %2131 = vst.msk [vmem:[%s3242_s21 + $0x80] sm:$0xff] %vm1571_vm2, %v2099_v47  ;;  %v1958_v59 = vld [vmem:[#allocation3 + $0x10] ss:$2 sm:$0xff]  ;;  %v2022_v60 = vld [vmem:[#allocation3 + $0x11] ss:$2 sm:$0xff]  ;;  %v905_v63 = vadd.f32 %v3133_v4, %v904_v53  ;;  %v1225_v0 = vadd.f32 %v3133_v4, %v1224_v54  ;;  %v2555_v1 = vpop.f32.mrf.mxu0  ;;  %v2651_v2 = vpop.f32.mrf.mxu1 }
 0x105   : > { %v1990_v61 = vld [vmem:[#allocation3 + $0x110] ss:$2 sm:$0xff]  ;;  %1731 = vst.msk [vmem:[#allocation3 + $0x38] sm:$0xff] %vm1571_vm2, %v1723_v48  ;;  %1859 = vst.msk [vmem:[#allocation3 + $0x138] sm:$0xff] %vm1571_vm2, %v1851_v49  ;;  %v2084_v3 = vmax.f32 %v1958_v59, %v2022_v60  ;;  %v2054_v5 = vld [vmem:[#allocation3 + $0x111] ss:$2 sm:$0xff]  ;;  %v920_v6 = vadd.f32 %v2555_v1, %v3133_v4  ;;  %v1240_v7 = vadd.f32 %v2651_v2, %v3133_v4 }
 0x106   : > { %1590 = vst.msk [vmem:[#allocation2 + $0x90] sm:$0xff] %vm1571_vm2, %v1461_v52  ;;  %1730 = vst.msk [vmem:[#allocation3 + $0x30] sm:$0xff] %vm1571_vm2, %v1722_v55  ;;  %v2100_v8 = vmax.f32 %v1990_v61, %v2054_v5  ;;  %v1528_v9 = vmax.f32 %v1230_v62, 0.0  ;;  %v1463_v10 = vmax.f32 %v905_v63, 0.0  ;;  %v1527_v11 = vmax.f32 %v1225_v0, 0.0  ;;  %v914_v12 = vpop.f32.mrf.mxu0  ;;  %v1234_v13 = vpop.f32.mrf.mxu1  ;;  %v1733_v2 = vld [vmem:[#allocation2 + $0x88] sm:$0xff] }
 0x107   : > { %1858 = vst.msk [vmem:[#allocation3 + $0x130] sm:$0xff] %vm1571_vm2, %v1850_v56  ;;  %1654 = vst.msk [vmem:[#allocation2 + $0x290] sm:$0xff] %vm1571_vm2, %v1525_v57  ;;  %v1466_v14 = vmax.f32 %v920_v6, 0.0  ;;  %v1530_v15 = vmax.f32 %v1240_v7, 0.0  ;;  %v915_v16 = vadd.f32 %v3133_v4, %v914_v12  ;;  %v1235_v17 = vadd.f32 %v3133_v4, %v1234_v13  ;;  %v1861_v7 = vld [vmem:[#allocation2 + $0x288] sm:$0xff]  ;;  %v1732_v12 = vld [vmem:[#allocation2 + $0x80] sm:$0xff] }
 0x108   : > { %1593 = vst.msk [vmem:[#allocation2 + $0xa8] sm:$0xff] %vm1571_vm2, %v1464_v58  ;;  %2116 = vst.msk [vmem:[%s3242_s21 + $0x8] sm:$0xff] %vm1571_vm2, %v2084_v3  ;;  %v1960_v18 = vld [vmem:[#allocation3 + $0x20] ss:$2 sm:$0xff]  ;;  %v2024_v19 = vld [vmem:[#allocation3 + $0x21] ss:$2 sm:$0xff]  ;;  %v2558_v21 = vpop.f32.mrf.mxu0  ;;  %v2654_v22 = vpop.f32.mrf.mxu1 }
 0x109   : > { %2132 = vst.msk [vmem:[%s3242_s21 + $0x88] sm:$0xff] %vm1571_vm2, %v2100_v8  ;;  %v1992_v20 = vld [vmem:[#allocation3 + $0x120] ss:$2 sm:$0xff]  ;;  %1657 = vst.msk [vmem:[#allocation2 + $0x2a8] sm:$0xff] %vm1571_vm2, %v1528_v9  ;;  %v2085_v23 = vmax.f32 %v1960_v18, %v2024_v19  ;;  %v2056_v24 = vld [vmem:[#allocation3 + $0x121] ss:$2 sm:$0xff]  ;;  %v930_v27 = vadd.f32 %v2558_v21, %v3133_v4  ;;  %v1250_v29 = vadd.f32 %v2654_v22, %v3133_v4 }
 0x10a   : > { %1592 = vst.msk [vmem:[#allocation2 + $0xa0] sm:$0xff] %vm1571_vm2, %v1463_v10  ;;  %1656 = vst.msk [vmem:[#allocation2 + $0x2a0] sm:$0xff] %vm1571_vm2, %v1527_v11  ;;  %v1465_v25 = vmax.f32 %v915_v16, 0.0  ;;  %v1529_v26 = vmax.f32 %v1235_v17, 0.0  ;;  %v2101_v28 = vmax.f32 %v1992_v20, %v2056_v24  ;;  %v924_v30 = vpop.f32.mrf.mxu0  ;;  %v1244_v31 = vpop.f32.mrf.mxu1  ;;  %v1860_v18 = vld [vmem:[#allocation2 + $0x280] sm:$0xff]  ;;  %v1735_v24 = vld [vmem:[#allocation2 + $0x98] sm:$0xff] }
 0x10b   : > { %1595 = vst.msk [vmem:[#allocation2 + $0xb8] sm:$0xff] %vm1571_vm2, %v1466_v14  ;;  %1659 = vst.msk [vmem:[#allocation2 + $0x2b8] sm:$0xff] %vm1571_vm2, %v1530_v15  ;;  %v1468_v32 = vmax.f32 %v930_v27, 0.0  ;;  %v925_v33 = vadd.f32 %v3133_v4, %v924_v30  ;;  %v1245_v34 = vadd.f32 %v3133_v4, %v1244_v31  ;;  %v1532_v42 = vmax.f32 %v1250_v29, 0.0  ;;  %v1863_v31 = vld [vmem:[#allocation2 + $0x298] sm:$0xff] }
 0x10c   : > { %2117 = vst.msk [vmem:[%s3242_s21 + $0x10] sm:$0xff] %vm1571_vm2, %v2085_v23  ;;  %1594 = vst.msk [vmem:[#allocation2 + $0xb0] sm:$0xff] %vm1571_vm2, %v1465_v25  ;;  %v2561_v38 = vpop.f32.mrf.mxu0  ;;  %v2657_v39 = vpop.f32.mrf.mxu1 }
 0x10d   : > { %1658 = vst.msk [vmem:[#allocation2 + $0x2b0] sm:$0xff] %vm1571_vm2, %v1529_v26  ;;  %2133 = vst.msk [vmem:[%s3242_s21 + $0x90] sm:$0xff] %vm1571_vm2, %v2101_v28  ;;  %v1962_v35 = vld [vmem:[#allocation3 + $0x30] ss:$2 sm:$0xff]  ;;  %v2026_v36 = vld [vmem:[#allocation3 + $0x31] ss:$2 sm:$0xff]  ;;  %v940_v44 = vadd.f32 %v2561_v38, %v3133_v4  ;;  %v1260_v47 = vadd.f32 %v2657_v39, %v3133_v4 }
 0x10e   : > { %v1994_v37 = vld [vmem:[#allocation3 + $0x130] ss:$2 sm:$0xff]  ;;  %v2086_v40 = vmax.f32 %v1962_v35, %v2026_v36  ;;  %v2058_v41 = vld [vmem:[#allocation3 + $0x131] ss:$2 sm:$0xff]  ;;  %1597 = vst.msk [vmem:[#allocation2 + $0xc8] sm:$0xff] %vm1571_vm2, %v1468_v32  ;;  %v1467_v43 = vmax.f32 %v925_v33, 0.0  ;;  %v934_v48 = vpop.f32.mrf.mxu0  ;;  %v1254_v49 = vpop.f32.mrf.mxu1 }
 0x10f   : > { %v2102_v45 = vmax.f32 %v1994_v37, %v2058_v41  ;;  %v1531_v46 = vmax.f32 %v1245_v34, 0.0  ;;  %1661 = vst.msk [vmem:[#allocation2 + $0x2c8] sm:$0xff] %vm1571_vm2, %v1532_v42  ;;  %v1470_v50 = vmax.f32 %v940_v44, 0.0  ;;  %v935_v51 = vadd.f32 %v3133_v4, %v934_v48  ;;  %v1734_v32 = vld [vmem:[#allocation2 + $0x90] sm:$0xff] }
 0x110   : > { %2118 = vst.msk [vmem:[%s3242_s21 + $0x18] sm:$0xff] %vm1571_vm2, %v2086_v40  ;;  %1596 = vst.msk [vmem:[#allocation2 + $0xc0] sm:$0xff] %vm1571_vm2, %v1467_v43  ;;  %v1255_v52 = vadd.f32 %v3133_v4, %v1254_v49  ;;  %v1534_v53 = vmax.f32 %v1260_v47, 0.0  ;;  %v2564_v54 = vpop.f32.mrf.mxu0  ;;  %v2660_v55 = vpop.f32.mrf.mxu1  ;;  %v1862_v38 = vld [vmem:[#allocation2 + $0x290] sm:$0xff] }
 0x111   : > { %2134 = vst.msk [vmem:[%s3242_s21 + $0x98] sm:$0xff] %vm1571_vm2, %v2102_v45  ;;  %1660 = vst.msk [vmem:[#allocation2 + $0x2c0] sm:$0xff] %vm1571_vm2, %v1531_v46  ;;  %v1469_v56 = vmax.f32 %v935_v51, 0.0  ;;  %v950_v58 = vadd.f32 %v2564_v54, %v3133_v4  ;;  %v1270_v59 = vadd.f32 %v2660_v55, %v3133_v4  ;;  %v1737_v45 = vld [vmem:[#allocation2 + $0xa8] sm:$0xff] }
 0x112   : > { %1599 = vst.msk [vmem:[#allocation2 + $0xd8] sm:$0xff] %vm1571_vm2, %v1470_v50  ;;  %v1533_v57 = vmax.f32 %v1255_v52, 0.0  ;;  %1663 = vst.msk [vmem:[#allocation2 + $0x2d8] sm:$0xff] %vm1571_vm2, %v1534_v53  ;;  %v944_v60 = vpop.f32.mrf.mxu0  ;;  %v1264_v61 = vpop.f32.mrf.mxu1  ;;  %v1865_v50 = vld [vmem:[#allocation2 + $0x2a8] sm:$0xff] }
 0x113   : > { %1598 = vst.msk [vmem:[#allocation2 + $0xd0] sm:$0xff] %vm1571_vm2, %v1469_v56  ;;  %v1472_v62 = vmax.f32 %v950_v58, 0.0  ;;  %v1536_v63 = vmax.f32 %v1270_v59, 0.0  ;;  %v945_v0 = vadd.f32 %v3133_v4, %v944_v60  ;;  %v1265_v1 = vadd.f32 %v3133_v4, %v1264_v61 }
 0x114   : > { %1662 = vst.msk [vmem:[#allocation2 + $0x2d0] sm:$0xff] %vm1571_vm2, %v1533_v57  ;;  %v2567_v5 = vpop.f32.mrf.mxu0  ;;  %v2663_v6 = vpop.f32.mrf.mxu1  ;;  %v1736_v57 = vld [vmem:[#allocation2 + $0xa0] sm:$0xff] }
 0x115   : > { %v1741_v3 = vld [vmem:[#allocation2 + $0xc8] sm:$0xff]  ;;  %1601 = vst.msk [vmem:[#allocation2 + $0xe8] sm:$0xff] %vm1571_vm2, %v1472_v62  ;;  %1665 = vst.msk [vmem:[#allocation2 + $0x2e8] sm:$0xff] %vm1571_vm2, %v1536_v63  ;;  %v1471_v9 = vmax.f32 %v945_v0, 0.0  ;;  %v1535_v10 = vmax.f32 %v1265_v1, 0.0  ;;  %v960_v11 = vadd.f32 %v2567_v5, %v3133_v4  ;;  %v1280_v15 = vadd.f32 %v2663_v6, %v3133_v4  ;;  %v1864_v62 = vld [vmem:[#allocation2 + $0x2a0] sm:$0xff] }
 0x116   : > { %v1749_v8 = vmax.f32 %v1733_v2, %v1741_v3  ;;  %v1869_v13 = vld [vmem:[#allocation2 + $0x2c8] sm:$0xff]  ;;  %v954_v16 = vpop.f32.mrf.mxu0  ;;  %v1274_v17 = vpop.f32.mrf.mxu1  ;;  %v1739_v6 = vld [vmem:[#allocation2 + $0xb8] sm:$0xff] }
 0x117   : > { %v1740_v14 = vld [vmem:[#allocation2 + $0xc0] sm:$0xff]  ;;  %v1877_v19 = vmax.f32 %v1861_v7, %v1869_v13  ;;  %1600 = vst.msk [vmem:[#allocation2 + $0xe0] sm:$0xff] %vm1571_vm2, %v1471_v9  ;;  %1664 = vst.msk [vmem:[#allocation2 + $0x2e0] sm:$0xff] %vm1571_vm2, %v1535_v10  ;;  %v1474_v22 = vmax.f32 %v960_v11, 0.0  ;;  %v955_v23 = vadd.f32 %v3133_v4, %v954_v16  ;;  %v1538_v27 = vmax.f32 %v1280_v15, 0.0  ;;  %v1867_v7 = vld [vmem:[#allocation2 + $0x2b8] sm:$0xff] }
 0x118   : > { %1757 = vst.msk [vmem:[#allocation3 + $0x48] sm:$0xff] %vm1571_vm2, %v1749_v8  ;;  %v1748_v20 = vmax.f32 %v1732_v12, %v1740_v14  ;;  %v1868_v21 = vld [vmem:[#allocation2 + $0x2c0] sm:$0xff]  ;;  %v1275_v28 = vadd.f32 %v3133_v4, %v1274_v17  ;;  %v2570_v29 = vpop.f32.mrf.mxu0  ;;  %v2666_v30 = vpop.f32.mrf.mxu1 }
 0x119   : > { %v1876_v25 = vmax.f32 %v1860_v18, %v1868_v21  ;;  %v1743_v26 = vld [vmem:[#allocation2 + $0xd8] sm:$0xff]  ;;  %1885 = vst.msk [vmem:[#allocation3 + $0x148] sm:$0xff] %vm1571_vm2, %v1877_v19  ;;  %1603 = vst.msk [vmem:[#allocation2 + $0xf8] sm:$0xff] %vm1571_vm2, %v1474_v22  ;;  %v1473_v35 = vmax.f32 %v955_v23, 0.0  ;;  %v970_v36 = vadd.f32 %v2570_v29, %v3133_v4  ;;  %v1290_v37 = vadd.f32 %v2666_v30, %v3133_v4 }
 0x11a   : > { %1756 = vst.msk [vmem:[#allocation3 + $0x40] sm:$0xff] %vm1571_vm2, %v1748_v20  ;;  %v1751_v33 = vmax.f32 %v1735_v24, %v1743_v26  ;;  %v1871_v34 = vld [vmem:[#allocation2 + $0x2d8] sm:$0xff]  ;;  %v1742_v40 = vld [vmem:[#allocation2 + $0xd0] sm:$0xff]  ;;  %1667 = vst.msk [vmem:[#allocation2 + $0x2f8] sm:$0xff] %vm1571_vm2, %v1538_v27  ;;  %v1537_v42 = vmax.f32 %v1275_v28, 0.0  ;;  %v964_v43 = vpop.f32.mrf.mxu0  ;;  %v1284_v44 = vpop.f32.mrf.mxu1 }
 0x11b   : > { %1884 = vst.msk [vmem:[#allocation3 + $0x140] sm:$0xff] %vm1571_vm2, %v1876_v25  ;;  %v1879_v39 = vmax.f32 %v1863_v31, %v1871_v34  ;;  %v1870_v41 = vld [vmem:[#allocation2 + $0x2d0] sm:$0xff]  ;;  %v1750_v46 = vmax.f32 %v1734_v32, %v1742_v40  ;;  %1602 = vst.msk [vmem:[#allocation2 + $0xf0] sm:$0xff] %vm1571_vm2, %v1473_v35  ;;  %v1476_v48 = vmax.f32 %v970_v36, 0.0  ;;  %v1540_v49 = vmax.f32 %v1290_v37, 0.0 }
 0x11c   : > { %1759 = vst.msk [vmem:[#allocation3 + $0x58] sm:$0xff] %vm1571_vm2, %v1751_v33  ;;  %v1878_v47 = vmax.f32 %v1862_v38, %v1870_v41  ;;  %v1745_v51 = vld [vmem:[#allocation2 + $0xe8] sm:$0xff]  ;;  %1666 = vst.msk [vmem:[#allocation2 + $0x2f0] sm:$0xff] %vm1571_vm2, %v1537_v42  ;;  %v965_v53 = vadd.f32 %v3133_v4, %v964_v43  ;;  %v1285_v54 = vadd.f32 %v3133_v4, %v1284_v44  ;;  %v2573_v55 = vpop.f32.mrf.mxu0  ;;  %v2669_v56 = vpop.f32.mrf.mxu1  ;;  %v1738_v26 = vld [vmem:[#allocation2 + $0xb0] sm:$0xff] }
 0x11d   : > { %1887 = vst.msk [vmem:[#allocation3 + $0x158] sm:$0xff] %vm1571_vm2, %v1879_v39  ;;  %v1873_v52 = vld [vmem:[#allocation2 + $0x2e8] sm:$0xff]  ;;  %1758 = vst.msk [vmem:[#allocation3 + $0x50] sm:$0xff] %vm1571_vm2, %v1750_v46  ;;  %v1753_v58 = vmax.f32 %v1737_v45, %v1745_v51  ;;  %v980_v60 = vadd.f32 %v2573_v55, %v3133_v4  ;;  %v1300_v61 = vadd.f32 %v2669_v56, %v3133_v4  ;;  %v1866_v34 = vld [vmem:[#allocation2 + $0x2b0] sm:$0xff] }
 0x11e   : > { %1886 = vst.msk [vmem:[#allocation3 + $0x150] sm:$0xff] %vm1571_vm2, %v1878_v47  ;;  %v1881_v59 = vmax.f32 %v1865_v50, %v1873_v52  ;;  %1605 = vst.msk [vmem:[#allocation2 + $0x108] sm:$0xff] %vm1571_vm2, %v1476_v48  ;;  %v1744_v63 = vld [vmem:[#allocation2 + $0xe0] sm:$0xff]  ;;  %v1475_v1 = vmax.f32 %v965_v53, 0.0  ;;  %v1539_v2 = vmax.f32 %v1285_v54, 0.0  ;;  %v974_v3 = vpop.f32.mrf.mxu0  ;;  %v1294_v5 = vpop.f32.mrf.mxu1 }
 0x11f   : > { %1669 = vst.msk [vmem:[#allocation2 + $0x308] sm:$0xff] %vm1571_vm2, %v1540_v49  ;;  %v1872_v0 = vld [vmem:[#allocation2 + $0x2e0] sm:$0xff]  ;;  %1761 = vst.msk [vmem:[#allocation3 + $0x68] sm:$0xff] %vm1571_vm2, %v1753_v58  ;;  %v1752_v8 = vmax.f32 %v1736_v57, %v1744_v63  ;;  %v1478_v10 = vmax.f32 %v980_v60, 0.0  ;;  %v1542_v11 = vmax.f32 %v1300_v61, 0.0  ;;  %v975_v15 = vadd.f32 %v3133_v4, %v974_v3 }
 0x120   : > { %1889 = vst.msk [vmem:[#allocation3 + $0x168] sm:$0xff] %vm1571_vm2, %v1881_v59  ;;  %v1880_v9 = vmax.f32 %v1864_v62, %v1872_v0  ;;  %v1747_v14 = vld [vmem:[#allocation2 + $0xf8] sm:$0xff]  ;;  %1604 = vst.msk [vmem:[#allocation2 + $0x100] sm:$0xff] %vm1571_vm2, %v1475_v1  ;;  %v1295_v16 = vadd.f32 %v3133_v4, %v1294_v5  ;;  %v2576_v17 = vpop.f32.mrf.mxu0  ;;  %v2672_v18 = vpop.f32.mrf.mxu1 }
 0x121   : > { %v1964_v12 = vld [vmem:[#allocation3 + $0x40] ss:$2 sm:$0xff]  ;;  %v2028_v13 = vld [vmem:[#allocation3 + $0x41] ss:$2 sm:$0xff]  ;;  %1668 = vst.msk [vmem:[#allocation2 + $0x300] sm:$0xff] %vm1571_vm2, %v1539_v2  ;;  %1760 = vst.msk [vmem:[#allocation3 + $0x60] sm:$0xff] %vm1571_vm2, %v1752_v8  ;;  %v1755_v22 = vmax.f32 %v1739_v6, %v1747_v14  ;;  %v990_v24 = vadd.f32 %v2576_v17, %v3133_v4  ;;  %v1310_v25 = vadd.f32 %v2672_v18, %v3133_v4 }
 0x122   : > { %v2087_v19 = vmax.f32 %v1964_v12, %v2028_v13  ;;  %v1996_v20 = vld [vmem:[#allocation3 + $0x140] ss:$2 sm:$0xff]  ;;  %v2060_v21 = vld [vmem:[#allocation3 + $0x141] ss:$2 sm:$0xff]  ;;  %1888 = vst.msk [vmem:[#allocation3 + $0x160] sm:$0xff] %vm1571_vm2, %v1880_v9  ;;  %v1875_v23 = vld [vmem:[#allocation2 + $0x2f8] sm:$0xff]  ;;  %v984_v32 = vpop.f32.mrf.mxu0  ;;  %v1304_v33 = vpop.f32.mrf.mxu1 }
 0x123   : > { %1607 = vst.msk [vmem:[#allocation2 + $0x118] sm:$0xff] %vm1571_vm2, %v1478_v10  ;;  %1671 = vst.msk [vmem:[#allocation2 + $0x318] sm:$0xff] %vm1571_vm2, %v1542_v11  ;;  %v2103_v27 = vmax.f32 %v1996_v20, %v2060_v21  ;;  %v1883_v28 = vmax.f32 %v1867_v7, %v1875_v23  ;;  %v1746_v29 = vld [vmem:[#allocation2 + $0xf0] sm:$0xff]  ;;  %v1477_v30 = vmax.f32 %v975_v15, 0.0  ;;  %v1541_v31 = vmax.f32 %v1295_v16, 0.0 }
 0x124   : > { %2119 = vst.msk [vmem:[%s3242_s21 + $0x20] sm:$0xff] %vm1571_vm2, %v2087_v19  ;;  %1763 = vst.msk [vmem:[#allocation3 + $0x78] sm:$0xff] %vm1571_vm2, %v1755_v22  ;;  %v1754_v35 = vmax.f32 %v1738_v26, %v1746_v29  ;;  %v1874_v36 = vld [vmem:[#allocation2 + $0x2f0] sm:$0xff]  ;;  %v1480_v37 = vmax.f32 %v990_v24, 0.0  ;;  %v1544_v38 = vmax.f32 %v1310_v25, 0.0  ;;  %v985_v39 = vadd.f32 %v3133_v4, %v984_v32  ;;  %v2579_v45 = vpop.f32.mrf.mxu0  ;;  %v2675_v46 = vpop.f32.mrf.mxu1 }
 0x125   : > { %2135 = vst.msk [vmem:[%s3242_s21 + $0xa0] sm:$0xff] %vm1571_vm2, %v2103_v27  ;;  %v1966_v40 = vld [vmem:[#allocation3 + $0x50] ss:$2 sm:$0xff]  ;;  %v2030_v41 = vld [vmem:[#allocation3 + $0x51] ss:$2 sm:$0xff]  ;;  %1891 = vst.msk [vmem:[#allocation3 + $0x178] sm:$0xff] %vm1571_vm2, %v1883_v28  ;;  %v1882_v43 = vmax.f32 %v1866_v34, %v1874_v36  ;;  %v1305_v44 = vadd.f32 %v3133_v4, %v1304_v33  ;;  %v1000_v50 = vadd.f32 %v2579_v45, %v3133_v4 }
 0x126   : > { %v1998_v42 = vld [vmem:[#allocation3 + $0x150] ss:$2 sm:$0xff]  ;;  %1606 = vst.msk [vmem:[#allocation2 + $0x110] sm:$0xff] %vm1571_vm2, %v1477_v30  ;;  %1670 = vst.msk [vmem:[#allocation2 + $0x310] sm:$0xff] %vm1571_vm2, %v1541_v31  ;;  %v2088_v47 = vmax.f32 %v1966_v40, %v2030_v41  ;;  %v2062_v48 = vld [vmem:[#allocation3 + $0x151] ss:$2 sm:$0xff]  ;;  %v1320_v51 = vadd.f32 %v2675_v46, %v3133_v4  ;;  %v994_v54 = vpop.f32.mrf.mxu0  ;;  %v1314_v55 = vpop.f32.mrf.mxu1 }
 0x127   : > { %1762 = vst.msk [vmem:[#allocation3 + $0x70] sm:$0xff] %vm1571_vm2, %v1754_v35  ;;  %1609 = vst.msk [vmem:[#allocation2 + $0x128] sm:$0xff] %vm1571_vm2, %v1480_v37  ;;  %v1479_v49 = vmax.f32 %v985_v39, 0.0  ;;  %v2104_v52 = vmax.f32 %v1998_v42, %v2062_v48  ;;  %v1543_v53 = vmax.f32 %v1305_v44, 0.0  ;;  %v1482_v56 = vmax.f32 %v1000_v50, 0.0  ;;  %v1765_v45 = vld [vmem:[#allocation2 + $0x108] sm:$0xff] }
 0x128   : > { %1673 = vst.msk [vmem:[#allocation2 + $0x328] sm:$0xff] %vm1571_vm2, %v1544_v38  ;;  %1890 = vst.msk [vmem:[#allocation3 + $0x170] sm:$0xff] %vm1571_vm2, %v1882_v43  ;;  %v1546_v57 = vmax.f32 %v1320_v51, 0.0  ;;  %v995_v58 = vadd.f32 %v3133_v4, %v994_v54  ;;  %v1315_v59 = vadd.f32 %v3133_v4, %v1314_v55  ;;  %v1968_v60 = vld [vmem:[#allocation3 + $0x60] ss:$2 sm:$0xff]  ;;  %v2582_v63 = vpop.f32.mrf.mxu0  ;;  %v2678_v0 = vpop.f32.mrf.mxu1 }
 0x129   : > { %2120 = vst.msk [vmem:[%s3242_s21 + $0x28] sm:$0xff] %vm1571_vm2, %v2088_v47  ;;  %1608 = vst.msk [vmem:[#allocation2 + $0x120] sm:$0xff] %vm1571_vm2, %v1479_v49  ;;  %v2032_v61 = vld [vmem:[#allocation3 + $0x61] ss:$2 sm:$0xff]  ;;  %v2000_v62 = vld [vmem:[#allocation3 + $0x160] ss:$2 sm:$0xff]  ;;  %v1010_v6 = vadd.f32 %v2582_v63, %v3133_v4 }
 0x12a   : > { %2136 = vst.msk [vmem:[%s3242_s21 + $0xa8] sm:$0xff] %vm1571_vm2, %v2104_v52  ;;  %1672 = vst.msk [vmem:[#allocation2 + $0x320] sm:$0xff] %vm1571_vm2, %v1543_v53  ;;  %v2089_v1 = vmax.f32 %v1968_v60, %v2032_v61  ;;  %v2064_v2 = vld [vmem:[#allocation3 + $0x161] ss:$2 sm:$0xff]  ;;  %v1481_v3 = vmax.f32 %v995_v58, 0.0  ;;  %v1545_v5 = vmax.f32 %v1315_v59, 0.0  ;;  %v1004_v10 = vpop.f32.mrf.mxu0  ;;  %v1324_v11 = vpop.f32.mrf.mxu1 }
 0x12b   : > { %1611 = vst.msk [vmem:[#allocation2 + $0x138] sm:$0xff] %vm1571_vm2, %v1482_v56  ;;  %1675 = vst.msk [vmem:[#allocation2 + $0x338] sm:$0xff] %vm1571_vm2, %v1546_v57  ;;  %v2105_v7 = vmax.f32 %v2000_v62, %v2064_v2  ;;  %v3376_v8 = vld [vmem:[%s3564_s2] ss:$0 sm:$0xff]  ;;  %v1484_v12 = vmax.f32 %v1010_v6, 0.0  ;;  %v1893_v49 = vld [vmem:[#allocation2 + $0x308] sm:$0xff] }
 0x12c   : > { %v1330_v9 = vadd.f32 %v3376_v8, %v2678_v0  ;;  %2121 = vst.msk [vmem:[%s3242_s21 + $0x30] sm:$0xff] %vm1571_vm2, %v2089_v1  ;;  %1610 = vst.msk [vmem:[#allocation2 + $0x130] sm:$0xff] %vm1571_vm2, %v1481_v3  ;;  %v1005_v13 = vadd.f32 %v3376_v8, %v1004_v10  ;;  %v1325_v4 = vadd.f32 %v3376_v8, %v1324_v11  ;;  %v2585_v17 = vpop.f32.mrf.mxu0  ;;  %v2681_v18 = vpop.f32.mrf.mxu1  ;;  %v1764_v55 = vld [vmem:[#allocation2 + $0x100] sm:$0xff]  ;;  %v1767_v62 = vld [vmem:[#allocation2 + $0x118] sm:$0xff] }
 0x12d   : > { %1674 = vst.msk [vmem:[#allocation2 + $0x330] sm:$0xff] %vm1571_vm2, %v1545_v5  ;;  %2137 = vst.msk [vmem:[%s3242_s21 + $0xb0] sm:$0xff] %vm1571_vm2, %v2105_v7  ;;  %v1020_v23 = vadd.f32 %v3376_v8, %v2585_v17  ;;  %v1340_v24 = vadd.f32 %v3376_v8, %v2681_v18  ;;  %v1892_v61 = vld [vmem:[#allocation2 + $0x300] sm:$0xff]  ;;  %v1895_v5 = vld [vmem:[#allocation2 + $0x318] sm:$0xff] }
 0x12e   : > { %v1970_v14 = vld [vmem:[#allocation3 + $0x70] ss:$2 sm:$0xff]  ;;  %v2034_v15 = vld [vmem:[#allocation3 + $0x71] ss:$2 sm:$0xff]  ;;  %v1548_v16 = vmax.f32 %v1330_v9, 0.0  ;;  %1613 = vst.msk [vmem:[#allocation2 + $0x148] sm:$0xff] %vm1571_vm2, %v1484_v12  ;;  %v1014_v27 = vpop.f32.mrf.mxu0  ;;  %v1334_v28 = vpop.f32.mrf.mxu1 }
 0x12f   : > { %v2090_v19 = vmax.f32 %v1970_v14, %v2034_v15  ;;  %v2002_v20 = vld [vmem:[#allocation3 + $0x170] ss:$2 sm:$0xff]  ;;  %v2066_v21 = vld [vmem:[#allocation3 + $0x171] ss:$2 sm:$0xff]  ;;  %v1483_v22 = vmax.f32 %v1005_v13, 0.0  ;;  %v1547_v26 = vmax.f32 %v1325_v4, 0.0  ;;  %v1015_v31 = vadd.f32 %v3376_v8, %v1014_v27 }
 0x130   : > { %v2106_v25 = vmax.f32 %v2002_v20, %v2066_v21  ;;  %1677 = vst.msk [vmem:[#allocation2 + $0x348] sm:$0xff] %vm1571_vm2, %v1548_v16  ;;  %v1486_v29 = vmax.f32 %v1020_v23, 0.0  ;;  %v1550_v30 = vmax.f32 %v1340_v24, 0.0  ;;  %v1335_v32 = vadd.f32 %v3376_v8, %v1334_v28  ;;  %v2588_v33 = vpop.f32.mrf.mxu0  ;;  %v2684_v34 = vpop.f32.mrf.mxu1  ;;  %v1766_v13 = vld [vmem:[#allocation2 + $0x110] sm:$0xff]  ;;  %v1769_v24 = vld [vmem:[#allocation2 + $0x128] sm:$0xff] }
 0x131   : > { %2122 = vst.msk [vmem:[%s3242_s21 + $0x38] sm:$0xff] %vm1571_vm2, %v2090_v19  ;;  %1612 = vst.msk [vmem:[#allocation2 + $0x140] sm:$0xff] %vm1571_vm2, %v1483_v22  ;;  %v1485_v35 = vmax.f32 %v1015_v31, 0.0  ;;  %v1030_v37 = vadd.f32 %v3376_v8, %v2588_v33  ;;  %v1350_v38 = vadd.f32 %v3376_v8, %v2684_v34  ;;  %v1894_v17 = vld [vmem:[#allocation2 + $0x310] sm:$0xff] }
 0x132   : > { %2138 = vst.msk [vmem:[%s3242_s21 + $0xb8] sm:$0xff] %vm1571_vm2, %v2106_v25  ;;  %1676 = vst.msk [vmem:[#allocation2 + $0x340] sm:$0xff] %vm1571_vm2, %v1547_v26  ;;  %v1549_v36 = vmax.f32 %v1335_v32, 0.0  ;;  %v1024_v39 = vpop.f32.mrf.mxu0  ;;  %v1344_v40 = vpop.f32.mrf.mxu1 }
 0x133   : > { %1615 = vst.msk [vmem:[#allocation2 + $0x158] sm:$0xff] %vm1571_vm2, %v1486_v29  ;;  %1679 = vst.msk [vmem:[#allocation2 + $0x358] sm:$0xff] %vm1571_vm2, %v1550_v30  ;;  %v1488_v41 = vmax.f32 %v1030_v37, 0.0  ;;  %v1552_v42 = vmax.f32 %v1350_v38, 0.0  ;;  %v1025_v43 = vadd.f32 %v3376_v8, %v1024_v39  ;;  %v1345_v44 = vadd.f32 %v3376_v8, %v1344_v40  ;;  %v1897_v29 = vld [vmem:[#allocation2 + $0x328] sm:$0xff] }
 0x134   : > { %1614 = vst.msk [vmem:[#allocation2 + $0x150] sm:$0xff] %vm1571_vm2, %v1485_v35  ;;  %1678 = vst.msk [vmem:[#allocation2 + $0x350] sm:$0xff] %vm1571_vm2, %v1549_v36  ;;  %v2591_v47 = vpop.f32.mrf.mxu0  ;;  %v2687_v48 = vpop.f32.mrf.mxu1  ;;  %v1768_v36 = vld [vmem:[#allocation2 + $0x120] sm:$0xff] }
 0x135   : > { %v1773_v46 = vld [vmem:[#allocation2 + $0x148] sm:$0xff]  ;;  %1617 = vst.msk [vmem:[#allocation2 + $0x168] sm:$0xff] %vm1571_vm2, %v1488_v41  ;;  %1681 = vst.msk [vmem:[#allocation2 + $0x368] sm:$0xff] %vm1571_vm2, %v1552_v42  ;;  %v1487_v52 = vmax.f32 %v1025_v43, 0.0  ;;  %v1551_v53 = vmax.f32 %v1345_v44, 0.0  ;;  %v1040_v54 = vadd.f32 %v3376_v8, %v2591_v47  ;;  %v1360_v58 = vadd.f32 %v3376_v8, %v2687_v48  ;;  %v1896_v41 = vld [vmem:[#allocation2 + $0x320] sm:$0xff] }
 0x136   : > { %v1781_v50 = vmax.f32 %v1765_v45, %v1773_v46  ;;  %v1034_v59 = vpop.f32.mrf.mxu0  ;;  %v1354_v60 = vpop.f32.mrf.mxu1  ;;  %v1771_v48 = vld [vmem:[#allocation2 + $0x138] sm:$0xff] }
 0x137   : > { %v1901_v51 = vld [vmem:[#allocation2 + $0x348] sm:$0xff]  ;;  %1616 = vst.msk [vmem:[#allocation2 + $0x160] sm:$0xff] %vm1571_vm2, %v1487_v52  ;;  %1680 = vst.msk [vmem:[#allocation2 + $0x360] sm:$0xff] %vm1571_vm2, %v1551_v53  ;;  %v1490_v1 = vmax.f32 %v1040_v54, 0.0  ;;  %v1035_v2 = vadd.f32 %v3376_v8, %v1034_v59  ;;  %v1355_v3 = vadd.f32 %v3376_v8, %v1354_v60  ;;  %v1554_v10 = vmax.f32 %v1360_v58, 0.0  ;;  %v1770_v54 = vld [vmem:[#allocation2 + $0x130] sm:$0xff] }
 0x138   : > { %v1909_v56 = vmax.f32 %v1893_v49, %v1901_v51  ;;  %v1772_v57 = vld [vmem:[#allocation2 + $0x140] sm:$0xff]  ;;  %1789 = vst.msk [vmem:[#allocation3 + $0x88] sm:$0xff] %vm1571_vm2, %v1781_v50  ;;  %v2594_v11 = vpop.f32.mrf.mxu0  ;;  %v2690_v12 = vpop.f32.mrf.mxu1  ;;  %v1899_v49 = vld [vmem:[#allocation2 + $0x338] sm:$0xff] }
 0x139   : > { %v1780_v63 = vmax.f32 %v1764_v55, %v1772_v57  ;;  %v1900_v0 = vld [vmem:[#allocation2 + $0x340] sm:$0xff]  ;;  %1619 = vst.msk [vmem:[#allocation2 + $0x178] sm:$0xff] %vm1571_vm2, %v1490_v1  ;;  %v1489_v15 = vmax.f32 %v1035_v2, 0.0  ;;  %v1553_v16 = vmax.f32 %v1355_v3, 0.0  ;;  %1683 = vst.msk [vmem:[#allocation2 + $0x378] sm:$0xff] %vm1571_vm2, %v1554_v10  ;;  %v1050_v20 = vadd.f32 %v3376_v8, %v2594_v11 }
 0x13a   : > { %1917 = vst.msk [vmem:[#allocation3 + $0x188] sm:$0xff] %vm1571_vm2, %v1909_v56  ;;  %v1908_v6 = vmax.f32 %v1892_v61, %v1900_v0  ;;  %v1775_v7 = vld [vmem:[#allocation2 + $0x158] sm:$0xff]  ;;  %v1370_v21 = vadd.f32 %v3376_v8, %v2690_v12  ;;  %v1044_v22 = vpop.f32.mrf.mxu0  ;;  %v1364_v23 = vpop.f32.mrf.mxu1 }
 0x13b   : > { %v1903_v9 = vld [vmem:[#allocation2 + $0x358] sm:$0xff]  ;;  %1788 = vst.msk [vmem:[#allocation3 + $0x80] sm:$0xff] %vm1571_vm2, %v1780_v63  ;;  %v1783_v4 = vmax.f32 %v1767_v62, %v1775_v7  ;;  %v1774_v18 = vld [vmem:[#allocation2 + $0x150] sm:$0xff]  ;;  %1618 = vst.msk [vmem:[#allocation2 + $0x170] sm:$0xff] %vm1571_vm2, %v1489_v15  ;;  %v1045_v27 = vadd.f32 %v3376_v8, %v1044_v22  ;;  %v1365_v28 = vadd.f32 %v3376_v8, %v1364_v23  ;;  %v1492_v32 = vmax.f32 %v1050_v20, 0.0 }
 0x13c   : > { %v1911_v14 = vmax.f32 %v1895_v5, %v1903_v9  ;;  %1916 = vst.msk [vmem:[#allocation3 + $0x180] sm:$0xff] %vm1571_vm2, %v1908_v6  ;;  %v1902_v19 = vld [vmem:[#allocation2 + $0x350] sm:$0xff]  ;;  %v1782_v25 = vmax.f32 %v1766_v13, %v1774_v18  ;;  %1682 = vst.msk [vmem:[#allocation2 + $0x370] sm:$0xff] %vm1571_vm2, %v1553_v16  ;;  %v1777_v30 = vld [vmem:[#allocation2 + $0x168] sm:$0xff]  ;;  %v1556_v33 = vmax.f32 %v1370_v21, 0.0  ;;  %v2597_v34 = vpop.f32.mrf.mxu0  ;;  %v2693_v35 = vpop.f32.mrf.mxu1 }
 0x13d   : > { %1791 = vst.msk [vmem:[#allocation3 + $0x98] sm:$0xff] %vm1571_vm2, %v1783_v4  ;;  %v1910_v26 = vmax.f32 %v1894_v17, %v1902_v19  ;;  %v1905_v31 = vld [vmem:[#allocation2 + $0x368] sm:$0xff]  ;;  %v1785_v37 = vmax.f32 %v1769_v24, %v1777_v30  ;;  %v1491_v39 = vmax.f32 %v1045_v27, 0.0  ;;  %v1555_v40 = vmax.f32 %v1365_v28, 0.0  ;;  %1621 = vst.msk [vmem:[#allocation2 + $0x188] sm:$0xff] %vm1571_vm2, %v1492_v32  ;;  %v1898_v5 = vld [vmem:[#allocation2 + $0x330] sm:$0xff] }
 0x13e   : > { %1919 = vst.msk [vmem:[#allocation3 + $0x198] sm:$0xff] %vm1571_vm2, %v1911_v14  ;;  %1790 = vst.msk [vmem:[#allocation3 + $0x90] sm:$0xff] %vm1571_vm2, %v1782_v25  ;;  %v1913_v38 = vmax.f32 %v1897_v29, %v1905_v31  ;;  %v1776_v42 = vld [vmem:[#allocation2 + $0x160] sm:$0xff]  ;;  %v1060_v44 = vadd.f32 %v3376_v8, %v2597_v34  ;;  %v1380_v45 = vadd.f32 %v3376_v8, %v2693_v35  ;;  %v1054_v46 = vpop.f32.mrf.mxu0  ;;  %v1374_v47 = vpop.f32.mrf.mxu1 }
 0x13f   : > { %1918 = vst.msk [vmem:[#allocation3 + $0x190] sm:$0xff] %vm1571_vm2, %v1910_v26  ;;  %v1904_v43 = vld [vmem:[#allocation2 + $0x360] sm:$0xff]  ;;  %1685 = vst.msk [vmem:[#allocation2 + $0x388] sm:$0xff] %vm1571_vm2, %v1556_v33  ;;  %v1784_v50 = vmax.f32 %v1768_v36, %v1776_v42  ;;  %v1055_v52 = vadd.f32 %v3376_v8, %v1054_v46  ;;  %v1375_v53 = vadd.f32 %v3376_v8, %v1374_v47 }
 0x140   : > { %1793 = vst.msk [vmem:[#allocation3 + $0xa8] sm:$0xff] %vm1571_vm2, %v1785_v37  ;;  %1921 = vst.msk [vmem:[#allocation3 + $0x1a8] sm:$0xff] %vm1571_vm2, %v1913_v38  ;;  %v1912_v51 = vmax.f32 %v1896_v41, %v1904_v43  ;;  %v1779_v57 = vld [vmem:[#allocation2 + $0x178] sm:$0xff]  ;;  %v1494_v58 = vmax.f32 %v1060_v44, 0.0  ;;  %v2600_v59 = vpop.f32.mrf.mxu0  ;;  %v2696_v60 = vpop.f32.mrf.mxu1  ;;  %v1558_v2 = vmax.f32 %v1380_v45, 0.0 }
 0x141   : > { %1620 = vst.msk [vmem:[#allocation2 + $0x180] sm:$0xff] %vm1571_vm2, %v1491_v39  ;;  %1684 = vst.msk [vmem:[#allocation2 + $0x380] sm:$0xff] %vm1571_vm2, %v1555_v40  ;;  %v1787_v0 = vmax.f32 %v1771_v48, %v1779_v57  ;;  %v1907_v1 = vld [vmem:[#allocation2 + $0x378] sm:$0xff]  ;;  %v1070_v3 = vadd.f32 %v3376_v8, %v2600_v59  ;;  %v1493_v11 = vmax.f32 %v1055_v52, 0.0  ;;  %v1557_v12 = vmax.f32 %v1375_v53, 0.0 }
 0x142   : > { %v1972_v55 = vld [vmem:[#allocation3 + $0x80] ss:$2 sm:$0xff]  ;;  %v2036_v56 = vld [vmem:[#allocation3 + $0x81] ss:$2 sm:$0xff]  ;;  %1792 = vst.msk [vmem:[#allocation3 + $0xa0] sm:$0xff] %vm1571_vm2, %v1784_v50  ;;  %1920 = vst.msk [vmem:[#allocation3 + $0x1a0] sm:$0xff] %vm1571_vm2, %v1912_v51  ;;  %v1915_v7 = vmax.f32 %v1899_v49, %v1907_v1  ;;  %v1064_v13 = vpop.f32.mrf.mxu0  ;;  %v1384_v4 = vpop.f32.mrf.mxu1  ;;  %v1390_v17 = vadd.f32 %v3376_v8, %v2696_v60 }
 0x143   : > { %v2091_v61 = vmax.f32 %v1972_v55, %v2036_v56  ;;  %v2004_v62 = vld [vmem:[#allocation3 + $0x180] ss:$2 sm:$0xff]  ;;  %v2068_v63 = vld [vmem:[#allocation3 + $0x181] ss:$2 sm:$0xff]  ;;  %v1778_v9 = vld [vmem:[#allocation2 + $0x170] sm:$0xff]  ;;  %1623 = vst.msk [vmem:[#allocation2 + $0x198] sm:$0xff] %vm1571_vm2, %v1494_v58  ;;  %v1065_v21 = vadd.f32 %v3376_v8, %v1064_v13  ;;  %v1385_v22 = vadd.f32 %v3376_v8, %v1384_v4 }
 0x144   : > { %v2107_v6 = vmax.f32 %v2004_v62, %v2068_v63  ;;  %v1906_v10 = vld [vmem:[#allocation2 + $0x370] sm:$0xff]  ;;  %1795 = vst.msk [vmem:[#allocation3 + $0xb8] sm:$0xff] %vm1571_vm2, %v1787_v0  ;;  %v1786_v14 = vmax.f32 %v1770_v54, %v1778_v9  ;;  %1687 = vst.msk [vmem:[#allocation2 + $0x398] sm:$0xff] %vm1571_vm2, %v1558_v2  ;;  %v1496_v16 = vmax.f32 %v1070_v3, 0.0  ;;  %v2603_v23 = vpop.f32.mrf.mxu0  ;;  %v2699_v24 = vpop.f32.mrf.mxu1  ;;  %v1560_v27 = vmax.f32 %v1390_v17, 0.0 }
 0x145   : > { %2123 = vst.msk [vmem:[%s3242_s21 + $0x40] sm:$0xff] %vm1571_vm2, %v2091_v61  ;;  %v1914_v15 = vmax.f32 %v1898_v5, %v1906_v10  ;;  %v1974_v18 = vld [vmem:[#allocation3 + $0x90] ss:$2 sm:$0xff]  ;;  %v2038_v19 = vld [vmem:[#allocation3 + $0x91] ss:$2 sm:$0xff]  ;;  %1923 = vst.msk [vmem:[#allocation3 + $0x1b8] sm:$0xff] %vm1571_vm2, %v1915_v7  ;;  %v1080_v28 = vadd.f32 %v3376_v8, %v2603_v23  ;;  %v1400_v29 = vadd.f32 %v3376_v8, %v2699_v24 }
 0x146   : > { %2139 = vst.msk [vmem:[%s3242_s21 + $0xc0] sm:$0xff] %vm1571_vm2, %v2107_v6  ;;  %v2006_v20 = vld [vmem:[#allocation3 + $0x190] ss:$2 sm:$0xff]  ;;  %1622 = vst.msk [vmem:[#allocation2 + $0x190] sm:$0xff] %vm1571_vm2, %v1493_v11  ;;  %v2092_v25 = vmax.f32 %v1974_v18, %v2038_v19  ;;  %v2070_v26 = vld [vmem:[#allocation3 + $0x191] ss:$2 sm:$0xff]  ;;  %v1074_v33 = vpop.f32.mrf.mxu0  ;;  %v1394_v34 = vpop.f32.mrf.mxu1 }
 0x147   : > { %1686 = vst.msk [vmem:[#allocation2 + $0x390] sm:$0xff] %vm1571_vm2, %v1557_v12  ;;  %1794 = vst.msk [vmem:[#allocation3 + $0xb0] sm:$0xff] %vm1571_vm2, %v1786_v14  ;;  %v2108_v30 = vmax.f32 %v2006_v20, %v2070_v26  ;;  %v1495_v31 = vmax.f32 %v1065_v21, 0.0  ;;  %v1559_v32 = vmax.f32 %v1385_v22, 0.0  ;;  %v1498_v35 = vmax.f32 %v1080_v28, 0.0  ;;  %v1797_v24 = vld [vmem:[#allocation2 + $0x188] sm:$0xff] }
 0x148   : > { %1922 = vst.msk [vmem:[#allocation3 + $0x1b0] sm:$0xff] %vm1571_vm2, %v1914_v15  ;;  %1625 = vst.msk [vmem:[#allocation2 + $0x1a8] sm:$0xff] %vm1571_vm2, %v1496_v16  ;;  %v1562_v36 = vmax.f32 %v1400_v29, 0.0  ;;  %v1075_v37 = vadd.f32 %v3376_v8, %v1074_v33  ;;  %v1395_v38 = vadd.f32 %v3376_v8, %v1394_v34  ;;  %v2606_v42 = vpop.f32.mrf.mxu0  ;;  %v2702_v43 = vpop.f32.mrf.mxu1  ;;  %v1925_v28 = vld [vmem:[#allocation2 + $0x388] sm:$0xff]  ;;  %v1796_v29 = vld [vmem:[#allocation2 + $0x180] sm:$0xff] }
 0x149   : > { %2124 = vst.msk [vmem:[%s3242_s21 + $0x48] sm:$0xff] %vm1571_vm2, %v2092_v25  ;;  %1689 = vst.msk [vmem:[#allocation2 + $0x3a8] sm:$0xff] %vm1571_vm2, %v1560_v27  ;;  %v1976_v39 = vld [vmem:[#allocation3 + $0xa0] ss:$2 sm:$0xff]  ;;  %v2040_v40 = vld [vmem:[#allocation3 + $0xa1] ss:$2 sm:$0xff]  ;;  %v1090_v48 = vadd.f32 %v3376_v8, %v2606_v42  ;;  %v1410_v50 = vadd.f32 %v3376_v8, %v2702_v43 }
 0x14a   : > { %2140 = vst.msk [vmem:[%s3242_s21 + $0xc8] sm:$0xff] %vm1571_vm2, %v2108_v30  ;;  %v2008_v41 = vld [vmem:[#allocation3 + $0x1a0] ss:$2 sm:$0xff]  ;;  %1624 = vst.msk [vmem:[#allocation2 + $0x1a0] sm:$0xff] %vm1571_vm2, %v1495_v31  ;;  %v2093_v44 = vmax.f32 %v1976_v39, %v2040_v40  ;;  %v2072_v45 = vld [vmem:[#allocation3 + $0x1a1] ss:$2 sm:$0xff]  ;;  %v1084_v51 = vpop.f32.mrf.mxu0  ;;  %v1404_v52 = vpop.f32.mrf.mxu1 }
 0x14b   : > { %1688 = vst.msk [vmem:[#allocation2 + $0x3a0] sm:$0xff] %vm1571_vm2, %v1559_v32  ;;  %1627 = vst.msk [vmem:[#allocation2 + $0x1b8] sm:$0xff] %vm1571_vm2, %v1498_v35  ;;  %v1497_v46 = vmax.f32 %v1075_v37, 0.0  ;;  %v1561_v47 = vmax.f32 %v1395_v38, 0.0  ;;  %v2109_v49 = vmax.f32 %v2008_v41, %v2072_v45  ;;  %v1500_v53 = vmax.f32 %v1090_v48, 0.0  ;;  %v1924_v30 = vld [vmem:[#allocation2 + $0x380] sm:$0xff] }
 0x14c   : > { %1691 = vst.msk [vmem:[#allocation2 + $0x3b8] sm:$0xff] %vm1571_vm2, %v1562_v36  ;;  %2125 = vst.msk [vmem:[%s3242_s21 + $0x50] sm:$0xff] %vm1571_vm2, %v2093_v44  ;;  %v1085_v54 = vadd.f32 %v3376_v8, %v1084_v51  ;;  %v1405_v55 = vadd.f32 %v3376_v8, %v1404_v52  ;;  %v2609_v59 = vpop.f32.mrf.mxu0  ;;  %v2705_v60 = vpop.f32.mrf.mxu1  ;;  %v1564_v63 = vmax.f32 %v1410_v50, 0.0  ;;  %v1799_v45 = vld [vmem:[#allocation2 + $0x198] sm:$0xff] }
 0x14d   : > { %1626 = vst.msk [vmem:[#allocation2 + $0x1b0] sm:$0xff] %vm1571_vm2, %v1497_v46  ;;  %1690 = vst.msk [vmem:[#allocation2 + $0x3b0] sm:$0xff] %vm1571_vm2, %v1561_v47  ;;  %v1100_v3 = vadd.f32 %v3376_v8, %v2609_v59  ;;  %v1420_v5 = vadd.f32 %v3376_v8, %v2705_v60  ;;  %v1927_v46 = vld [vmem:[#allocation2 + $0x398] sm:$0xff]  ;;  %v1798_v50 = vld [vmem:[#allocation2 + $0x190] sm:$0xff] }
 0x14e   : > { %2141 = vst.msk [vmem:[%s3242_s21 + $0xd0] sm:$0xff] %vm1571_vm2, %v2109_v49  ;;  %v1978_v56 = vld [vmem:[#allocation3 + $0xb0] ss:$2 sm:$0xff]  ;;  %v2042_v57 = vld [vmem:[#allocation3 + $0xb1] ss:$2 sm:$0xff]  ;;  %1629 = vst.msk [vmem:[#allocation2 + $0x1c8] sm:$0xff] %vm1571_vm2, %v1500_v53  ;;  %v1094_v6 = vpop.f32.mrf.mxu0  ;;  %v1414_v7 = vpop.f32.mrf.mxu1 }
 0x14f   : > { %v2010_v58 = vld [vmem:[#allocation3 + $0x1b0] ss:$2 sm:$0xff]  ;;  %v2094_v61 = vmax.f32 %v1978_v56, %v2042_v57  ;;  %v2074_v62 = vld [vmem:[#allocation3 + $0x1b1] ss:$2 sm:$0xff]  ;;  %v1499_v0 = vmax.f32 %v1085_v54, 0.0  ;;  %v1563_v1 = vmax.f32 %v1405_v55, 0.0  ;;  %v1095_v9 = vadd.f32 %v3376_v8, %v1094_v6 }
 0x150   : > { %v2110_v2 = vmax.f32 %v2010_v58, %v2074_v62  ;;  %1693 = vst.msk [vmem:[#allocation2 + $0x3c8] sm:$0xff] %vm1571_vm2, %v1564_v63  ;;  %v1415_v10 = vadd.f32 %v3376_v8, %v1414_v7  ;;  %v1502_v11 = vmax.f32 %v1100_v3, 0.0  ;;  %v1566_v12 = vmax.f32 %v1420_v5, 0.0  ;;  %v2612_v13 = vpop.f32.mrf.mxu0  ;;  %v2708_v4 = vpop.f32.mrf.mxu1  ;;  %v1926_v53 = vld [vmem:[#allocation2 + $0x390] sm:$0xff]  ;;  %v1801_v59 = vld [vmem:[#allocation2 + $0x1a8] sm:$0xff] }
 0x151   : > { %2126 = vst.msk [vmem:[%s3242_s21 + $0x58] sm:$0xff] %vm1571_vm2, %v2094_v61  ;;  %1628 = vst.msk [vmem:[#allocation2 + $0x1c0] sm:$0xff] %vm1571_vm2, %v1499_v0  ;;  %v1501_v14 = vmax.f32 %v1095_v9, 0.0  ;;  %v1110_v16 = vadd.f32 %v3376_v8, %v2612_v13  ;;  %v1430_v17 = vadd.f32 %v3376_v8, %v2708_v4  ;;  %v1929_v62 = vld [vmem:[#allocation2 + $0x3a8] sm:$0xff] }
 0x152   : > { %1692 = vst.msk [vmem:[#allocation2 + $0x3c0] sm:$0xff] %vm1571_vm2, %v1563_v1  ;;  %2142 = vst.msk [vmem:[%s3242_s21 + $0xd8] sm:$0xff] %vm1571_vm2, %v2110_v2  ;;  %v1565_v15 = vmax.f32 %v1415_v10, 0.0  ;;  %v1104_v18 = vpop.f32.mrf.mxu0  ;;  %v1424_v19 = vpop.f32.mrf.mxu1  ;;  %v1800_v1 = vld [vmem:[#allocation2 + $0x1a0] sm:$0xff]  ;;  %v1803_v9 = vld [vmem:[#allocation2 + $0x1b8] sm:$0xff] }
 0x153   : > { %1631 = vst.msk [vmem:[#allocation2 + $0x1d8] sm:$0xff] %vm1571_vm2, %v1502_v11  ;;  %1695 = vst.msk [vmem:[#allocation2 + $0x3d8] sm:$0xff] %vm1571_vm2, %v1566_v12  ;;  %v1504_v20 = vmax.f32 %v1110_v16, 0.0  ;;  %v1568_v21 = vmax.f32 %v1430_v17, 0.0  ;;  %v1105_v22 = vadd.f32 %v3376_v8, %v1104_v18  ;;  %v1425_v23 = vadd.f32 %v3376_v8, %v1424_v19  ;;  %v1928_v5 = vld [vmem:[#allocation2 + $0x3a0] sm:$0xff]  ;;  %v1931_v10 = vld [vmem:[#allocation2 + $0x3b8] sm:$0xff] }
 0x154   : > { %1630 = vst.msk [vmem:[#allocation2 + $0x1d0] sm:$0xff] %vm1571_vm2, %v1501_v14  ;;  %1694 = vst.msk [vmem:[#allocation2 + $0x3d0] sm:$0xff] %vm1571_vm2, %v1565_v15  ;;  %v2615_v26 = vpop.f32.mrf.mxu0  ;;  %v2711_v27 = vpop.f32.mrf.mxu1  ;;  %v1802_v19 = vld [vmem:[#allocation2 + $0x1b0] sm:$0xff] }
 0x155   : > { %v1805_v25 = vld [vmem:[#allocation2 + $0x1c8] sm:$0xff]  ;;  %1633 = vst.msk [vmem:[#allocation2 + $0x1e8] sm:$0xff] %vm1571_vm2, %v1504_v20  ;;  %1697 = vst.msk [vmem:[#allocation2 + $0x3e8] sm:$0xff] %vm1571_vm2, %v1568_v21  ;;  %v1503_v32 = vmax.f32 %v1105_v22, 0.0  ;;  %v1567_v33 = vmax.f32 %v1425_v23, 0.0  ;;  %v1120_v34 = vadd.f32 %v3376_v8, %v2615_v26  ;;  %v1440_v38 = vadd.f32 %v3376_v8, %v2711_v27  ;;  %v1930_v23 = vld [vmem:[#allocation2 + $0x3b0] sm:$0xff] }
 0x156   : > { %v1813_v31 = vmax.f32 %v1797_v24, %v1805_v25  ;;  %v1114_v39 = vpop.f32.mrf.mxu0  ;;  %v1434_v40 = vpop.f32.mrf.mxu1 }
 0x157   : > { %v1933_v35 = vld [vmem:[#allocation2 + $0x3c8] sm:$0xff]  ;;  %1632 = vst.msk [vmem:[#allocation2 + $0x1e0] sm:$0xff] %vm1571_vm2, %v1503_v32  ;;  %1696 = vst.msk [vmem:[#allocation2 + $0x3e0] sm:$0xff] %vm1571_vm2, %v1567_v33  ;;  %v1506_v44 = vmax.f32 %v1120_v34, 0.0  ;;  %v1570_v47 = vmax.f32 %v1440_v38, 0.0  ;;  %v1115_v48 = vadd.f32 %v3376_v8, %v1114_v39  ;;  %v1435_v49 = vadd.f32 %v3376_v8, %v1434_v40 }
 0x158   : > { %v1804_v36 = vld [vmem:[#allocation2 + $0x1c0] sm:$0xff]  ;;  %1821 = vst.msk [vmem:[#allocation3 + $0xc8] sm:$0xff] %vm1571_vm2, %v1813_v31  ;;  %v1941_v41 = vmax.f32 %v1925_v28, %v1933_v35 }
 0x159   : > { %v1932_v37 = vld [vmem:[#allocation2 + $0x3c0] sm:$0xff]  ;;  %v1812_v42 = vmax.f32 %v1796_v29, %v1804_v36  ;;  %1635 = vst.msk [vmem:[#allocation2 + $0x1f8] sm:$0xff] %vm1571_vm2, %v1506_v44  ;;  %1699 = vst.msk [vmem:[#allocation2 + $0x3f8] sm:$0xff] %vm1571_vm2, %v1570_v47  ;;  %v1505_v58 = vmax.f32 %v1115_v48, 0.0  ;;  %v1569_v8 = vmax.f32 %v1435_v49, 0.0 }
 0x15a   : > { %v1940_v43 = vmax.f32 %v1924_v30, %v1932_v37  ;;  %1949 = vst.msk [vmem:[#allocation3 + $0x1c8] sm:$0xff] %vm1571_vm2, %v1941_v41  ;;  %v1807_v51 = vld [vmem:[#allocation2 + $0x1d8] sm:$0xff] }
 0x15b   : > { %1820 = vst.msk [vmem:[#allocation3 + $0xc0] sm:$0xff] %vm1571_vm2, %v1812_v42  ;;  %v1935_v52 = vld [vmem:[#allocation2 + $0x3d8] sm:$0xff]  ;;  %v1815_v54 = vmax.f32 %v1799_v45, %v1807_v51  ;;  %v1806_v56 = vld [vmem:[#allocation2 + $0x1d0] sm:$0xff]  ;;  %1634 = vst.msk [vmem:[#allocation2 + $0x1f0] sm:$0xff] %vm1571_vm2, %v1505_v58 }
 0x15c   : > { %1948 = vst.msk [vmem:[#allocation3 + $0x1c0] sm:$0xff] %vm1571_vm2, %v1940_v43  ;;  %v1943_v55 = vmax.f32 %v1927_v46, %v1935_v52  ;;  %v1934_v57 = vld [vmem:[#allocation2 + $0x3d0] sm:$0xff]  ;;  %v1814_v60 = vmax.f32 %v1798_v50, %v1806_v56  ;;  %v1809_v63 = vld [vmem:[#allocation2 + $0x1e8] sm:$0xff]  ;;  %1698 = vst.msk [vmem:[#allocation2 + $0x3f0] sm:$0xff] %vm1571_vm2, %v1569_v8 }
 0x15d   : > { %v1942_v61 = vmax.f32 %v1926_v53, %v1934_v57  ;;  %1823 = vst.msk [vmem:[#allocation3 + $0xd8] sm:$0xff] %vm1571_vm2, %v1815_v54  ;;  %v1937_v0 = vld [vmem:[#allocation2 + $0x3e8] sm:$0xff]  ;;  %v1817_v2 = vmax.f32 %v1801_v59, %v1809_v63 }
 0x15e   : > { %1951 = vst.msk [vmem:[#allocation3 + $0x1d8] sm:$0xff] %vm1571_vm2, %v1943_v55  ;;  %1822 = vst.msk [vmem:[#allocation3 + $0xd0] sm:$0xff] %vm1571_vm2, %v1814_v60  ;;  %v1945_v3 = vmax.f32 %v1929_v62, %v1937_v0  ;;  %v1808_v6 = vld [vmem:[#allocation2 + $0x1e0] sm:$0xff] }
 0x15f   : > { %1950 = vst.msk [vmem:[#allocation3 + $0x1d0] sm:$0xff] %vm1571_vm2, %v1942_v61  ;;  %v1936_v7 = vld [vmem:[#allocation2 + $0x3e0] sm:$0xff]  ;;  %1825 = vst.msk [vmem:[#allocation3 + $0xe8] sm:$0xff] %vm1571_vm2, %v1817_v2  ;;  %v1816_v11 = vmax.f32 %v1800_v1, %v1808_v6 }
 0x160   : > { %1953 = vst.msk [vmem:[#allocation3 + $0x1e8] sm:$0xff] %vm1571_vm2, %v1945_v3  ;;  %v1944_v12 = vmax.f32 %v1928_v5, %v1936_v7  ;;  %v1811_v17 = vld [vmem:[#allocation2 + $0x1f8] sm:$0xff] }
 0x161   : > { %1824 = vst.msk [vmem:[#allocation3 + $0xe0] sm:$0xff] %vm1571_vm2, %v1816_v11  ;;  %v1939_v18 = vld [vmem:[#allocation2 + $0x3f8] sm:$0xff]  ;;  %v1819_v21 = vmax.f32 %v1803_v9, %v1811_v17 }
 0x162   : > { %v1980_v13 = vld [vmem:[#allocation3 + $0xc0] ss:$2 sm:$0xff]  ;;  %v2044_v4 = vld [vmem:[#allocation3 + $0xc1] ss:$2 sm:$0xff]  ;;  %1952 = vst.msk [vmem:[#allocation3 + $0x1e0] sm:$0xff] %vm1571_vm2, %v1944_v12  ;;  %v1947_v22 = vmax.f32 %v1931_v10, %v1939_v18  ;;  %v1810_v24 = vld [vmem:[#allocation2 + $0x1f0] sm:$0xff] }
 0x163   : > { %v2012_v14 = vld [vmem:[#allocation3 + $0x1c0] ss:$2 sm:$0xff]  ;;  %v2095_v15 = vmax.f32 %v1980_v13, %v2044_v4  ;;  %v2076_v16 = vld [vmem:[#allocation3 + $0x1c1] ss:$2 sm:$0xff]  ;;  %v1938_v25 = vld [vmem:[#allocation2 + $0x3f0] sm:$0xff]  ;;  %1827 = vst.msk [vmem:[#allocation3 + $0xf8] sm:$0xff] %vm1571_vm2, %v1819_v21  ;;  %v1818_v29 = vmax.f32 %v1802_v19, %v1810_v24 }
 0x164   : > { %v2111_v20 = vmax.f32 %v2012_v14, %v2076_v16  ;;  %1955 = vst.msk [vmem:[#allocation3 + $0x1f8] sm:$0xff] %vm1571_vm2, %v1947_v22  ;;  %v1946_v30 = vmax.f32 %v1930_v23, %v1938_v25 }
 0x165   : > { %2127 = vst.msk [vmem:[%s3242_s21 + $0x60] sm:$0xff] %vm1571_vm2, %v2095_v15  ;;  %v1982_v26 = vld [vmem:[#allocation3 + $0xd0] ss:$2 sm:$0xff]  ;;  %v2046_v27 = vld [vmem:[#allocation3 + $0xd1] ss:$2 sm:$0xff]  ;;  %1826 = vst.msk [vmem:[#allocation3 + $0xf0] sm:$0xff] %vm1571_vm2, %v1818_v29 }
 0x166   : > { %2143 = vst.msk [vmem:[%s3242_s21 + $0xe0] sm:$0xff] %vm1571_vm2, %v2111_v20  ;;  %v2014_v28 = vld [vmem:[#allocation3 + $0x1d0] ss:$2 sm:$0xff]  ;;  %v2096_v31 = vmax.f32 %v1982_v26, %v2046_v27  ;;  %v2078_v32 = vld [vmem:[#allocation3 + $0x1d1] ss:$2 sm:$0xff]  ;;  %1954 = vst.msk [vmem:[#allocation3 + $0x1f0] sm:$0xff] %vm1571_vm2, %v1946_v30 }
 0x167   : > { %v2112_v33 = vmax.f32 %v2014_v28, %v2078_v32 }
 0x168   : > { %2128 = vst.msk [vmem:[%s3242_s21 + $0x68] sm:$0xff] %vm1571_vm2, %v2096_v31  ;;  %v1984_v34 = vld [vmem:[#allocation3 + $0xe0] ss:$2 sm:$0xff]  ;;  %v2048_v35 = vld [vmem:[#allocation3 + $0xe1] ss:$2 sm:$0xff] }
 0x169   : > { %2144 = vst.msk [vmem:[%s3242_s21 + $0xe8] sm:$0xff] %vm1571_vm2, %v2112_v33  ;;  %v2016_v36 = vld [vmem:[#allocation3 + $0x1e0] ss:$2 sm:$0xff]  ;;  %v2097_v37 = vmax.f32 %v1984_v34, %v2048_v35  ;;  %v2080_v38 = vld [vmem:[#allocation3 + $0x1e1] ss:$2 sm:$0xff] }
 0x16a   : > { %v2113_v39 = vmax.f32 %v2016_v36, %v2080_v38 }
 0x16b   : > { %2129 = vst.msk [vmem:[%s3242_s21 + $0x70] sm:$0xff] %vm1571_vm2, %v2097_v37 }
 0x16c   : > { %2145 = vst.msk [vmem:[%s3242_s21 + $0xf0] sm:$0xff] %vm1571_vm2, %v2113_v39  ;;  %v1986_v40 = vld [vmem:[#allocation3 + $0xf0] ss:$2 sm:$0xff]  ;;  %v2050_v41 = vld [vmem:[#allocation3 + $0xf1] ss:$2 sm:$0xff] }
 0x16d   : > { %v2018_v42 = vld [vmem:[#allocation3 + $0x1f0] ss:$2 sm:$0xff]  ;;  %v2098_v43 = vmax.f32 %v1986_v40, %v2050_v41  ;;  %v2082_v44 = vld [vmem:[#allocation3 + $0x1f1] ss:$2 sm:$0xff] }
 0x16e   : > { %v2114_v45 = vmax.f32 %v2018_v42, %v2082_v44 }
 0x16f   : > { %2130 = vst.msk [vmem:[%s3242_s21 + $0x78] sm:$0xff] %vm1571_vm2, %v2098_v43 }
 0x170   : > { %2146 = vst.msk [vmem:[%s3242_s21 + $0xf8] sm:$0xff] %vm1571_vm2, %v2114_v45 }
 0x171 PF: > { %s13_s16 = sadd.s32 1, %s2799_s16   ;;  %s3567_s12 = smov %s2791_s14 }
 0x172   : > { %p10_p8 = scmp.ge.s32.totalorder %s13_s16, 10   ;;  %s3568_s13 = smov %s2795_s15 }
 0x173   : > { %s3569_s14 = smov %s3572_s17  ;;  %s3570_s15 = smov %s3576_s18 }
 0x174   :  { %12 = sbr.rel (!%p10_p8) target bundleno = 3 (0x3), region = 125 }

// kernel: anime_cnn_forward.4
= control target key start
LH: loop header
LB: loop body
LE: loop exit
PB: predicated region body
PF: predicated region fallthrough
CT: control target
= control target key end

     0   :  { %s2274_s12 = smov 0   ;;  %s2276_s13 = smov 0   ;;  %s3112_s0 = inlined_call_operand.vmem [shape: f32[2,1024,288], index: 0, kind: input, shape index: {}]   ;;  %s3113_s1 = inlined_call_operand.vmem [shape: f32[288,64], index: 1, kind: input, shape index: {}]   ;;  %s3114_s2 = inlined_call_operand.vmem [shape: f32[1,64], index: 2, kind: input, shape index: {}]   ;;  %s3115_s3 = inlined_call_operand.vmem [shape: f32[2,256,64], index: 3, kind: output, shape index: {}]  }
   0x1   :  { %s2278_s14 = smov 0   ;;  %s2280_s15 = smov 0  }
   0x2   :  { %s2282_s16 = smov 0  }
   0x3 LB: > { %s22_s17 = sadd.s32 1, %s2243_s14  ;;  %s25_s18 = sadd.s32 1, %s2247_s15  ;;  %s2251_s16 = sphi %s2282_s16, %s13_s16   ;;  %s2247_s15 = sphi %s2280_s15, %s3120_s15   ;;  %s2243_s14 = sphi %s2278_s14, %s3119_s14   ;;  %s2239_s13 = sphi %s2276_s13, %s3118_s13   ;;  %s2235_s12 = sphi %s2274_s12, %s3117_s12  }
   0x4   : > { %p23_p0 = scmp.ge.s32.totalorder %s22_s17, 2  ;;  %p1860_p1 = scmp.ge.s32.totalorder %s2251_s16, 1 }
   0x5   : > { %p159_p2 = scmp.lt.s32.totalorder %s2251_s16, 5 }
   0x6   : > { %s3122_s17 = smov (%p23_p0, %s22_s17), 0  ;;  %s3124_s18 = smov (!%p23_p0, %s25_s18), %s2247_s15 }
   0x7   : > { %p160_p3 = pnand %p1860_p1, %p159_p2  ;;  %p27_p4 = scmp.ge.s32.totalorder %s3124_s18, 2 }
   0x8   : > { %s1861_s19 = sshll.u32 (!%p160_p3), %s2235_s12, 6  ;;  %p193_p5 = scmp.lt.s32.totalorder (!%p160_p3), %s2239_s13, 1 }
   0x9   : > { %s3126_s18 = smov (%p27_p4, %s3124_s18), 0  ;;  %163 = sbr.rel (%p160_p3) target bundleno = 489 (0x1e9), region = 32 }
   0xa   : > { %p195_p6 = scmp.lt.s32.totalorder (!%p160_p3), %s1861_s19, 127 }
   0xe   : > { %v420_v0 = vld [vmem:[%s3113_s1 + $0x78] sm:$0xff]  ;;  %v2253_v1 = vmov 0.0   ;;  %v419_v2 = vld [vmem:[%s3113_s1 + $0x70] sm:$0xff]  ;;  %v418_v3 = vld [vmem:[%s3113_s1 + $0x68] sm:$0xff]  ;;  %s3128_s13 = smov (!%p193_p5, %s2239_s13), 1  ;;  %s3130_s19 = smov (!%p195_p6, %s1861_s19), 127 }
   0xf   : > { %641 = vmatprep.subr.mxu0 %v2253_v1  ;;  %2105 = vmatprep.subr.mxu1 %v2253_v1  ;;  %v417_v4 = vld [vmem:[%s3113_s1 + $0x60] sm:$0xff]  ;;  %v416_v5 = vld [vmem:[%s3113_s1 + $0x58] sm:$0xff]  ;;  %v415_v6 = vld [vmem:[%s3113_s1 + $0x50] sm:$0xff]  ;;  %s2170_s30 = smul.u32 384, %s3128_s13  ;;  %vm448_vm0 = vcmask 261120   ;;  %vm1475_vm1 = vcmask 523264  }
  0x10   : > { %642 = vmatpush1.msra.mxu0 %v420_v0  ;;  %2137 = vmatpush1.msra.mxu1 %v420_v0  ;;  %v414_v7 = vld [vmem:[%s3113_s1 + $0x48] sm:$0xff]  ;;  %v413_v8 = vld [vmem:[%s3113_s1 + $0x40] sm:$0xff]  ;;  %v412_v9 = vld [vmem:[%s3113_s1 + $0x38] sm:$0xff]  ;;  %s2169_s6 = smul.u32 3, %s3130_s19 }
  0x11   : > { %643 = vmatprep.subr.mxu0 %v2253_v1  ;;  %2106 = vmatprep.subr.mxu1 %v2253_v1  ;;  %v411_v10 = vld [vmem:[%s3113_s1 + $0x30] sm:$0xff]  ;;  %v410_v11 = vld [vmem:[%s3113_s1 + $0x28] sm:$0xff]  ;;  %v409_v12 = vld [vmem:[%s3113_s1 + $0x20] sm:$0xff] }
  0x12   : > { %644 = vmatpush1.msra.mxu0 %v419_v2  ;;  %2138 = vmatpush1.msra.mxu1 %v419_v2  ;;  %v408_v13 = vld [vmem:[%s3113_s1 + $0x18] sm:$0xff]  ;;  %v407_v14 = vld [vmem:[%s3113_s1 + $0x10] sm:$0xff]  ;;  %v406_v15 = vld [vmem:[%s3113_s1 + $0x8] sm:$0xff]  ;;  %s199_s11 = sadd.s32 %s2170_s30, %s2169_s6 }
  0x13   : > { %645 = vmatprep.subr.mxu0 %v2253_v1  ;;  %2107 = vmatprep.subr.mxu1 %v2253_v1  ;;  %v405_v16 = vld [vmem:[%s3113_s1] sm:$0xff]  ;;  %v436_v17 = vld [vmem:[%s3113_s1 + $0xf8] sm:$0xff]  ;;  %v435_v18 = vld [vmem:[%s3113_s1 + $0xf0] sm:$0xff]  ;;  %s1862_s21 = sshll.u32 %s199_s11, 3 }
  0x14   : > { %646 = vmatpush1.msra.mxu0 %v418_v3  ;;  %2139 = vmatpush1.msra.mxu1 %v418_v3  ;;  %v434_v19 = vld [vmem:[%s3113_s1 + $0xe8] sm:$0xff]  ;;  %v433_v20 = vld [vmem:[%s3113_s1 + $0xe0] sm:$0xff]  ;;  %v432_v21 = vld [vmem:[%s3113_s1 + $0xd8] sm:$0xff]  ;;  %s2470_s28 = scalar_lea.vmem %s3112_s0, %s1862_s21  ;;  %s1863_s21 = sshll.u32 %s2235_s12, 4 }
  0x15   : > { %647 = vmatprep.subr.mxu0 %v2253_v1  ;;  %2108 = vmatprep.subr.mxu1 %v2253_v1  ;;  %v431_v22 = vld [vmem:[%s3113_s1 + $0xd0] sm:$0xff]  ;;  %v430_v23 = vld [vmem:[%s3113_s1 + $0xc8] sm:$0xff]  ;;  %v429_v24 = vld [vmem:[%s3113_s1 + $0xc0] sm:$0xff]  ;;  %p2848_p7 = scmp.lt.s32.totalorder %s1863_s21, 31  ;;  %s1864_s12 = sshll.u32 %s3128_s13, 5 }
  0x16   : > { %648 = vmatpush1.msra.mxu0 %v417_v4  ;;  %2140 = vmatpush1.msra.mxu1 %v417_v4  ;;  %v428_v25 = vld [vmem:[%s3113_s1 + $0xb8] sm:$0xff]  ;;  %v427_v26 = vld [vmem:[%s3113_s1 + $0xb0] sm:$0xff]  ;;  %v426_v27 = vld [vmem:[%s3113_s1 + $0xa8] sm:$0xff] }
  0x17   : > { %649 = vmatprep.subr.mxu0 %v2253_v1  ;;  %2109 = vmatprep.subr.mxu1 %v2253_v1  ;;  %v425_v28 = vld [vmem:[%s3113_s1 + $0xa0] sm:$0xff]  ;;  %v424_v29 = vld [vmem:[%s3113_s1 + $0x98] sm:$0xff]  ;;  %v423_v30 = vld [vmem:[%s3113_s1 + $0x90] sm:$0xff]  ;;  %s3132_s21 = smov (!%p2848_p7, %s1863_s21), 31 }
  0x18   : > { %650 = vmatpush1.msra.mxu0 %v416_v5  ;;  %2141 = vmatpush1.msra.mxu1 %v416_v5  ;;  %v422_v31 = vld [vmem:[%s3113_s1 + $0x88] sm:$0xff]  ;;  %v421_v32 = vld [vmem:[%s3113_s1 + $0x80] sm:$0xff]  ;;  %v440_v37 = vld [vmem:[%s3113_s1 + $0x118] sm:$0xff]  ;;  %s209_s13 = sadd.s32 %s1864_s12, %s3132_s21 }
  0x19   : > { %651 = vmatprep.subr.mxu0 %v2253_v1  ;;  %2110 = vmatprep.subr.mxu1 %v2253_v1  ;;  %v214_v33 = vld [vmem:[%s2470_s28 + $0x8] sm:$0xff]  ;;  %v213_v35 = vld [vmem:[%s2470_s28] sm:$0xff]  ;;  %v439_v40 = vld [vmem:[%s3113_s1 + $0x110] sm:$0xff]  ;;  %s1865_s23 = sshll.u32 %s209_s13, 3 }
  0x1a   : > { %652 = vmatpush1.msra.mxu0 %v415_v6  ;;  %2142 = vmatpush1.msra.mxu1 %v415_v6  ;;  %v358_v34 = vld [vmem:[%s2470_s28 + $0x488] sm:$0xff]  ;;  %v357_v36 = vld [vmem:[%s2470_s28 + $0x480] sm:$0xff]  ;;  %v216_v41 = vld [vmem:[%s2470_s28 + $0x18] sm:$0xff]  ;;  %s2889_s26 = scalar_lea.vmem %s3115_s3, %s1865_s23 }
  0x1b   : > { %653 = vmatprep.subr.mxu0 %v2253_v1  ;;  %2111 = vmatprep.subr.mxu1 %v2253_v1  ;;  %v217_v38 = vld [vmem:[%s2470_s28 + $0x20] sm:$0xff]  ;;  %v360_v42 = vld [vmem:[%s2470_s28 + $0x498] sm:$0xff]  ;;  %v438_v45 = vld [vmem:[%s3113_s1 + $0x108] sm:$0xff] }
  0x1c   : > { %654 = vmatpush1.msra.mxu0 %v414_v7  ;;  %2143 = vmatpush1.msra.mxu1 %v414_v7  ;;  %v361_v39 = vld [vmem:[%s2470_s28 + $0x4a0] sm:$0xff]  ;;  %v220_v43 = vld [vmem:[%s2470_s28 + $0x38] sm:$0xff]  ;;  %v219_v46 = vld [vmem:[%s2470_s28 + $0x30] sm:$0xff] }
  0x1d   : > { %655 = vmatprep.subr.mxu0 %v2253_v1  ;;  %2112 = vmatprep.subr.mxu1 %v2253_v1  ;;  %v364_v44 = vld [vmem:[%s2470_s28 + $0x4b8] sm:$0xff]  ;;  %v363_v47 = vld [vmem:[%s2470_s28 + $0x4b0] sm:$0xff]  ;;  %v437_v50 = vld [vmem:[%s3113_s1 + $0x100] sm:$0xff] }
  0x1e   : > { %656 = vmatpush1.msra.mxu0 %v413_v8  ;;  %2144 = vmatpush1.msra.mxu1 %v413_v8  ;;  %v223_v48 = vld [vmem:[%s2470_s28 + $0x50] sm:$0xff]  ;;  %v222_v51 = vld [vmem:[%s2470_s28 + $0x48] sm:$0xff]  ;;  %v225_v55 = vld [vmem:[%s2470_s28 + $0x60] sm:$0xff] }
  0x1f   : > { %657 = vmatprep.subr.mxu0 %v2253_v1  ;;  %2113 = vmatprep.subr.mxu1 %v2253_v1  ;;  %v367_v49 = vld [vmem:[%s2470_s28 + $0x4d0] sm:$0xff]  ;;  %v366_v52 = vld [vmem:[%s2470_s28 + $0x4c8] sm:$0xff]  ;;  %v369_v56 = vld [vmem:[%s2470_s28 + $0x4e0] sm:$0xff] }
  0x20   : > { %658 = vmatpush1.msra.mxu0 %v412_v9  ;;  %2145 = vmatpush1.msra.mxu1 %v412_v9  ;;  %v226_v53 = vld [vmem:[%s2470_s28 + $0x68] sm:$0xff]  ;;  %v229_v57 = vld [vmem:[%s2470_s28 + $0x80] sm:$0xff]  ;;  %v228_v59 = vld [vmem:[%s2470_s28 + $0x78] sm:$0xff] }
  0x21   : > { %659 = vmatprep.subr.mxu0 %v2253_v1  ;;  %2114 = vmatprep.subr.mxu1 %v2253_v1  ;;  %v370_v54 = vld [vmem:[%s2470_s28 + $0x4e8] sm:$0xff]  ;;  %v373_v58 = vld [vmem:[%s2470_s28 + $0x500] sm:$0xff]  ;;  %v372_v60 = vld [vmem:[%s2470_s28 + $0x4f8] sm:$0xff] }
  0x22   : > { %660 = vmatpush1.msra.mxu0 %v411_v10  ;;  %2146 = vmatpush1.msra.mxu1 %v411_v10  ;;  %v232_v61 = vld [vmem:[%s2470_s28 + $0x98] sm:$0xff]  ;;  %v231_v63 = vld [vmem:[%s2470_s28 + $0x90] sm:$0xff]  ;;  %v234_v3 = vld [vmem:[%s2470_s28 + $0xa8] sm:$0xff] }
  0x23   : > { %661 = vmatprep.subr.mxu0 %v2253_v1  ;;  %2115 = vmatprep.subr.mxu1 %v2253_v1  ;;  %v376_v62 = vld [vmem:[%s2470_s28 + $0x518] sm:$0xff]  ;;  %v375_v0 = vld [vmem:[%s2470_s28 + $0x510] sm:$0xff]  ;;  %v378_v4 = vld [vmem:[%s2470_s28 + $0x528] sm:$0xff] }
  0x24   : > { %662 = vmatpush1.msra.mxu0 %v410_v11  ;;  %2147 = vmatpush1.msra.mxu1 %v410_v11  ;;  %v379_v2 = vld [vmem:[%s2470_s28 + $0x530] sm:$0xff]  ;;  %v238_v5 = vld [vmem:[%s2470_s28 + $0xc8] sm:$0xff]  ;;  %v237_v7 = vld [vmem:[%s2470_s28 + $0xc0] sm:$0xff] }
  0x25   : > { %663 = vmatprep.subr.mxu0 %v2253_v1  ;;  %2116 = vmatprep.subr.mxu1 %v2253_v1  ;;  %v382_v6 = vld [vmem:[%s2470_s28 + $0x548] sm:$0xff]  ;;  %v381_v8 = vld [vmem:[%s2470_s28 + $0x540] sm:$0xff]  ;;  %v240_v11 = vld [vmem:[%s2470_s28 + $0xd8] sm:$0xff] }
  0x26   : > { %664 = vmatpush1.msra.mxu0 %v409_v12  ;;  %2148 = vmatpush1.msra.mxu1 %v409_v12  ;;  %v241_v9 = vld [vmem:[%s2470_s28 + $0xe0] sm:$0xff]  ;;  %v384_v12 = vld [vmem:[%s2470_s28 + $0x558] sm:$0xff] }
  0x27   : > { %665 = vmatprep.subr.mxu0 %v2253_v1  ;;  %2117 = vmatprep.subr.mxu1 %v2253_v1  ;;  %v385_v10 = vld [vmem:[%s2470_s28 + $0x560] sm:$0xff] }
  0x28   : > { %666 = vmatpush1.msra.mxu0 %v408_v13  ;;  %2149 = vmatpush1.msra.mxu1 %v408_v13  ;;  %v244_v13 = vld [vmem:[%s2470_s28 + $0xf8] sm:$0xff] }
  0x29   : > { %667 = vmatprep.subr.mxu0 %v2253_v1  ;;  %2118 = vmatprep.subr.mxu1 %v2253_v1 }
  0x2a   : > { %668 = vmatpush1.msra.mxu0 %v407_v14  ;;  %2150 = vmatpush1.msra.mxu1 %v407_v14  ;;  %v388_v14 = vld [vmem:[%s2470_s28 + $0x578] sm:$0xff] }
  0x2b   : > { %669 = vmatprep.subr.mxu0 %v2253_v1  ;;  %2119 = vmatprep.subr.mxu1 %v2253_v1 }
  0x2c   : > { %670 = vmatpush1.msra.mxu0 %v406_v15  ;;  %2151 = vmatpush1.msra.mxu1 %v406_v15  ;;  %v243_v15 = vld [vmem:[%s2470_s28 + $0xf0] sm:$0xff] }
  0x2d   : > { %671 = vmatprep.subr.mxu0 %v2253_v1  ;;  %2120 = vmatprep.subr.mxu1 %v2253_v1 }
  0x2e   : > { %672 = vmatpush1.msra.mxu0 %v405_v16  ;;  %2152 = vmatpush1.msra.mxu1 %v405_v16  ;;  %v387_v16 = vld [vmem:[%s2470_s28 + $0x570] sm:$0xff] }
  0x2f   : > { %673 = vmatprep.subr.mxu0 %v2253_v1  ;;  %2121 = vmatprep.subr.mxu1 %v2253_v1 }
  0x30   : > { %674 = vmatpush2.msra.mxu0 %v436_v17  ;;  %2153 = vmatpush2.msra.mxu1 %v436_v17  ;;  %v247_v17 = vld [vmem:[%s2470_s28 + $0x110] sm:$0xff] }
  0x31   : > { %675 = vmatprep.subr.mxu0 %v2253_v1  ;;  %2122 = vmatprep.subr.mxu1 %v2253_v1 }
  0x32   : > { %676 = vmatpush2.msra.mxu0 %v435_v18  ;;  %2154 = vmatpush2.msra.mxu1 %v435_v18  ;;  %v391_v18 = vld [vmem:[%s2470_s28 + $0x590] sm:$0xff] }
  0x33   : > { %677 = vmatprep.subr.mxu0 %v2253_v1  ;;  %2123 = vmatprep.subr.mxu1 %v2253_v1 }
  0x34   : > { %678 = vmatpush2.msra.mxu0 %v434_v19  ;;  %2155 = vmatpush2.msra.mxu1 %v434_v19  ;;  %v246_v19 = vld [vmem:[%s2470_s28 + $0x108] sm:$0xff] }
  0x35   : > { %679 = vmatprep.subr.mxu0 %v2253_v1  ;;  %2124 = vmatprep.subr.mxu1 %v2253_v1 }
  0x36   : > { %680 = vmatpush2.msra.mxu0 %v433_v20  ;;  %2156 = vmatpush2.msra.mxu1 %v433_v20  ;;  %v390_v20 = vld [vmem:[%s2470_s28 + $0x588] sm:$0xff] }
  0x37   : > { %681 = vmatprep.subr.mxu0 %v2253_v1  ;;  %2125 = vmatprep.subr.mxu1 %v2253_v1 }
  0x38   : > { %682 = vmatpush2.msra.mxu0 %v432_v21  ;;  %2157 = vmatpush2.msra.mxu1 %v432_v21  ;;  %v250_v21 = vld [vmem:[%s2470_s28 + $0x128] sm:$0xff] }
  0x39   : > { %683 = vmatprep.subr.mxu0 %v2253_v1  ;;  %2126 = vmatprep.subr.mxu1 %v2253_v1 }
  0x3a   : > { %684 = vmatpush2.msra.mxu0 %v431_v22  ;;  %2158 = vmatpush2.msra.mxu1 %v431_v22  ;;  %v394_v22 = vld [vmem:[%s2470_s28 + $0x5a8] sm:$0xff] }
  0x3b   : > { %685 = vmatprep.subr.mxu0 %v2253_v1  ;;  %2127 = vmatprep.subr.mxu1 %v2253_v1 }
  0x3c   : > { %686 = vmatpush2.msra.mxu0 %v430_v23  ;;  %2159 = vmatpush2.msra.mxu1 %v430_v23  ;;  %v249_v23 = vld [vmem:[%s2470_s28 + $0x120] sm:$0xff] }
  0x3d   : > { %687 = vmatprep.subr.mxu0 %v2253_v1  ;;  %2128 = vmatprep.subr.mxu1 %v2253_v1 }
  0x3e   : > { %688 = vmatpush2.msra.mxu0 %v429_v24  ;;  %2160 = vmatpush2.msra.mxu1 %v429_v24  ;;  %v393_v24 = vld [vmem:[%s2470_s28 + $0x5a0] sm:$0xff] }
  0x3f   : > { %689 = vmatprep.subr.mxu0 %v2253_v1  ;;  %2129 = vmatprep.subr.mxu1 %v2253_v1 }
  0x40   : > { %690 = vmatpush2.msra.mxu0 %v428_v25  ;;  %2161 = vmatpush2.msra.mxu1 %v428_v25  ;;  %v253_v25 = vld [vmem:[%s2470_s28 + $0x140] sm:$0xff] }
  0x41   : > { %691 = vmatprep.subr.mxu0 %v2253_v1  ;;  %2130 = vmatprep.subr.mxu1 %v2253_v1 }
  0x42   : > { %692 = vmatpush2.msra.mxu0 %v427_v26  ;;  %2162 = vmatpush2.msra.mxu1 %v427_v26  ;;  %v397_v26 = vld [vmem:[%s2470_s28 + $0x5c0] sm:$0xff] }
  0x43   : > { %693 = vmatprep.subr.mxu0 %v2253_v1  ;;  %2131 = vmatprep.subr.mxu1 %v2253_v1 }
  0x44   : > { %694 = vmatpush2.msra.mxu0 %v426_v27  ;;  %2163 = vmatpush2.msra.mxu1 %v426_v27  ;;  %v252_v27 = vld [vmem:[%s2470_s28 + $0x138] sm:$0xff] }
  0x45   : > { %695 = vmatprep.subr.mxu0 %v2253_v1  ;;  %2132 = vmatprep.subr.mxu1 %v2253_v1 }
  0x46   : > { %696 = vmatpush2.msra.mxu0 %v425_v28  ;;  %2164 = vmatpush2.msra.mxu1 %v425_v28  ;;  %v396_v28 = vld [vmem:[%s2470_s28 + $0x5b8] sm:$0xff] }
  0x47   : > { %697 = vmatprep.subr.mxu0 %v2253_v1  ;;  %2133 = vmatprep.subr.mxu1 %v2253_v1 }
  0x48   : > { %698 = vmatpush2.msra.mxu0 %v424_v29  ;;  %2165 = vmatpush2.msra.mxu1 %v424_v29  ;;  %v256_v29 = vld [vmem:[%s2470_s28 + $0x158] sm:$0xff] }
  0x49   : > { %699 = vmatprep.subr.mxu0 %v2253_v1  ;;  %2134 = vmatprep.subr.mxu1 %v2253_v1 }
  0x4a   : > { %700 = vmatpush2.msra.mxu0 %v423_v30  ;;  %2166 = vmatpush2.msra.mxu1 %v423_v30  ;;  %v400_v30 = vld [vmem:[%s2470_s28 + $0x5d8] sm:$0xff] }
  0x4b   : > { %701 = vmatprep.subr.mxu0 %v2253_v1  ;;  %2135 = vmatprep.subr.mxu1 %v2253_v1 }
  0x4c   : > { %702 = vmatpush2.msra.mxu0 %v422_v31  ;;  %2167 = vmatpush2.msra.mxu1 %v422_v31  ;;  %v255_v31 = vld [vmem:[%s2470_s28 + $0x150] sm:$0xff] }
  0x4d   : > { %703 = vmatprep.subr.mxu0 %v2253_v1  ;;  %2136 = vmatprep.subr.mxu1 %v2253_v1  ;;  %v235_v1 = vld [vmem:[%s2470_s28 + $0xb0] sm:$0xff] }
  0x4e   : > { %704 = vmatpush2.msra.mxu0 %v421_v32  ;;  %2168 = vmatpush2.msra.mxu1 %v421_v32  ;;  %v399_v32 = vld [vmem:[%s2470_s28 + $0x5d0] sm:$0xff] }
  0x4f   : > { %705 = vmatprep.mubr.f32.mxu0 %v214_v33  ;;  %945 = vmatprep.mubr.f32.mxu1 %v358_v34  ;;  %v259_v33 = vld [vmem:[%s2470_s28 + $0x170] sm:$0xff] }
  0x50   : > { %706 = vmatmul.mubr.f32.vlgmr.msra.gmra.mxu0 %v213_v35  ;;  %946 = vmatmul.mubr.f32.vlgmr.msra.gmra.mxu1 %v357_v36  ;;  %v403_v34 = vld [vmem:[%s2470_s28 + $0x5f0] sm:$0xff]  ;;  %v258_v35 = vld [vmem:[%s2470_s28 + $0x168] sm:$0xff] }
  0x51   : > { %2001 = vmatprep.subr.mxu1 %v440_v37  ;;  %710 = vmatprep.mubr.f32.mxu0 %v217_v38  ;;  %v402_v36 = vld [vmem:[%s2470_s28 + $0x5e8] sm:$0xff]  ;;  %v215_v38 = vld [vmem:[%s2470_s28 + $0x10] sm:$0xff] }
  0x52   : > { %2002 = vmatpush3.msra.mxu1 %v440_v37  ;;  %950 = vmatprep.mubr.f32.mxu1 %v361_v39  ;;  %v262_v37 = vld [vmem:[%s2470_s28 + $0x188] sm:$0xff]  ;;  %v261_v39 = vld [vmem:[%s2470_s28 + $0x180] sm:$0xff] }
  0x53   : > { %2003 = vmatprep.subr.mxu1 %v439_v40 }
  0x54   : > { %711 = vmatmul.mubr.f32.gmra.mxu0 %v216_v41  ;;  %951 = vmatmul.mubr.f32.gmra.mxu1 %v360_v42  ;;  %v265_v41 = vld [vmem:[%s2470_s28 + $0x1a0] sm:$0xff] }
  0x55   : > { %715 = vmatprep.mubr.f32.mxu0 %v220_v43  ;;  %955 = vmatprep.mubr.f32.mxu1 %v364_v44  ;;  %v221_v42 = vld [vmem:[%s2470_s28 + $0x40] sm:$0xff]  ;;  %v264_v43 = vld [vmem:[%s2470_s28 + $0x198] sm:$0xff] }
  0x56   : > { %2004 = vmatpush3.msra.mxu1 %v439_v40  ;;  %v218_v40 = vld [vmem:[%s2470_s28 + $0x28] sm:$0xff]  ;;  %v224_v44 = vld [vmem:[%s2470_s28 + $0x58] sm:$0xff] }
  0x57   : > { %2005 = vmatprep.subr.mxu1 %v438_v45 }
  0x58   : > { %716 = vmatmul.mubr.f32.gmra.mxu0 %v219_v46  ;;  %956 = vmatmul.mubr.f32.gmra.mxu1 %v363_v47  ;;  %v227_v46 = vld [vmem:[%s2470_s28 + $0x70] sm:$0xff] }
  0x59   : > { %720 = vmatprep.mubr.f32.mxu0 %v223_v48  ;;  %960 = vmatprep.mubr.f32.mxu1 %v367_v49  ;;  %v267_v47 = vld [vmem:[%s2470_s28 + $0x1b0] sm:$0xff]  ;;  %v230_v48 = vld [vmem:[%s2470_s28 + $0x88] sm:$0xff] }
  0x5a   : > { %2006 = vmatpush3.msra.mxu1 %v438_v45  ;;  %v268_v45 = vld [vmem:[%s2470_s28 + $0x1b8] sm:$0xff]  ;;  %v271_v49 = vld [vmem:[%s2470_s28 + $0x1d0] sm:$0xff] }
  0x5b   : > { %2007 = vmatprep.subr.mxu1 %v437_v50 }
  0x5c   : > { %721 = vmatmul.mubr.f32.gmra.mxu0 %v222_v51  ;;  %961 = vmatmul.mubr.f32.gmra.mxu1 %v366_v52  ;;  %v270_v51 = vld [vmem:[%s2470_s28 + $0x1c8] sm:$0xff]  ;;  %v236_v52 = vld [vmem:[%s2470_s28 + $0xb8] sm:$0xff] }
  0x5d   : > { %725 = vmatprep.mubr.f32.mxu0 %v226_v53  ;;  %965 = vmatprep.mubr.f32.mxu1 %v370_v54  ;;  %v274_v53 = vld [vmem:[%s2470_s28 + $0x1e8] sm:$0xff]  ;;  %v239_v54 = vld [vmem:[%s2470_s28 + $0xd0] sm:$0xff] }
  0x5e   : > { %2008 = vmatpush3.msra.mxu1 %v437_v50  ;;  %v233_v50 = vld [vmem:[%s2470_s28 + $0xa0] sm:$0xff] }
  0x60   : > { %726 = vmatmul.mubr.f32.gmra.mxu0 %v225_v55  ;;  %966 = vmatmul.mubr.f32.gmra.mxu1 %v369_v56  ;;  %v273_v55 = vld [vmem:[%s2470_s28 + $0x1e0] sm:$0xff]  ;;  %v242_v56 = vld [vmem:[%s2470_s28 + $0xe8] sm:$0xff] }
  0x61   : > { %730 = vmatprep.mubr.f32.mxu0 %v229_v57  ;;  %970 = vmatprep.mubr.f32.mxu1 %v373_v58  ;;  %v277_v57 = vld [vmem:[%s2470_s28 + $0x200] sm:$0xff] }
  0x62   : > { %v245_v58 = vld [vmem:[%s2470_s28 + $0x100] sm:$0xff] }
  0x64   : > { %731 = vmatmul.mubr.f32.gmra.mxu0 %v228_v59  ;;  %971 = vmatmul.mubr.f32.gmra.mxu1 %v372_v60  ;;  %v276_v59 = vld [vmem:[%s2470_s28 + $0x1f8] sm:$0xff] }
  0x65   : > { %735 = vmatprep.mubr.f32.mxu0 %v232_v61  ;;  %975 = vmatprep.mubr.f32.mxu1 %v376_v62  ;;  %v248_v60 = vld [vmem:[%s2470_s28 + $0x118] sm:$0xff]  ;;  %v251_v62 = vld [vmem:[%s2470_s28 + $0x130] sm:$0xff] }
  0x66   : > { %v280_v61 = vld [vmem:[%s2470_s28 + $0x218] sm:$0xff] }
  0x68   : > { %736 = vmatmul.mubr.f32.gmra.mxu0 %v231_v63  ;;  %976 = vmatmul.mubr.f32.gmra.mxu1 %v375_v0  ;;  %v279_v63 = vld [vmem:[%s2470_s28 + $0x210] sm:$0xff]  ;;  %v254_v0 = vld [vmem:[%s2470_s28 + $0x148] sm:$0xff] }
  0x69   : > { %740 = vmatprep.mubr.f32.mxu0 %v235_v1  ;;  %980 = vmatprep.mubr.f32.mxu1 %v379_v2  ;;  %v283_v1 = vld [vmem:[%s2470_s28 + $0x230] sm:$0xff]  ;;  %v257_v2 = vld [vmem:[%s2470_s28 + $0x160] sm:$0xff] }
  0x6c   : > { %741 = vmatmul.mubr.f32.gmra.mxu0 %v234_v3  ;;  %981 = vmatmul.mubr.f32.gmra.mxu1 %v378_v4  ;;  %v282_v3 = vld [vmem:[%s2470_s28 + $0x228] sm:$0xff]  ;;  %v260_v4 = vld [vmem:[%s2470_s28 + $0x178] sm:$0xff] }
  0x6d   : > { %745 = vmatprep.mubr.f32.mxu0 %v238_v5  ;;  %985 = vmatprep.mubr.f32.mxu1 %v382_v6  ;;  %v286_v5 = vld [vmem:[%s2470_s28 + $0x248] sm:$0xff]  ;;  %v263_v6 = vld [vmem:[%s2470_s28 + $0x190] sm:$0xff] }
  0x70   : > { %746 = vmatmul.mubr.f32.gmra.mxu0 %v237_v7  ;;  %986 = vmatmul.mubr.f32.gmra.mxu1 %v381_v8  ;;  %v285_v7 = vld [vmem:[%s2470_s28 + $0x240] sm:$0xff]  ;;  %v266_v8 = vld [vmem:[%s2470_s28 + $0x1a8] sm:$0xff] }
  0x71   : > { %750 = vmatprep.mubr.f32.mxu0 %v241_v9  ;;  %990 = vmatprep.mubr.f32.mxu1 %v385_v10  ;;  %v289_v9 = vld [vmem:[%s2470_s28 + $0x260] sm:$0xff] }
  0x72   : > { %v269_v10 = vld [vmem:[%s2470_s28 + $0x1c0] sm:$0xff] }
  0x74   : > { %751 = vmatmul.mubr.f32.gmra.mxu0 %v240_v11  ;;  %991 = vmatmul.mubr.f32.gmra.mxu1 %v384_v12  ;;  %v288_v11 = vld [vmem:[%s2470_s28 + $0x258] sm:$0xff] }
  0x75   : > { %755 = vmatprep.mubr.f32.mxu0 %v244_v13  ;;  %995 = vmatprep.mubr.f32.mxu1 %v388_v14  ;;  %v272_v12 = vld [vmem:[%s2470_s28 + $0x1d8] sm:$0xff]  ;;  %v275_v14 = vld [vmem:[%s2470_s28 + $0x1f0] sm:$0xff] }
  0x76   : > { %v292_v13 = vld [vmem:[%s2470_s28 + $0x278] sm:$0xff] }
  0x78   : > { %756 = vmatmul.mubr.f32.gmra.mxu0 %v243_v15  ;;  %996 = vmatmul.mubr.f32.gmra.mxu1 %v387_v16  ;;  %v291_v15 = vld [vmem:[%s2470_s28 + $0x270] sm:$0xff]  ;;  %v278_v16 = vld [vmem:[%s2470_s28 + $0x208] sm:$0xff] }
  0x79   : > { %760 = vmatprep.mubr.f32.mxu0 %v247_v17  ;;  %1000 = vmatprep.mubr.f32.mxu1 %v391_v18  ;;  %v295_v17 = vld [vmem:[%s2470_s28 + $0x290] sm:$0xff]  ;;  %v281_v18 = vld [vmem:[%s2470_s28 + $0x220] sm:$0xff] }
  0x7c   : > { %761 = vmatmul.mubr.f32.gmra.mxu0 %v246_v19  ;;  %1001 = vmatmul.mubr.f32.gmra.mxu1 %v390_v20  ;;  %v294_v19 = vld [vmem:[%s2470_s28 + $0x288] sm:$0xff]  ;;  %v284_v20 = vld [vmem:[%s2470_s28 + $0x238] sm:$0xff] }
  0x7d   : > { %765 = vmatprep.mubr.f32.mxu0 %v250_v21  ;;  %1005 = vmatprep.mubr.f32.mxu1 %v394_v22  ;;  %v298_v21 = vld [vmem:[%s2470_s28 + $0x2a8] sm:$0xff]  ;;  %v287_v22 = vld [vmem:[%s2470_s28 + $0x250] sm:$0xff] }
  0x80   : > { %766 = vmatmul.mubr.f32.gmra.mxu0 %v249_v23  ;;  %1006 = vmatmul.mubr.f32.gmra.mxu1 %v393_v24  ;;  %v297_v23 = vld [vmem:[%s2470_s28 + $0x2a0] sm:$0xff]  ;;  %v290_v24 = vld [vmem:[%s2470_s28 + $0x268] sm:$0xff] }
  0x81   : > { %770 = vmatprep.mubr.f32.mxu0 %v253_v25  ;;  %1010 = vmatprep.mubr.f32.mxu1 %v397_v26  ;;  %v301_v25 = vld [vmem:[%s2470_s28 + $0x2c0] sm:$0xff] }
  0x82   : > { %v293_v26 = vld [vmem:[%s2470_s28 + $0x280] sm:$0xff] }
  0x84   : > { %771 = vmatmul.mubr.f32.gmra.mxu0 %v252_v27  ;;  %1011 = vmatmul.mubr.f32.gmra.mxu1 %v396_v28  ;;  %v300_v27 = vld [vmem:[%s2470_s28 + $0x2b8] sm:$0xff] }
  0x85   : > { %775 = vmatprep.mubr.f32.mxu0 %v256_v29  ;;  %1015 = vmatprep.mubr.f32.mxu1 %v400_v30  ;;  %v296_v28 = vld [vmem:[%s2470_s28 + $0x298] sm:$0xff]  ;;  %v299_v30 = vld [vmem:[%s2470_s28 + $0x2b0] sm:$0xff] }
  0x86   : > { %v304_v29 = vld [vmem:[%s2470_s28 + $0x2d8] sm:$0xff] }
  0x88   : > { %776 = vmatmul.mubr.f32.gmra.mxu0 %v255_v31  ;;  %1016 = vmatmul.mubr.f32.gmra.mxu1 %v399_v32  ;;  %v303_v31 = vld [vmem:[%s2470_s28 + $0x2d0] sm:$0xff]  ;;  %v302_v32 = vld [vmem:[%s2470_s28 + $0x2c8] sm:$0xff] }
  0x89   : > { %780 = vmatprep.mubr.f32.mxu0 %v259_v33  ;;  %1020 = vmatprep.mubr.f32.mxu1 %v403_v34  ;;  %v307_v33 = vld [vmem:[%s2470_s28 + $0x2f0] sm:$0xff]  ;;  %v305_v34 = vld [vmem:[%s2470_s28 + $0x2e0] sm:$0xff] }
  0x8c   : > { %781 = vmatmul.mubr.f32.gmra.mxu0 %v258_v35  ;;  %1021 = vmatmul.mubr.f32.gmra.mxu1 %v402_v36  ;;  %v306_v35 = vld [vmem:[%s2470_s28 + $0x2e8] sm:$0xff]  ;;  %v308_v36 = vld [vmem:[%s2470_s28 + $0x2f8] sm:$0xff] }
  0x8d   : > { %785 = vmatprep.mubr.f32.mxu0 %v262_v37  ;;  %2009 = vmatprep.mubr.msk.f32.mxu1 %vm448_vm0, %v215_v38  ;;  %v310_v37 = vld [vmem:[%s2470_s28 + $0x308] sm:$0xff]  ;;  %v311_v38 = vld [vmem:[%s2470_s28 + $0x310] sm:$0xff] }
  0x90   : > { %786 = vmatmul.mubr.f32.gmra.mxu0 %v261_v39  ;;  %2010 = vmatmul.mubr.msk.f32.vlgmr.msra.gmra.mxu1 %vm448_vm0, %v218_v40  ;;  %v309_v39 = vld [vmem:[%s2470_s28 + $0x300] sm:$0xff]  ;;  %v314_v40 = vld [vmem:[%s2470_s28 + $0x328] sm:$0xff] }
  0x91   : > { %790 = vmatprep.mubr.f32.mxu0 %v265_v41  ;;  %2012 = vmatprep.mubr.msk.f32.mxu1 %vm448_vm0, %v221_v42  ;;  %v313_v41 = vld [vmem:[%s2470_s28 + $0x320] sm:$0xff] }
  0x92   : > { %v317_v42 = vld [vmem:[%s2470_s28 + $0x340] sm:$0xff] }
  0x94   : > { %791 = vmatmul.mubr.f32.gmra.mxu0 %v264_v43  ;;  %2013 = vmatmul.mubr.msk.f32.gmra.mxu1 %vm448_vm0, %v224_v44  ;;  %v312_v43 = vld [vmem:[%s2470_s28 + $0x318] sm:$0xff] }
  0x95   : > { %795 = vmatprep.mubr.f32.mxu0 %v268_v45  ;;  %2015 = vmatprep.mubr.msk.f32.mxu1 %vm448_vm0, %v227_v46  ;;  %v320_v44 = vld [vmem:[%s2470_s28 + $0x358] sm:$0xff]  ;;  %v323_v46 = vld [vmem:[%s2470_s28 + $0x370] sm:$0xff] }
  0x96   : > { %v316_v45 = vld [vmem:[%s2470_s28 + $0x338] sm:$0xff] }
  0x98   : > { %796 = vmatmul.mubr.f32.gmra.mxu0 %v267_v47  ;;  %2016 = vmatmul.mubr.msk.f32.gmra.mxu1 %vm448_vm0, %v230_v48  ;;  %v315_v47 = vld [vmem:[%s2470_s28 + $0x330] sm:$0xff]  ;;  %v326_v48 = vld [vmem:[%s2470_s28 + $0x388] sm:$0xff] }
  0x99   : > { %800 = vmatprep.mubr.f32.mxu0 %v271_v49  ;;  %2018 = vmatprep.mubr.msk.f32.mxu1 %vm448_vm0, %v233_v50  ;;  %v319_v49 = vld [vmem:[%s2470_s28 + $0x350] sm:$0xff]  ;;  %v329_v50 = vld [vmem:[%s2470_s28 + $0x3a0] sm:$0xff] }
  0x9c   : > { %801 = vmatmul.mubr.f32.gmra.mxu0 %v270_v51  ;;  %2019 = vmatmul.mubr.msk.f32.gmra.mxu1 %vm448_vm0, %v236_v52  ;;  %v318_v51 = vld [vmem:[%s2470_s28 + $0x348] sm:$0xff]  ;;  %v332_v52 = vld [vmem:[%s2470_s28 + $0x3b8] sm:$0xff] }
  0x9d   : > { %805 = vmatprep.mubr.f32.mxu0 %v274_v53  ;;  %2021 = vmatprep.mubr.msk.f32.mxu1 %vm448_vm0, %v239_v54  ;;  %v322_v53 = vld [vmem:[%s2470_s28 + $0x368] sm:$0xff]  ;;  %v335_v54 = vld [vmem:[%s2470_s28 + $0x3d0] sm:$0xff] }
  0xa0   : > { %806 = vmatmul.mubr.f32.gmra.mxu0 %v273_v55  ;;  %2022 = vmatmul.mubr.msk.f32.gmra.mxu1 %vm448_vm0, %v242_v56  ;;  %v321_v55 = vld [vmem:[%s2470_s28 + $0x360] sm:$0xff]  ;;  %v338_v56 = vld [vmem:[%s2470_s28 + $0x3e8] sm:$0xff] }
  0xa1   : > { %810 = vmatprep.mubr.f32.mxu0 %v277_v57  ;;  %2024 = vmatprep.mubr.msk.f32.mxu1 %vm448_vm0, %v245_v58  ;;  %v325_v57 = vld [vmem:[%s2470_s28 + $0x380] sm:$0xff] }
  0xa2   : > { %v341_v58 = vld [vmem:[%s2470_s28 + $0x400] sm:$0xff] }
  0xa4   : > { %811 = vmatmul.mubr.f32.gmra.mxu0 %v276_v59  ;;  %2025 = vmatmul.mubr.msk.f32.gmra.mxu1 %vm448_vm0, %v248_v60  ;;  %v324_v59 = vld [vmem:[%s2470_s28 + $0x378] sm:$0xff] }
  0xa5   : > { %815 = vmatprep.mubr.f32.mxu0 %v280_v61  ;;  %2027 = vmatprep.mubr.msk.f32.mxu1 %vm448_vm0, %v251_v62  ;;  %v344_v60 = vld [vmem:[%s2470_s28 + $0x418] sm:$0xff]  ;;  %v347_v62 = vld [vmem:[%s2470_s28 + $0x430] sm:$0xff] }
  0xa6   : > { %v328_v61 = vld [vmem:[%s2470_s28 + $0x398] sm:$0xff] }
  0xa8   : > { %816 = vmatmul.mubr.f32.gmra.mxu0 %v279_v63  ;;  %2028 = vmatmul.mubr.msk.f32.gmra.mxu1 %vm448_vm0, %v254_v0  ;;  %v327_v63 = vld [vmem:[%s2470_s28 + $0x390] sm:$0xff]  ;;  %v350_v0 = vld [vmem:[%s2470_s28 + $0x448] sm:$0xff] }
  0xa9   : > { %820 = vmatprep.mubr.f32.mxu0 %v283_v1  ;;  %2030 = vmatprep.mubr.msk.f32.mxu1 %vm448_vm0, %v257_v2  ;;  %v331_v1 = vld [vmem:[%s2470_s28 + $0x3b0] sm:$0xff]  ;;  %v353_v2 = vld [vmem:[%s2470_s28 + $0x460] sm:$0xff] }
  0xac   : > { %821 = vmatmul.mubr.f32.gmra.mxu0 %v282_v3  ;;  %2031 = vmatmul.mubr.msk.f32.gmra.mxu1 %vm448_vm0, %v260_v4  ;;  %v330_v3 = vld [vmem:[%s2470_s28 + $0x3a8] sm:$0xff]  ;;  %v356_v4 = vld [vmem:[%s2470_s28 + $0x478] sm:$0xff] }
  0xad   : > { %825 = vmatprep.mubr.f32.mxu0 %v286_v5  ;;  %2033 = vmatprep.mubr.msk.f32.mxu1 %vm448_vm0, %v263_v6  ;;  %v334_v5 = vld [vmem:[%s2470_s28 + $0x3c8] sm:$0xff]  ;;  %v359_v6 = vld [vmem:[%s2470_s28 + $0x490] sm:$0xff] }
  0xb0   : > { %826 = vmatmul.mubr.f32.gmra.mxu0 %v285_v7  ;;  %2034 = vmatmul.mubr.msk.f32.gmra.mxu1 %vm448_vm0, %v266_v8  ;;  %v333_v7 = vld [vmem:[%s2470_s28 + $0x3c0] sm:$0xff]  ;;  %v362_v8 = vld [vmem:[%s2470_s28 + $0x4a8] sm:$0xff] }
  0xb1   : > { %830 = vmatprep.mubr.f32.mxu0 %v289_v9  ;;  %2036 = vmatprep.mubr.msk.f32.mxu1 %vm448_vm0, %v269_v10  ;;  %v337_v9 = vld [vmem:[%s2470_s28 + $0x3e0] sm:$0xff] }
  0xb2   : > { %v365_v10 = vld [vmem:[%s2470_s28 + $0x4c0] sm:$0xff] }
  0xb4   : > { %831 = vmatmul.mubr.f32.gmra.mxu0 %v288_v11  ;;  %2037 = vmatmul.mubr.msk.f32.gmra.mxu1 %vm448_vm0, %v272_v12  ;;  %v336_v11 = vld [vmem:[%s2470_s28 + $0x3d8] sm:$0xff] }
  0xb5   : > { %835 = vmatprep.mubr.f32.mxu0 %v292_v13  ;;  %2039 = vmatprep.mubr.msk.f32.mxu1 %vm448_vm0, %v275_v14  ;;  %v368_v12 = vld [vmem:[%s2470_s28 + $0x4d8] sm:$0xff]  ;;  %v371_v14 = vld [vmem:[%s2470_s28 + $0x4f0] sm:$0xff] }
  0xb6   : > { %v340_v13 = vld [vmem:[%s2470_s28 + $0x3f8] sm:$0xff] }
  0xb8   : > { %836 = vmatmul.mubr.f32.gmra.mxu0 %v291_v15  ;;  %2040 = vmatmul.mubr.msk.f32.gmra.mxu1 %vm448_vm0, %v278_v16  ;;  %v339_v15 = vld [vmem:[%s2470_s28 + $0x3f0] sm:$0xff]  ;;  %v374_v16 = vld [vmem:[%s2470_s28 + $0x508] sm:$0xff] }
  0xb9   : > { %840 = vmatprep.mubr.f32.mxu0 %v295_v17  ;;  %2042 = vmatprep.mubr.msk.f32.mxu1 %vm448_vm0, %v281_v18  ;;  %v343_v17 = vld [vmem:[%s2470_s28 + $0x410] sm:$0xff]  ;;  %v377_v18 = vld [vmem:[%s2470_s28 + $0x520] sm:$0xff] }
  0xbc   : > { %841 = vmatmul.mubr.f32.gmra.mxu0 %v294_v19  ;;  %2043 = vmatmul.mubr.msk.f32.gmra.mxu1 %vm448_vm0, %v284_v20  ;;  %v342_v19 = vld [vmem:[%s2470_s28 + $0x408] sm:$0xff]  ;;  %v380_v20 = vld [vmem:[%s2470_s28 + $0x538] sm:$0xff] }
  0xbd   : > { %845 = vmatprep.mubr.f32.mxu0 %v298_v21  ;;  %2045 = vmatprep.mubr.msk.f32.mxu1 %vm448_vm0, %v287_v22  ;;  %v346_v21 = vld [vmem:[%s2470_s28 + $0x428] sm:$0xff]  ;;  %v383_v22 = vld [vmem:[%s2470_s28 + $0x550] sm:$0xff] }
  0xc0   : > { %846 = vmatmul.mubr.f32.gmra.mxu0 %v297_v23  ;;  %2046 = vmatmul.mubr.msk.f32.gmra.mxu1 %vm448_vm0, %v290_v24  ;;  %v345_v23 = vld [vmem:[%s2470_s28 + $0x420] sm:$0xff]  ;;  %v386_v24 = vld [vmem:[%s2470_s28 + $0x568] sm:$0xff] }
  0xc1   : > { %850 = vmatprep.mubr.f32.mxu0 %v301_v25  ;;  %2048 = vmatprep.mubr.msk.f32.mxu1 %vm448_vm0, %v293_v26  ;;  %v349_v25 = vld [vmem:[%s2470_s28 + $0x440] sm:$0xff] }
  0xc2   : > { %v389_v26 = vld [vmem:[%s2470_s28 + $0x580] sm:$0xff] }
  0xc4   : > { %851 = vmatmul.mubr.f32.gmra.mxu0 %v300_v27  ;;  %2049 = vmatmul.mubr.msk.f32.gmra.mxu1 %vm448_vm0, %v296_v28  ;;  %v348_v27 = vld [vmem:[%s2470_s28 + $0x438] sm:$0xff] }
  0xc5   : > { %855 = vmatprep.mubr.f32.mxu0 %v304_v29  ;;  %2051 = vmatprep.mubr.msk.f32.mxu1 %vm448_vm0, %v299_v30  ;;  %v392_v28 = vld [vmem:[%s2470_s28 + $0x598] sm:$0xff]  ;;  %v395_v30 = vld [vmem:[%s2470_s28 + $0x5b0] sm:$0xff] }
  0xc6   : > { %v352_v29 = vld [vmem:[%s2470_s28 + $0x458] sm:$0xff] }
  0xc8   : > { %856 = vmatmul.mubr.f32.gmra.mxu0 %v303_v31  ;;  %2052 = vmatmul.mubr.msk.f32.gmra.mxu1 %vm448_vm0, %v302_v32  ;;  %v351_v31 = vld [vmem:[%s2470_s28 + $0x450] sm:$0xff]  ;;  %v398_v32 = vld [vmem:[%s2470_s28 + $0x5c8] sm:$0xff] }
  0xc9   : > { %860 = vmatprep.mubr.f32.mxu0 %v307_v33  ;;  %2054 = vmatprep.mubr.msk.f32.mxu1 %vm448_vm0, %v305_v34  ;;  %v355_v33 = vld [vmem:[%s2470_s28 + $0x470] sm:$0xff]  ;;  %v401_v34 = vld [vmem:[%s2470_s28 + $0x5e0] sm:$0xff] }
  0xcc   : > { %861 = vmatmul.mubr.f32.gmra.mxu0 %v306_v35  ;;  %2055 = vmatmul.mubr.msk.f32.gmra.mxu1 %vm448_vm0, %v308_v36  ;;  %v354_v35 = vld [vmem:[%s2470_s28 + $0x468] sm:$0xff]  ;;  %v404_v36 = vld [vmem:[%s2470_s28 + $0x5f8] sm:$0xff] }
  0xcd   : > { %865 = vmatprep.mubr.f32.mxu0 %v310_v37  ;;  %2057 = vmatprep.mubr.msk.f32.mxu1 %vm448_vm0, %v311_v38 }
  0xd0   : > { %866 = vmatmul.mubr.f32.gmra.mxu0 %v309_v39  ;;  %2058 = vmatmul.mubr.msk.f32.gmra.mxu1 %vm448_vm0, %v314_v40 }
  0xd1   : > { %870 = vmatprep.mubr.f32.mxu0 %v313_v41  ;;  %2060 = vmatprep.mubr.msk.f32.mxu1 %vm448_vm0, %v317_v42 }
  0xd4   : > { %871 = vmatmul.mubr.f32.gmra.mxu0 %v312_v43  ;;  %2061 = vmatmul.mubr.msk.f32.gmra.mxu1 %vm448_vm0, %v320_v44 }
  0xd5   : > { %875 = vmatprep.mubr.f32.mxu0 %v316_v45  ;;  %2063 = vmatprep.mubr.msk.f32.mxu1 %vm448_vm0, %v323_v46 }
  0xd8   : > { %876 = vmatmul.mubr.f32.gmra.mxu0 %v315_v47  ;;  %2064 = vmatmul.mubr.msk.f32.gmra.mxu1 %vm448_vm0, %v326_v48 }
  0xd9   : > { %880 = vmatprep.mubr.f32.mxu0 %v319_v49  ;;  %2066 = vmatprep.mubr.msk.f32.mxu1 %vm448_vm0, %v329_v50 }
  0xdc   : > { %881 = vmatmul.mubr.f32.gmra.mxu0 %v318_v51  ;;  %2067 = vmatmul.mubr.msk.f32.gmra.mxu1 %vm448_vm0, %v332_v52 }
  0xdd   : > { %885 = vmatprep.mubr.f32.mxu0 %v322_v53  ;;  %2069 = vmatprep.mubr.msk.f32.mxu1 %vm448_vm0, %v335_v54 }
  0xe0   : > { %886 = vmatmul.mubr.f32.gmra.mxu0 %v321_v55  ;;  %2070 = vmatmul.mubr.msk.f32.gmra.mxu1 %vm448_vm0, %v338_v56 }
  0xe1   : > { %890 = vmatprep.mubr.f32.mxu0 %v325_v57  ;;  %2072 = vmatprep.mubr.msk.f32.mxu1 %vm448_vm0, %v341_v58 }
  0xe4   : > { %891 = vmatmul.mubr.f32.gmra.mxu0 %v324_v59  ;;  %2073 = vmatmul.mubr.msk.f32.gmra.mxu1 %vm448_vm0, %v344_v60 }
  0xe5   : > { %895 = vmatprep.mubr.f32.mxu0 %v328_v61  ;;  %2075 = vmatprep.mubr.msk.f32.mxu1 %vm448_vm0, %v347_v62 }
  0xe8   : > { %896 = vmatmul.mubr.f32.gmra.mxu0 %v327_v63  ;;  %2076 = vmatmul.mubr.msk.f32.gmra.mxu1 %vm448_vm0, %v350_v0 }
  0xe9   : > { %900 = vmatprep.mubr.f32.mxu0 %v331_v1  ;;  %2078 = vmatprep.mubr.msk.f32.mxu1 %vm448_vm0, %v353_v2 }
  0xec   : > { %901 = vmatmul.mubr.f32.gmra.mxu0 %v330_v3  ;;  %2079 = vmatmul.mubr.msk.f32.gmra.mxu1 %vm448_vm0, %v356_v4 }
  0xed   : > { %905 = vmatprep.mubr.f32.mxu0 %v334_v5  ;;  %2081 = vmatprep.mubr.msk.f32.mxu1 %vm448_vm0, %v359_v6 }
  0xf0   : > { %906 = vmatmul.mubr.f32.gmra.mxu0 %v333_v7  ;;  %2082 = vmatmul.mubr.msk.f32.gmra.mxu1 %vm448_vm0, %v362_v8 }
  0xf1   : > { %910 = vmatprep.mubr.f32.mxu0 %v337_v9  ;;  %2084 = vmatprep.mubr.msk.f32.mxu1 %vm448_vm0, %v365_v10 }
  0xf4   : > { %911 = vmatmul.mubr.f32.gmra.mxu0 %v336_v11  ;;  %2085 = vmatmul.mubr.msk.f32.gmra.mxu1 %vm448_vm0, %v368_v12 }
  0xf5   : > { %915 = vmatprep.mubr.f32.mxu0 %v340_v13  ;;  %2087 = vmatprep.mubr.msk.f32.mxu1 %vm448_vm0, %v371_v14 }
  0xf8   : > { %916 = vmatmul.mubr.f32.gmra.mxu0 %v339_v15  ;;  %2088 = vmatmul.mubr.msk.f32.gmra.mxu1 %vm448_vm0, %v374_v16 }
  0xf9   : > { %920 = vmatprep.mubr.f32.mxu0 %v343_v17  ;;  %2090 = vmatprep.mubr.msk.f32.mxu1 %vm448_vm0, %v377_v18 }
  0xfc   : > { %921 = vmatmul.mubr.f32.gmra.mxu0 %v342_v19  ;;  %2091 = vmatmul.mubr.msk.f32.gmra.mxu1 %vm448_vm0, %v380_v20 }
  0xfd   : > { %925 = vmatprep.mubr.f32.mxu0 %v346_v21  ;;  %2093 = vmatprep.mubr.msk.f32.mxu1 %vm448_vm0, %v383_v22 }
 0x100   : > { %926 = vmatmul.mubr.f32.gmra.mxu0 %v345_v23  ;;  %2094 = vmatmul.mubr.msk.f32.gmra.mxu1 %vm448_vm0, %v386_v24 }
 0x101   : > { %930 = vmatprep.mubr.f32.mxu0 %v349_v25  ;;  %2096 = vmatprep.mubr.msk.f32.mxu1 %vm448_vm0, %v389_v26 }
 0x104   : > { %931 = vmatmul.mubr.f32.gmra.mxu0 %v348_v27  ;;  %2097 = vmatmul.mubr.msk.f32.gmra.mxu1 %vm448_vm0, %v392_v28 }
 0x105   : > { %935 = vmatprep.mubr.f32.mxu0 %v352_v29  ;;  %2099 = vmatprep.mubr.msk.f32.mxu1 %vm448_vm0, %v395_v30 }
 0x108   : > { %936 = vmatmul.mubr.f32.gmra.mxu0 %v351_v31  ;;  %2100 = vmatmul.mubr.msk.f32.gmra.mxu1 %vm448_vm0, %v398_v32 }
 0x109   : > { %940 = vmatprep.mubr.f32.mxu0 %v355_v33  ;;  %2102 = vmatprep.mubr.msk.f32.mxu1 %vm448_vm0, %v401_v34 }
 0x10c   : > { %941 = vmatmul.mubr.f32.gmra.mxu0 %v354_v35  ;;  %2103 = vmatmul.mubr.msk.f32.gmra.mxu1 %vm448_vm0, %v404_v36  ;;  %v2810_v35 = vld [vmem:[%s3114_s2] ss:$0 sm:$0xff] }
 0x110   : > { %v2747_v37 = vpop.f32.mrf.mxu0  ;;  %v2749_v38 = vpop.f32.mrf.mxu1 }
 0x112   : > { %v709_v39 = vpop.f32.mrf.mxu0  ;;  %v949_v40 = vpop.f32.mrf.mxu1 }
 0x114   : > { %v712_v41 = vpop.f32.mrf.mxu0  ;;  %v2751_v42 = vpop.f32.mrf.mxu1 }
 0x115   : > { %v713_v40 = vadd.f32 %v2810_v35, %v712_v41 }
 0x116   : > { %v714_v43 = vpop.f32.mrf.mxu0  ;;  %v954_v44 = vpop.f32.mrf.mxu1 }
 0x118   : > { %v2753_v45 = vpop.f32.mrf.mxu0  ;;  %v2755_v46 = vpop.f32.mrf.mxu1 }
 0x119   : > { %v718_v41 = vadd.f32 %v2810_v35, %v2753_v45 }
 0x11a   : > { %v719_v47 = vpop.f32.mrf.mxu0  ;;  %v959_v48 = vpop.f32.mrf.mxu1 }
 0x11b   : > { %v708_v47 = vadd.f32 %v2810_v35, %v2747_v37 }
 0x11c   : > { %v722_v49 = vpop.f32.mrf.mxu0  ;;  %v2757_v50 = vpop.f32.mrf.mxu1 }
 0x11e   : > { %v724_v51 = vpop.f32.mrf.mxu0  ;;  %v964_v52 = vpop.f32.mrf.mxu1 }
 0x120   : > { %v2759_v53 = vpop.f32.mrf.mxu0  ;;  %v2761_v54 = vpop.f32.mrf.mxu1 }
 0x122   : > { %v729_v55 = vpop.f32.mrf.mxu0  ;;  %v969_v56 = vpop.f32.mrf.mxu1 }
 0x123   : > { %v723_v55 = vadd.f32 %v2810_v35, %v722_v49 }
 0x124   : > { %v2763_v57 = vpop.f32.mrf.mxu0  ;;  %v2765_v58 = vpop.f32.mrf.mxu1 }
 0x126   : > { %v734_v59 = vpop.f32.mrf.mxu0  ;;  %v974_v60 = vpop.f32.mrf.mxu1 }
 0x128   : > { %v2767_v61 = vpop.f32.mrf.mxu0  ;;  %v2769_v62 = vpop.f32.mrf.mxu1 }
 0x12a   : > { %v739_v63 = vpop.f32.mrf.mxu0  ;;  %v979_v0 = vpop.f32.mrf.mxu1 }
 0x12c   : > { %v2771_v1 = vpop.f32.mrf.mxu0  ;;  %v2773_v2 = vpop.f32.mrf.mxu1 }
 0x12e   : > { %v744_v3 = vpop.f32.mrf.mxu0  ;;  %v984_v4 = vpop.f32.mrf.mxu1 }
 0x130   : > { %v2775_v5 = vpop.f32.mrf.mxu0  ;;  %v2777_v6 = vpop.f32.mrf.mxu1 }
 0x132   : > { %v749_v7 = vpop.f32.mrf.mxu0  ;;  %v989_v8 = vpop.f32.mrf.mxu1 }
 0x133   : > { %v733_v7 = vadd.f32 %v2810_v35, %v2763_v57  ;;  %v743_v57 = vadd.f32 %v2810_v35, %v2771_v1 }
 0x134   : > { %v2779_v9 = vpop.f32.mrf.mxu0  ;;  %v2781_v10 = vpop.f32.mrf.mxu1 }
 0x136   : > { %v754_v11 = vpop.f32.mrf.mxu0  ;;  %v994_v12 = vpop.f32.mrf.mxu1 }
 0x138   : > { %v2783_v13 = vpop.f32.mrf.mxu0  ;;  %v2785_v14 = vpop.f32.mrf.mxu1 }
 0x13a   : > { %v759_v15 = vpop.f32.mrf.mxu0  ;;  %v999_v16 = vpop.f32.mrf.mxu1 }
 0x13b   : > { %v728_v15 = vadd.f32 %v2810_v35, %v2759_v53  ;;  %v738_v53 = vadd.f32 %v2810_v35, %v2767_v61  ;;  %v748_v61 = vadd.f32 %v2810_v35, %v2775_v5 }
 0x13c   : > { %v2787_v17 = vpop.f32.mrf.mxu0  ;;  %v2789_v18 = vpop.f32.mrf.mxu1 }
 0x13e   : > { %v764_v19 = vpop.f32.mrf.mxu0  ;;  %v1004_v20 = vpop.f32.mrf.mxu1 }
 0x140   : > { %v2791_v21 = vpop.f32.mrf.mxu0  ;;  %v2793_v22 = vpop.f32.mrf.mxu1 }
 0x142   : > { %v769_v23 = vpop.f32.mrf.mxu0  ;;  %v1009_v24 = vpop.f32.mrf.mxu1 }
 0x144   : > { %v2795_v25 = vpop.f32.mrf.mxu0  ;;  %v2797_v26 = vpop.f32.mrf.mxu1 }
 0x146   : > { %v774_v27 = vpop.f32.mrf.mxu0  ;;  %v1014_v28 = vpop.f32.mrf.mxu1 }
 0x148   : > { %v2799_v29 = vpop.f32.mrf.mxu0  ;;  %v2801_v30 = vpop.f32.mrf.mxu1 }
 0x14a   : > { %v779_v31 = vpop.f32.mrf.mxu0  ;;  %v1019_v32 = vpop.f32.mrf.mxu1 }
 0x14c   : > { %v2803_v33 = vpop.f32.mrf.mxu0  ;;  %v2805_v34 = vpop.f32.mrf.mxu1 }
 0x14e   : > { %v784_v36 = vpop.f32.mrf.mxu0  ;;  %v1024_v39 = vpop.f32.mrf.mxu1 }
 0x150   : > { %v2813_v43 = vpop.f32.mrf.mxu0  ;;  %v2011_v44 = vpop.f32.mrf.mxu1 }
 0x151   : > { %v1098_v48 = vadd.f32 %v2011_v44, %v713_v40  ;;  %v753_v40 = vadd.f32 %v2810_v35, %v2779_v9 }
 0x152   : > { %v789_v51 = vpop.f32.mrf.mxu0  ;;  %v1092_v52 = vpop.f32.mrf.mxu1 }
 0x153   : > { %v1412_v56 = vmax.f32 %v1098_v48, 0.0  ;;  %v1093_v59 = vadd.f32 %v1092_v52, %v708_v47 }
 0x154   : > { %v2818_v60 = vpop.f32.mrf.mxu0  ;;  %v2014_v63 = vpop.f32.mrf.mxu1 }
 0x155   : > { %1477 = vst.msk [vmem:[#allocation2 + $0x8] sm:$0xff] %vm1475_vm1, %v1412_v56  ;;  %v1411_v0 = vmax.f32 %v1093_v59, 0.0  ;;  %v1108_v3 = vadd.f32 %v2014_v63, %v723_v55  ;;  %v763_v56 = vadd.f32 %v2810_v35, %v2787_v17 }
 0x156   : > { %v794_v4 = vpop.f32.mrf.mxu0  ;;  %v1102_v37 = vpop.f32.mrf.mxu1 }
 0x157   : > { %1476 = vst.msk [vmem:[#allocation2] sm:$0xff] %vm1475_vm1, %v1411_v0  ;;  %v1414_v49 = vmax.f32 %v1108_v3, 0.0  ;;  %v1103_v8 = vadd.f32 %v1102_v37, %v718_v41  ;;  %v758_v4 = vadd.f32 %v2810_v35, %v2783_v13 }
 0x158   : > { %v2826_v11 = vpop.f32.mrf.mxu0  ;;  %v2017_v12 = vpop.f32.mrf.mxu1 }
 0x159   : > { %1479 = vst.msk [vmem:[#allocation2 + $0x18] sm:$0xff] %vm1475_vm1, %v1414_v49  ;;  %v1413_v45 = vmax.f32 %v1103_v8, 0.0  ;;  %v1118_v16 = vadd.f32 %v2017_v12, %v733_v7 }
 0x15a   : > { %v799_v19 = vpop.f32.mrf.mxu0  ;;  %v1112_v20 = vpop.f32.mrf.mxu1 }
 0x15b   : > { %1478 = vst.msk [vmem:[#allocation2 + $0x10] sm:$0xff] %vm1475_vm1, %v1413_v45  ;;  %v1416_v23 = vmax.f32 %v1118_v16, 0.0  ;;  %v1113_v24 = vadd.f32 %v1112_v20, %v728_v15  ;;  %v773_v45 = vadd.f32 %v2810_v35, %v2795_v25 }
 0x15c   : > { %v2834_v27 = vpop.f32.mrf.mxu0  ;;  %v2020_v28 = vpop.f32.mrf.mxu1  ;;  %v1541_v41 = vld [vmem:[#allocation2 + $0x8] sm:$0xff] }
 0x15d   : > { %1481 = vst.msk [vmem:[#allocation2 + $0x28] sm:$0xff] %vm1475_vm1, %v1416_v23  ;;  %v1415_v31 = vmax.f32 %v1113_v24, 0.0  ;;  %v1128_v32 = vadd.f32 %v2020_v28, %v743_v57  ;;  %v768_v28 = vadd.f32 %v2810_v35, %v2791_v21 }
 0x15e   : > { %v804_v36 = vpop.f32.mrf.mxu0  ;;  %v1122_v39 = vpop.f32.mrf.mxu1  ;;  %v1540_v8 = vld [vmem:[#allocation2] sm:$0xff] }
 0x15f   : > { %1480 = vst.msk [vmem:[#allocation2 + $0x20] sm:$0xff] %vm1475_vm1, %v1415_v31  ;;  %v1418_v1 = vmax.f32 %v1128_v32, 0.0  ;;  %v1123_v44 = vadd.f32 %v1122_v39, %v738_v53 }
 0x160   : > { %v2843_v47 = vpop.f32.mrf.mxu0  ;;  %v2023_v48 = vpop.f32.mrf.mxu1  ;;  %v1543_v20 = vld [vmem:[#allocation2 + $0x18] sm:$0xff] }
 0x161   : > { %1483 = vst.msk [vmem:[#allocation2 + $0x38] sm:$0xff] %vm1475_vm1, %v1418_v1  ;;  %v1417_v51 = vmax.f32 %v1123_v44, 0.0  ;;  %v1138_v52 = vadd.f32 %v2023_v48, %v753_v40  ;;  %v783_v1 = vadd.f32 %v2810_v35, %v2803_v33 }
 0x162   : > { %v809_v9 = vpop.f32.mrf.mxu0  ;;  %v1132_v55 = vpop.f32.mrf.mxu1  ;;  %v1542_v32 = vld [vmem:[#allocation2 + $0x10] sm:$0xff] }
 0x163   : > { %1482 = vst.msk [vmem:[#allocation2 + $0x30] sm:$0xff] %vm1475_vm1, %v1417_v51  ;;  %v1420_v59 = vmax.f32 %v1138_v52, 0.0  ;;  %v1133_v63 = vadd.f32 %v1132_v55, %v748_v61  ;;  %v778_v52 = vadd.f32 %v2810_v35, %v2799_v29 }
 0x164   : > { %v1545_v5 = vld [vmem:[#allocation2 + $0x28] sm:$0xff]  ;;  %v2855_v0 = vpop.f32.mrf.mxu0  ;;  %v2026_v3 = vpop.f32.mrf.mxu1 }
 0x165   : > { %v1549_v37 = vmax.f32 %v1541_v41, %v1545_v5  ;;  %1485 = vst.msk [vmem:[#allocation2 + $0x48] sm:$0xff] %vm1475_vm1, %v1420_v59  ;;  %v1419_v7 = vmax.f32 %v1133_v63, 0.0  ;;  %v1148_v49 = vadd.f32 %v2026_v3, %v763_v56  ;;  %v793_v59 = vadd.f32 %v2810_v35, %v2818_v60 }
 0x166   : > { %v1544_v17 = vld [vmem:[#allocation2 + $0x20] sm:$0xff]  ;;  %v814_v12 = vpop.f32.mrf.mxu0  ;;  %v1142_v15 = vpop.f32.mrf.mxu1 }
 0x167   : > { %1553 = vst.msk [vmem:[#allocation3 + $0x8] sm:$0xff] %vm1475_vm1, %v1549_v37  ;;  %v1548_v16 = vmax.f32 %v1540_v8, %v1544_v17  ;;  %1484 = vst.msk [vmem:[#allocation2 + $0x40] sm:$0xff] %vm1475_vm1, %v1419_v7  ;;  %v1422_v13 = vmax.f32 %v1148_v49, 0.0  ;;  %v1143_v19 = vadd.f32 %v1142_v15, %v758_v4  ;;  %v788_v37 = vadd.f32 %v2810_v35, %v2813_v43 }
 0x168   : > { %v1547_v57 = vld [vmem:[#allocation2 + $0x38] sm:$0xff]  ;;  %v2867_v23 = vpop.f32.mrf.mxu0  ;;  %v2029_v24 = vpop.f32.mrf.mxu1 }
 0x169   : > { %1552 = vst.msk [vmem:[#allocation3] sm:$0xff] %vm1475_vm1, %v1548_v16  ;;  %v1551_v53 = vmax.f32 %v1543_v20, %v1547_v57  ;;  %1487 = vst.msk [vmem:[#allocation2 + $0x58] sm:$0xff] %vm1475_vm1, %v1422_v13  ;;  %v1421_v25 = vmax.f32 %v1143_v19, 0.0  ;;  %v1158_v31 = vadd.f32 %v2029_v24, %v773_v45  ;;  %v803_v16 = vadd.f32 %v2810_v35, %v2834_v27 }
 0x16a   : > { %v1546_v36 = vld [vmem:[#allocation2 + $0x30] sm:$0xff]  ;;  %v819_v39 = vpop.f32.mrf.mxu0  ;;  %v1152_v40 = vpop.f32.mrf.mxu1  ;;  %v798_v24 = vadd.f32 %v2810_v35, %v2826_v11  ;;  %v813_v27 = vadd.f32 %v2810_v35, %v2855_v0 }
 0x16b   : > { %1555 = vst.msk [vmem:[#allocation3 + $0x18] sm:$0xff] %vm1475_vm1, %v1551_v53  ;;  %v1550_v44 = vmax.f32 %v1542_v32, %v1546_v36  ;;  %1486 = vst.msk [vmem:[#allocation2 + $0x50] sm:$0xff] %vm1475_vm1, %v1421_v25  ;;  %v1424_v21 = vmax.f32 %v1158_v31, 0.0  ;;  %v1153_v48 = vadd.f32 %v1152_v40, %v768_v28 }
 0x16c   : > { %v2877_v61 = vpop.f32.mrf.mxu0  ;;  %v2032_v51 = vpop.f32.mrf.mxu1  ;;  %v1557_v12 = vld [vmem:[#allocation2 + $0x48] sm:$0xff] }
 0x16d   : > { %1554 = vst.msk [vmem:[#allocation3 + $0x10] sm:$0xff] %vm1475_vm1, %v1550_v44  ;;  %1489 = vst.msk [vmem:[#allocation2 + $0x68] sm:$0xff] %vm1475_vm1, %v1424_v21  ;;  %v1423_v9 = vmax.f32 %v1153_v48, 0.0  ;;  %v1168_v33 = vadd.f32 %v2032_v51, %v783_v1 }
 0x16e   : > { %v824_v55 = vpop.f32.mrf.mxu0  ;;  %v1162_v56 = vpop.f32.mrf.mxu1  ;;  %v1556_v31 = vld [vmem:[#allocation2 + $0x40] sm:$0xff] }
 0x16f   : > { %1488 = vst.msk [vmem:[#allocation2 + $0x60] sm:$0xff] %vm1475_vm1, %v1423_v9  ;;  %v1426_v63 = vmax.f32 %v1168_v33, 0.0  ;;  %v1163_v41 = vadd.f32 %v1162_v56, %v778_v52  ;;  %v808_v9 = vadd.f32 %v2810_v35, %v2843_v47 }
 0x170   : > { %v1668_v29 = vld [vmem:[#allocation3] ss:$2 sm:$0xff]  ;;  %v1700_v5 = vld [vmem:[#allocation3 + $0x1] ss:$2 sm:$0xff]  ;;  %v2891_v3 = vpop.f32.mrf.mxu0  ;;  %v2035_v4 = vpop.f32.mrf.mxu1  ;;  %v1559_v44 = vld [vmem:[#allocation2 + $0x58] sm:$0xff] }
 0x171   : > { %v1731_v7 = vmax.f32 %v1668_v29, %v1700_v5  ;;  %1491 = vst.msk [vmem:[#allocation2 + $0x78] sm:$0xff] %vm1475_vm1, %v1426_v63  ;;  %v1425_v60 = vmax.f32 %v1163_v41, 0.0  ;;  %v1178_v49 = vadd.f32 %v2035_v4, %v793_v59  ;;  %v823_v29 = vadd.f32 %v2810_v35, %v2877_v61 }
 0x172   : > { %v829_v8 = vpop.f32.mrf.mxu0  ;;  %v1172_v17 = vpop.f32.mrf.mxu1  ;;  %v1558_v0 = vld [vmem:[#allocation2 + $0x50] sm:$0xff] }
 0x173   : > { %1747 = vst.msk [vmem:[%s2889_s26] sm:$0xff] %vm1475_vm1, %v1731_v7  ;;  %1490 = vst.msk [vmem:[#allocation2 + $0x70] sm:$0xff] %vm1475_vm1, %v1425_v60  ;;  %v1428_v15 = vmax.f32 %v1178_v49, 0.0  ;;  %v1173_v45 = vadd.f32 %v1172_v17, %v788_v37  ;;  %v818_v60 = vadd.f32 %v2810_v35, %v2867_v23 }
 0x174   : > { %v1670_v13 = vld [vmem:[#allocation3 + $0x10] ss:$2 sm:$0xff]  ;;  %v1702_v43 = vld [vmem:[#allocation3 + $0x11] ss:$2 sm:$0xff]  ;;  %v1561_v19 = vld [vmem:[#allocation2 + $0x68] sm:$0xff]  ;;  %v832_v20 = vpop.f32.mrf.mxu0  ;;  %v2038_v57 = vpop.f32.mrf.mxu1 }
 0x175   : > { %v1732_v28 = vmax.f32 %v1670_v13, %v1702_v43  ;;  %v1565_v53 = vmax.f32 %v1557_v12, %v1561_v19  ;;  %1493 = vst.msk [vmem:[#allocation2 + $0x88] sm:$0xff] %vm1475_vm1, %v1428_v15  ;;  %v1427_v25 = vmax.f32 %v1173_v45, 0.0  ;;  %v1188_v36 = vadd.f32 %v2038_v57, %v803_v16 }
 0x176   : > { %v1560_v32 = vld [vmem:[#allocation2 + $0x60] sm:$0xff]  ;;  %v834_v39 = vpop.f32.mrf.mxu0  ;;  %v1182_v40 = vpop.f32.mrf.mxu1  ;;  %v833_v12 = vadd.f32 %v2810_v35, %v832_v20  ;;  %v828_v57 = vadd.f32 %v2810_v35, %v2891_v3 }
 0x177   : > { %1748 = vst.msk [vmem:[%s2889_s26 + $0x8] sm:$0xff] %vm1475_vm1, %v1732_v28  ;;  %1569 = vst.msk [vmem:[#allocation3 + $0x28] sm:$0xff] %vm1475_vm1, %v1565_v53  ;;  %v1564_v1 = vmax.f32 %v1556_v31, %v1560_v32  ;;  %v1183_v11 = vadd.f32 %v1182_v40, %v798_v24  ;;  %v1430_v48 = vmax.f32 %v1188_v36, 0.0 }
 0x178   : > { %1492 = vst.msk [vmem:[#allocation2 + $0x80] sm:$0xff] %vm1475_vm1, %v1427_v25  ;;  %v1563_v21 = vld [vmem:[#allocation2 + $0x78] sm:$0xff]  ;;  %v837_v51 = vpop.f32.mrf.mxu0  ;;  %v2041_v52 = vpop.f32.mrf.mxu1 }
 0x179   : > { %1568 = vst.msk [vmem:[#allocation3 + $0x20] sm:$0xff] %vm1475_vm1, %v1564_v1  ;;  %v1567_v33 = vmax.f32 %v1559_v44, %v1563_v21  ;;  %v1429_v55 = vmax.f32 %v1183_v11, 0.0  ;;  %v1198_v56 = vadd.f32 %v2041_v52, %v813_v27  ;;  %1495 = vst.msk [vmem:[#allocation2 + $0x98] sm:$0xff] %vm1475_vm1, %v1430_v48  ;;  %v838_v44 = vadd.f32 %v2810_v35, %v837_v51 }
 0x17a   : > { %v1562_v59 = vld [vmem:[#allocation2 + $0x70] sm:$0xff]  ;;  %v839_v63 = vpop.f32.mrf.mxu0  ;;  %v1192_v41 = vpop.f32.mrf.mxu1 }
 0x17b   : > { %1571 = vst.msk [vmem:[#allocation3 + $0x38] sm:$0xff] %vm1475_vm1, %v1567_v33  ;;  %v1566_v5 = vmax.f32 %v1558_v0, %v1562_v59  ;;  %1494 = vst.msk [vmem:[#allocation2 + $0x90] sm:$0xff] %vm1475_vm1, %v1429_v55  ;;  %v1432_v47 = vmax.f32 %v1198_v56, 0.0  ;;  %v1193_v4 = vadd.f32 %v1192_v41, %v808_v9 }
 0x17c   : > { %v842_v37 = vpop.f32.mrf.mxu0  ;;  %v2044_v7 = vpop.f32.mrf.mxu1  ;;  %v1573_v20 = vld [vmem:[#allocation2 + $0x88] sm:$0xff] }
 0x17d   : > { %1570 = vst.msk [vmem:[#allocation3 + $0x30] sm:$0xff] %vm1475_vm1, %v1566_v5  ;;  %1497 = vst.msk [vmem:[#allocation2 + $0xa8] sm:$0xff] %vm1475_vm1, %v1432_v47  ;;  %v1431_v49 = vmax.f32 %v1193_v4, 0.0  ;;  %v1208_v8 = vadd.f32 %v2044_v7, %v823_v29  ;;  %v843_v27 = vadd.f32 %v2810_v35, %v842_v37 }
 0x17e   : > { %v844_v17 = vpop.f32.mrf.mxu0  ;;  %v1202_v61 = vpop.f32.mrf.mxu1 }
 0x17f   : > { %1496 = vst.msk [vmem:[#allocation2 + $0xa0] sm:$0xff] %vm1475_vm1, %v1431_v49  ;;  %v1434_v15 = vmax.f32 %v1208_v8, 0.0  ;;  %v1203_v45 = vadd.f32 %v1202_v61, %v818_v60  ;;  %v1572_v52 = vld [vmem:[#allocation2 + $0x80] sm:$0xff] }
 0x180   : > { %v1672_v16 = vld [vmem:[#allocation3 + $0x20] ss:$2 sm:$0xff]  ;;  %v1704_v13 = vld [vmem:[#allocation3 + $0x21] ss:$2 sm:$0xff]  ;;  %v847_v43 = vpop.f32.mrf.mxu0  ;;  %v2047_v19 = vpop.f32.mrf.mxu1  ;;  %v1575_v51 = vld [vmem:[#allocation2 + $0x98] sm:$0xff] }
 0x181   : > { %v1733_v23 = vmax.f32 %v1672_v16, %v1704_v13  ;;  %1499 = vst.msk [vmem:[#allocation2 + $0xb8] sm:$0xff] %vm1475_vm1, %v1434_v15  ;;  %v1433_v24 = vmax.f32 %v1203_v45, 0.0  ;;  %v1218_v28 = vadd.f32 %v2047_v19, %v833_v12  ;;  %v848_v37 = vadd.f32 %v2810_v35, %v847_v43 }
 0x182   : > { %v849_v53 = vpop.f32.mrf.mxu0  ;;  %v1212_v25 = vpop.f32.mrf.mxu1  ;;  %v1574_v49 = vld [vmem:[#allocation2 + $0x90] sm:$0xff] }
 0x183   : > { %1749 = vst.msk [vmem:[%s2889_s26 + $0x10] sm:$0xff] %vm1475_vm1, %v1733_v23  ;;  %1498 = vst.msk [vmem:[#allocation2 + $0xb0] sm:$0xff] %vm1475_vm1, %v1433_v24  ;;  %v1436_v31 = vmax.f32 %v1218_v28, 0.0  ;;  %v1213_v32 = vadd.f32 %v1212_v25, %v828_v57 }
 0x184   : > { %v1674_v36 = vld [vmem:[#allocation3 + $0x30] ss:$2 sm:$0xff]  ;;  %v1706_v39 = vld [vmem:[#allocation3 + $0x31] ss:$2 sm:$0xff]  ;;  %v1577_v40 = vld [vmem:[#allocation2 + $0xa8] sm:$0xff]  ;;  %v852_v3 = vpop.f32.mrf.mxu0  ;;  %v2050_v1 = vpop.f32.mrf.mxu1 }
 0x185   : > { %v1734_v11 = vmax.f32 %v1674_v36, %v1706_v39  ;;  %v1581_v21 = vmax.f32 %v1573_v20, %v1577_v40  ;;  %1501 = vst.msk [vmem:[#allocation2 + $0xc8] sm:$0xff] %vm1475_vm1, %v1436_v31  ;;  %v1435_v48 = vmax.f32 %v1213_v32, 0.0  ;;  %v1228_v33 = vadd.f32 %v2050_v1, %v843_v27 }
 0x186   : > { %v1576_v9 = vld [vmem:[#allocation2 + $0xa0] sm:$0xff]  ;;  %v854_v55 = vpop.f32.mrf.mxu0  ;;  %v1222_v56 = vpop.f32.mrf.mxu1  ;;  %v853_v59 = vadd.f32 %v2810_v35, %v852_v3 }
 0x187   : > { %1750 = vst.msk [vmem:[%s2889_s26 + $0x18] sm:$0xff] %vm1475_vm1, %v1734_v11  ;;  %1585 = vst.msk [vmem:[#allocation3 + $0x48] sm:$0xff] %vm1475_vm1, %v1581_v21  ;;  %v1580_v0 = vmax.f32 %v1572_v52, %v1576_v9  ;;  %v1223_v63 = vadd.f32 %v1222_v56, %v838_v44  ;;  %v1438_v29 = vmax.f32 %v1228_v33, 0.0 }
 0x188   : > { %1500 = vst.msk [vmem:[#allocation2 + $0xc0] sm:$0xff] %vm1475_vm1, %v1435_v48  ;;  %v1579_v41 = vld [vmem:[#allocation2 + $0xb8] sm:$0xff]  ;;  %v857_v5 = vpop.f32.mrf.mxu0  ;;  %v2053_v47 = vpop.f32.mrf.mxu1 }
 0x189   : > { %1584 = vst.msk [vmem:[#allocation3 + $0x40] sm:$0xff] %vm1475_vm1, %v1580_v0  ;;  %v1583_v4 = vmax.f32 %v1575_v51, %v1579_v41  ;;  %v1437_v7 = vmax.f32 %v1223_v63, 0.0  ;;  %v1238_v60 = vadd.f32 %v2053_v47, %v853_v59  ;;  %1503 = vst.msk [vmem:[#allocation2 + $0xd8] sm:$0xff] %vm1475_vm1, %v1438_v29  ;;  %v858_v43 = vadd.f32 %v2810_v35, %v857_v5 }
 0x18a   : > { %v1578_v8 = vld [vmem:[#allocation2 + $0xb0] sm:$0xff]  ;;  %v859_v17 = vpop.f32.mrf.mxu0  ;;  %v1232_v61 = vpop.f32.mrf.mxu1 }
 0x18b   : > { %1587 = vst.msk [vmem:[#allocation3 + $0x58] sm:$0xff] %vm1475_vm1, %v1583_v4  ;;  %v1582_v12 = vmax.f32 %v1574_v49, %v1578_v8  ;;  %1502 = vst.msk [vmem:[#allocation2 + $0xd0] sm:$0xff] %vm1475_vm1, %v1437_v7  ;;  %v1440_v15 = vmax.f32 %v1238_v60, 0.0  ;;  %v1233_v45 = vadd.f32 %v1232_v61, %v848_v37 }
 0x18c   : > { %v862_v16 = vpop.f32.mrf.mxu0  ;;  %v2056_v13 = vpop.f32.mrf.mxu1  ;;  %v1589_v11 = vld [vmem:[#allocation2 + $0xc8] sm:$0xff] }
 0x18d   : > { %1586 = vst.msk [vmem:[#allocation3 + $0x50] sm:$0xff] %vm1475_vm1, %v1582_v12  ;;  %1505 = vst.msk [vmem:[#allocation2 + $0xe8] sm:$0xff] %vm1475_vm1, %v1440_v15  ;;  %v1439_v19 = vmax.f32 %v1233_v45, 0.0  ;;  %v863_v23 = vadd.f32 %v2810_v35, %v862_v16 }
 0x18e   : > { %v864_v57 = vpop.f32.mrf.mxu0  ;;  %v1242_v24 = vpop.f32.mrf.mxu1 }
 0x18f   : > { %1504 = vst.msk [vmem:[#allocation2 + $0xe0] sm:$0xff] %vm1475_vm1, %v1439_v19  ;;  %v1248_v28 = vadd.f32 %v2056_v13, %v863_v23  ;;  %v1243_v53 = vadd.f32 %v1242_v24, %v858_v43  ;;  %v1588_v63 = vld [vmem:[#allocation2 + $0xc0] sm:$0xff] }
 0x190   : > { %v1676_v25 = vld [vmem:[#allocation3 + $0x40] ss:$2 sm:$0xff]  ;;  %v1708_v20 = vld [vmem:[#allocation3 + $0x41] ss:$2 sm:$0xff]  ;;  %v867_v31 = vpop.f32.mrf.mxu0  ;;  %v2059_v32 = vpop.f32.mrf.mxu1  ;;  %v1591_v7 = vld [vmem:[#allocation2 + $0xd8] sm:$0xff] }
 0x191   : > { %v1735_v36 = vmax.f32 %v1676_v25, %v1708_v20  ;;  %v1442_v39 = vmax.f32 %v1248_v28, 0.0  ;;  %v1441_v40 = vmax.f32 %v1243_v53, 0.0  ;;  %v868_v27 = vadd.f32 %v2810_v35, %v867_v31 }
 0x192   : > { %v869_v3 = vpop.f32.mrf.mxu0  ;;  %v1252_v1 = vpop.f32.mrf.mxu1  ;;  %v1590_v8 = vld [vmem:[#allocation2 + $0xd0] sm:$0xff] }
 0x193   : > { %1751 = vst.msk [vmem:[%s2889_s26 + $0x20] sm:$0xff] %vm1475_vm1, %v1735_v36  ;;  %1507 = vst.msk [vmem:[#allocation2 + $0xf8] sm:$0xff] %vm1475_vm1, %v1442_v39  ;;  %v1253_v44 = vadd.f32 %v1252_v1, %v868_v27 }
 0x194   : > { %1506 = vst.msk [vmem:[#allocation2 + $0xf0] sm:$0xff] %vm1475_vm1, %v1441_v40  ;;  %v1678_v21 = vld [vmem:[#allocation3 + $0x50] ss:$2 sm:$0xff]  ;;  %v1710_v48 = vld [vmem:[#allocation3 + $0x51] ss:$2 sm:$0xff]  ;;  %v1593_v52 = vld [vmem:[#allocation2 + $0xe8] sm:$0xff]  ;;  %v872_v9 = vpop.f32.mrf.mxu0  ;;  %v2062_v33 = vpop.f32.mrf.mxu1 }
 0x195   : > { %v1736_v55 = vmax.f32 %v1678_v21, %v1710_v48  ;;  %v1597_v56 = vmax.f32 %v1589_v11, %v1593_v52  ;;  %v1443_v0 = vmax.f32 %v1253_v44, 0.0  ;;  %v873_v59 = vadd.f32 %v2810_v35, %v872_v9 }
 0x196   : > { %v1592_v51 = vld [vmem:[#allocation2 + $0xe0] sm:$0xff]  ;;  %v874_v41 = vpop.f32.mrf.mxu0  ;;  %v1262_v29 = vpop.f32.mrf.mxu1 }
 0x197   : > { %1752 = vst.msk [vmem:[%s2889_s26 + $0x28] sm:$0xff] %vm1475_vm1, %v1736_v55  ;;  %1601 = vst.msk [vmem:[#allocation3 + $0x68] sm:$0xff] %vm1475_vm1, %v1597_v56  ;;  %v1596_v5 = vmax.f32 %v1588_v63, %v1592_v51  ;;  %v1258_v47 = vadd.f32 %v2059_v32, %v873_v59 }
 0x198   : > { %1508 = vst.msk [vmem:[#allocation2 + $0x100] sm:$0xff] %vm1475_vm1, %v1443_v0  ;;  %v877_v4 = vpop.f32.mrf.mxu0  ;;  %v2065_v37 = vpop.f32.mrf.mxu1 }
 0x199   : > { %1600 = vst.msk [vmem:[#allocation3 + $0x60] sm:$0xff] %vm1475_vm1, %v1596_v5  ;;  %v1444_v60 = vmax.f32 %v1258_v47, 0.0  ;;  %v878_v49 = vadd.f32 %v2810_v35, %v877_v4 }
 0x19a   : > { %v1595_v17 = vld [vmem:[#allocation2 + $0xf8] sm:$0xff]  ;;  %v879_v12 = vpop.f32.mrf.mxu0  ;;  %v1272_v15 = vpop.f32.mrf.mxu1 }
 0x19b   : > { %v1594_v61 = vld [vmem:[#allocation2 + $0xf0] sm:$0xff]  ;;  %v1599_v45 = vmax.f32 %v1591_v7, %v1595_v17  ;;  %1509 = vst.msk [vmem:[#allocation2 + $0x108] sm:$0xff] %vm1475_vm1, %v1444_v60  ;;  %v1263_v13 = vadd.f32 %v1262_v29, %v878_v49  ;;  %v953_v12 = vadd.f32 %v2810_v35, %v2751_v42 }
 0x19c   : > { %v1598_v16 = vmax.f32 %v1590_v8, %v1594_v61  ;;  %v882_v43 = vpop.f32.mrf.mxu0  ;;  %v2068_v19 = vpop.f32.mrf.mxu1 }
 0x19d   : > { %1603 = vst.msk [vmem:[#allocation3 + $0x78] sm:$0xff] %vm1475_vm1, %v1599_v45  ;;  %v1445_v23 = vmax.f32 %v1263_v13, 0.0  ;;  %v883_v57 = vadd.f32 %v2810_v35, %v882_v43  ;;  %v948_v43 = vadd.f32 %v2810_v35, %v2749_v38  ;;  %v958_v38 = vadd.f32 %v2810_v35, %v2755_v46 }
 0x19e   : > { %1602 = vst.msk [vmem:[#allocation3 + $0x70] sm:$0xff] %vm1475_vm1, %v1598_v16  ;;  %v884_v24 = vpop.f32.mrf.mxu0  ;;  %v1282_v28 = vpop.f32.mrf.mxu1 }
 0x19f   : > { %1510 = vst.msk [vmem:[#allocation2 + $0x110] sm:$0xff] %vm1475_vm1, %v1445_v23  ;;  %v1268_v53 = vadd.f32 %v2062_v33, %v883_v57  ;;  %v1604_v8 = vld [vmem:[#allocation2 + $0x100] sm:$0xff] }
 0x1a0   : > { %v1680_v25 = vld [vmem:[#allocation3 + $0x60] ss:$2 sm:$0xff]  ;;  %v1712_v20 = vld [vmem:[#allocation3 + $0x61] ss:$2 sm:$0xff]  ;;  %v887_v31 = vpop.f32.mrf.mxu0  ;;  %v2965_v32 = vpop.f32.mrf.mxu1 }
 0x1a1   : > { %v1737_v36 = vmax.f32 %v1680_v25, %v1712_v20  ;;  %v1446_v39 = vmax.f32 %v1268_v53, 0.0  ;;  %v888_v40 = vadd.f32 %v2810_v35, %v887_v31 }
 0x1a2   : > { %v889_v27 = vpop.f32.mrf.mxu0  ;;  %v1292_v3 = vpop.f32.mrf.mxu1  ;;  %v1605_v53 = vld [vmem:[#allocation2 + $0x108] sm:$0xff] }
 0x1a3   : > { %1753 = vst.msk [vmem:[%s2889_s26 + $0x30] sm:$0xff] %vm1475_vm1, %v1737_v36  ;;  %1511 = vst.msk [vmem:[#allocation2 + $0x118] sm:$0xff] %vm1475_vm1, %v1446_v39  ;;  %v1273_v1 = vadd.f32 %v1272_v15, %v888_v40 }
 0x1a4   : > { %v892_v21 = vpop.f32.mrf.mxu0  ;;  %v2971_v48 = vpop.f32.mrf.mxu1 }
 0x1a5   : > { %v1682_v11 = vld [vmem:[#allocation3 + $0x70] ss:$2 sm:$0xff]  ;;  %v1714_v44 = vld [vmem:[#allocation3 + $0x71] ss:$2 sm:$0xff]  ;;  %v1447_v9 = vmax.f32 %v1273_v1, 0.0  ;;  %v893_v33 = vadd.f32 %v2810_v35, %v892_v21  ;;  %v973_v21 = vadd.f32 %v2810_v35, %v2765_v58 }
 0x1a6   : > { %v1738_v52 = vmax.f32 %v1682_v11, %v1714_v44  ;;  %v894_v55 = vpop.f32.mrf.mxu0  ;;  %v2974_v56 = vpop.f32.mrf.mxu1 }
 0x1a7   : > { %1512 = vst.msk [vmem:[#allocation2 + $0x120] sm:$0xff] %vm1475_vm1, %v1447_v9  ;;  %v1278_v0 = vadd.f32 %v2065_v37, %v893_v33 }
 0x1a8   : > { %1754 = vst.msk [vmem:[%s2889_s26 + $0x38] sm:$0xff] %vm1475_vm1, %v1738_v52  ;;  %v897_v59 = vpop.f32.mrf.mxu0  ;;  %v2979_v63 = vpop.f32.mrf.mxu1 }
 0x1a9   : > { %v1448_v51 = vmax.f32 %v1278_v0, 0.0  ;;  %v898_v41 = vadd.f32 %v2810_v35, %v897_v59 }
 0x1aa   : > { %v899_v29 = vpop.f32.mrf.mxu0  ;;  %v2982_v5 = vpop.f32.mrf.mxu1 }
 0x1ab   : > { %1513 = vst.msk [vmem:[#allocation2 + $0x128] sm:$0xff] %vm1475_vm1, %v1448_v51  ;;  %v1283_v47 = vadd.f32 %v1282_v28, %v898_v41  ;;  %v963_v28 = vadd.f32 %v2810_v35, %v2757_v50  ;;  %v968_v51 = vadd.f32 %v2810_v35, %v2761_v54 }
 0x1ac   : > { %v902_v4 = vpop.f32.mrf.mxu0  ;;  %v2985_v7 = vpop.f32.mrf.mxu1 }
 0x1ad   : > { %v1449_v60 = vmax.f32 %v1283_v47, 0.0  ;;  %v903_v49 = vadd.f32 %v2810_v35, %v902_v4 }
 0x1ae   : > { %v1608_v37 = vld [vmem:[#allocation2 + $0x120] sm:$0xff]  ;;  %v904_v17 = vpop.f32.mrf.mxu0  ;;  %v2988_v61 = vpop.f32.mrf.mxu1 }
 0x1af   : > { %v1612_v15 = vmax.f32 %v1604_v8, %v1608_v37  ;;  %1514 = vst.msk [vmem:[#allocation2 + $0x130] sm:$0xff] %vm1475_vm1, %v1449_v60  ;;  %v1288_v45 = vadd.f32 %v2068_v19, %v903_v49  ;;  %v1607_v49 = vld [vmem:[#allocation2 + $0x118] sm:$0xff] }
 0x1b0   : > { %v907_v16 = vpop.f32.mrf.mxu0  ;;  %v2083_v13 = vpop.f32.mrf.mxu1 }
 0x1b1   : > { %1616 = vst.msk [vmem:[#allocation3 + $0x80] sm:$0xff] %vm1475_vm1, %v1612_v15  ;;  %v1450_v23 = vmax.f32 %v1288_v45, 0.0  ;;  %v908_v57 = vadd.f32 %v2810_v35, %v907_v16  ;;  %v1338_v24 = vadd.f32 %v2083_v13, %v953_v12  ;;  %v978_v45 = vadd.f32 %v2810_v35, %v2769_v62 }
 0x1b2   : > { %v1609_v42 = vld [vmem:[#allocation2 + $0x128] sm:$0xff]  ;;  %v909_v25 = vpop.f32.mrf.mxu0  ;;  %v1332_v20 = vpop.f32.mrf.mxu1  ;;  %v983_v16 = vadd.f32 %v2810_v35, %v2773_v2 }
 0x1b3   : > { %v1613_v31 = vmax.f32 %v1605_v53, %v1609_v42  ;;  %1515 = vst.msk [vmem:[#allocation2 + $0x138] sm:$0xff] %vm1475_vm1, %v1450_v23  ;;  %v1293_v19 = vadd.f32 %v1292_v3, %v908_v57  ;;  %v1460_v36 = vmax.f32 %v1338_v24, 0.0  ;;  %v1333_v39 = vadd.f32 %v1332_v20, %v948_v43  ;;  %v1606_v3 = vld [vmem:[#allocation2 + $0x110] sm:$0xff] }
 0x1b4   : > { %v912_v40 = vpop.f32.mrf.mxu0  ;;  %v2086_v27 = vpop.f32.mrf.mxu1  ;;  %v993_v20 = vadd.f32 %v2810_v35, %v2781_v10 }
 0x1b5   : > { %1617 = vst.msk [vmem:[#allocation3 + $0x88] sm:$0xff] %vm1475_vm1, %v1613_v31  ;;  %v1451_v1 = vmax.f32 %v1293_v19, 0.0  ;;  %1525 = vst.msk [vmem:[#allocation2 + $0x188] sm:$0xff] %vm1475_vm1, %v1460_v36  ;;  %v1459_v50 = vmax.f32 %v1333_v39, 0.0  ;;  %v913_v11 = vadd.f32 %v2810_v35, %v912_v40  ;;  %v1348_v44 = vadd.f32 %v2086_v27, %v963_v28 }
 0x1b6   : > { %v1610_v52 = vld [vmem:[#allocation2 + $0x130] sm:$0xff]  ;;  %v914_v9 = vpop.f32.mrf.mxu0  ;;  %v1342_v33 = vpop.f32.mrf.mxu1  ;;  %v988_v19 = vadd.f32 %v2810_v35, %v2777_v6 }
 0x1b7   : > { %v1614_v55 = vmax.f32 %v1606_v3, %v1610_v52  ;;  %1516 = vst.msk [vmem:[#allocation2 + $0x140] sm:$0xff] %vm1475_vm1, %v1451_v1  ;;  %1524 = vst.msk [vmem:[#allocation2 + $0x180] sm:$0xff] %vm1475_vm1, %v1459_v50  ;;  %v1298_v46 = vadd.f32 %v2965_v32, %v913_v11  ;;  %v1462_v0 = vmax.f32 %v1348_v44, 0.0  ;;  %v1343_v59 = vadd.f32 %v1342_v33, %v958_v38 }
 0x1b8   : > { %v917_v41 = vpop.f32.mrf.mxu0  ;;  %v2089_v29 = vpop.f32.mrf.mxu1  ;;  %v998_v3 = vadd.f32 %v2810_v35, %v2785_v14  ;;  %v1003_v52 = vadd.f32 %v2810_v35, %v2789_v18  ;;  %v1013_v18 = vadd.f32 %v2810_v35, %v2797_v26 }
 0x1b9   : > { %1618 = vst.msk [vmem:[#allocation3 + $0x90] sm:$0xff] %vm1475_vm1, %v1614_v55  ;;  %v1452_v58 = vmax.f32 %v1298_v46, 0.0  ;;  %1527 = vst.msk [vmem:[#allocation2 + $0x198] sm:$0xff] %vm1475_vm1, %v1462_v0  ;;  %v1461_v47 = vmax.f32 %v1343_v59, 0.0  ;;  %v918_v4 = vadd.f32 %v2810_v35, %v917_v41  ;;  %v1358_v60 = vadd.f32 %v2089_v29, %v973_v21 }
 0x1ba   : > { %v1611_v8 = vld [vmem:[#allocation2 + $0x138] sm:$0xff]  ;;  %v919_v37 = vpop.f32.mrf.mxu0  ;;  %v1352_v32 = vpop.f32.mrf.mxu1 }
 0x1bb   : > { %v1615_v17 = vmax.f32 %v1607_v49, %v1611_v8  ;;  %1517 = vst.msk [vmem:[#allocation2 + $0x148] sm:$0xff] %vm1475_vm1, %v1452_v58  ;;  %1526 = vst.msk [vmem:[#allocation2 + $0x190] sm:$0xff] %vm1475_vm1, %v1461_v47  ;;  %v1303_v54 = vadd.f32 %v2974_v56, %v918_v4  ;;  %v1464_v12 = vmax.f32 %v1358_v60, 0.0  ;;  %v1353_v15 = vadd.f32 %v1352_v32, %v968_v51 }
 0x1bc   : > { %v1684_v13 = vld [vmem:[#allocation3 + $0x80] ss:$2 sm:$0xff]  ;;  %v1716_v43 = vld [vmem:[#allocation3 + $0x81] ss:$2 sm:$0xff]  ;;  %v922_v23 = vpop.f32.mrf.mxu0  ;;  %v2092_v57 = vpop.f32.mrf.mxu1 }
 0x1bd   : > { %v1739_v24 = vmax.f32 %v1684_v13, %v1716_v43  ;;  %1619 = vst.msk [vmem:[#allocation3 + $0x98] sm:$0xff] %vm1475_vm1, %v1615_v17  ;;  %v1453_v28 = vmax.f32 %v1303_v54, 0.0  ;;  %1529 = vst.msk [vmem:[#allocation2 + $0x1a8] sm:$0xff] %vm1475_vm1, %v1464_v12  ;;  %v1463_v56 = vmax.f32 %v1353_v15, 0.0  ;;  %v923_v53 = vadd.f32 %v2810_v35, %v922_v23  ;;  %v1637_v44 = vld [vmem:[#allocation2 + $0x188] sm:$0xff] }
 0x1be   : > { %v1368_v42 = vadd.f32 %v2092_v57, %v983_v16  ;;  %v924_v25 = vpop.f32.mrf.mxu0  ;;  %v1362_v62 = vpop.f32.mrf.mxu1  ;;  %v1636_v29 = vld [vmem:[#allocation2 + $0x180] sm:$0xff]  ;;  %v1008_v12 = vadd.f32 %v2810_v35, %v2793_v22  ;;  %v1023_v43 = vadd.f32 %v2810_v35, %v2805_v34 }
 0x1bf   : > { %1755 = vst.msk [vmem:[%s2889_s26 + $0x40] sm:$0xff] %vm1475_vm1, %v1739_v24  ;;  %1518 = vst.msk [vmem:[#allocation2 + $0x150] sm:$0xff] %vm1475_vm1, %v1453_v28  ;;  %v1308_v2 = vadd.f32 %v2971_v48, %v923_v53  ;;  %v1363_v31 = vadd.f32 %v1362_v62, %v978_v45  ;;  %v1018_v62 = vadd.f32 %v2810_v35, %v2801_v30 }
 0x1c0   : > { %1528 = vst.msk [vmem:[#allocation2 + $0x1a0] sm:$0xff] %vm1475_vm1, %v1463_v56  ;;  %v1466_v36 = vmax.f32 %v1368_v42, 0.0  ;;  %v927_v39 = vpop.f32.mrf.mxu0  ;;  %v2095_v38 = vpop.f32.mrf.mxu1  ;;  %v1639_v15 = vld [vmem:[#allocation2 + $0x198] sm:$0xff] }
 0x1c1   : > { %v1454_v40 = vmax.f32 %v1308_v2, 0.0  ;;  %v1465_v27 = vmax.f32 %v1363_v31, 0.0  ;;  %v928_v1 = vadd.f32 %v2810_v35, %v927_v39  ;;  %v1378_v10 = vadd.f32 %v2095_v38, %v993_v20  ;;  %v1620_v39 = vld [vmem:[#allocation2 + $0x140] sm:$0xff] }
 0x1c2   : > { %1531 = vst.msk [vmem:[#allocation2 + $0x1b8] sm:$0xff] %vm1475_vm1, %v1466_v36  ;;  %v929_v50 = vpop.f32.mrf.mxu0  ;;  %v1372_v11 = vpop.f32.mrf.mxu1  ;;  %v1638_v23 = vld [vmem:[#allocation2 + $0x190] sm:$0xff] }
 0x1c3   : > { %1519 = vst.msk [vmem:[#allocation2 + $0x158] sm:$0xff] %vm1475_vm1, %v1454_v40  ;;  %1530 = vst.msk [vmem:[#allocation2 + $0x1b0] sm:$0xff] %vm1475_vm1, %v1465_v27  ;;  %v1313_v48 = vadd.f32 %v2982_v5, %v928_v1  ;;  %v1468_v6 = vmax.f32 %v1378_v10, 0.0  ;;  %v1373_v21 = vadd.f32 %v1372_v11, %v988_v19 }
 0x1c4   : > { %v1686_v9 = vld [vmem:[#allocation3 + $0x90] ss:$2 sm:$0xff]  ;;  %v1718_v33 = vld [vmem:[#allocation3 + $0x91] ss:$2 sm:$0xff]  ;;  %v1641_v55 = vld [vmem:[#allocation2 + $0x1a8] sm:$0xff]  ;;  %v932_v46 = vpop.f32.mrf.mxu0  ;;  %v2098_v0 = vpop.f32.mrf.mxu1 }
 0x1c5   : > { %v1740_v59 = vmax.f32 %v1686_v9, %v1718_v33  ;;  %v1645_v51 = vmax.f32 %v1637_v44, %v1641_v55  ;;  %v1455_v41 = vmax.f32 %v1313_v48, 0.0  ;;  %1533 = vst.msk [vmem:[#allocation2 + $0x1c8] sm:$0xff] %vm1475_vm1, %v1468_v6  ;;  %v1467_v5 = vmax.f32 %v1373_v21, 0.0  ;;  %v1621_v21 = vld [vmem:[#allocation2 + $0x148] sm:$0xff] }
 0x1c6   : > { %v933_v47 = vadd.f32 %v2810_v35, %v932_v46  ;;  %v1388_v14 = vadd.f32 %v2098_v0, %v1003_v52  ;;  %v934_v4 = vpop.f32.mrf.mxu0  ;;  %v1382_v60 = vpop.f32.mrf.mxu1  ;;  %v1622_v46 = vld [vmem:[#allocation2 + $0x150] sm:$0xff] }
 0x1c7   : > { %v1640_v58 = vld [vmem:[#allocation2 + $0x1a0] sm:$0xff]  ;;  %1756 = vst.msk [vmem:[%s2889_s26 + $0x48] sm:$0xff] %vm1475_vm1, %v1740_v59  ;;  %1649 = vst.msk [vmem:[#allocation3 + $0xc8] sm:$0xff] %vm1475_vm1, %v1645_v51  ;;  %v1383_v8 = vadd.f32 %v1382_v60, %v998_v3 }
 0x1c8   : > { %v1644_v49 = vmax.f32 %v1636_v29, %v1640_v58  ;;  %1520 = vst.msk [vmem:[#allocation2 + $0x160] sm:$0xff] %vm1475_vm1, %v1455_v41  ;;  %1532 = vst.msk [vmem:[#allocation2 + $0x1c0] sm:$0xff] %vm1475_vm1, %v1467_v5  ;;  %v1318_v37 = vadd.f32 %v2979_v63, %v933_v47  ;;  %v1470_v32 = vmax.f32 %v1388_v14, 0.0  ;;  %v937_v17 = vpop.f32.mrf.mxu0  ;;  %v2101_v54 = vpop.f32.mrf.mxu1 }
 0x1c9   : > { %v1643_v26 = vld [vmem:[#allocation2 + $0x1b8] sm:$0xff]  ;;  %v1469_v45 = vmax.f32 %v1383_v8, 0.0  ;;  %v938_v16 = vadd.f32 %v2810_v35, %v937_v17  ;;  %v1398_v13 = vadd.f32 %v2101_v54, %v1013_v18 }
 0x1ca   : > { %1648 = vst.msk [vmem:[#allocation3 + $0xc0] sm:$0xff] %vm1475_vm1, %v1644_v49  ;;  %v1647_v57 = vmax.f32 %v1639_v15, %v1643_v26  ;;  %v1642_v63 = vld [vmem:[#allocation2 + $0x1b0] sm:$0xff]  ;;  %v1456_v24 = vmax.f32 %v1318_v37, 0.0  ;;  %1535 = vst.msk [vmem:[#allocation2 + $0x1d8] sm:$0xff] %vm1475_vm1, %v1470_v32  ;;  %v939_v28 = vpop.f32.mrf.mxu0  ;;  %v1392_v56 = vpop.f32.mrf.mxu1  ;;  %v1623_v4 = vld [vmem:[#allocation2 + $0x158] sm:$0xff] }
 0x1cb   : > { %v1646_v22 = vmax.f32 %v1638_v23, %v1642_v63  ;;  %1534 = vst.msk [vmem:[#allocation2 + $0x1d0] sm:$0xff] %vm1475_vm1, %v1469_v45  ;;  %v1323_v53 = vadd.f32 %v2988_v61, %v938_v16  ;;  %v1472_v42 = vmax.f32 %v1398_v13, 0.0  ;;  %v1393_v25 = vadd.f32 %v1392_v56, %v1008_v12  ;;  %v2212_v61 = vld [vmem:[%s3114_s2] ss:$0 sm:$0xff] }
 0x1cc   : > { %1651 = vst.msk [vmem:[#allocation3 + $0xd8] sm:$0xff] %vm1475_vm1, %v1647_v57  ;;  %1521 = vst.msk [vmem:[#allocation2 + $0x168] sm:$0xff] %vm1475_vm1, %v1456_v24  ;;  %v942_v34 = vpop.f32.mrf.mxu0  ;;  %v2104_v20 = vpop.f32.mrf.mxu1  ;;  %v1653_v3 = vld [vmem:[#allocation2 + $0x1c8] sm:$0xff] }
 0x1cd   : > { %1650 = vst.msk [vmem:[#allocation3 + $0xd0] sm:$0xff] %vm1475_vm1, %v1646_v22  ;;  %v1457_v2 = vmax.f32 %v1323_v53, 0.0  ;;  %1537 = vst.msk [vmem:[#allocation2 + $0x1e8] sm:$0xff] %vm1475_vm1, %v1472_v42  ;;  %v1471_v31 = vmax.f32 %v1393_v25, 0.0  ;;  %v943_v19 = vadd.f32 %v2212_v61, %v942_v34  ;;  %v1408_v36 = vadd.f32 %v2104_v20, %v1023_v43 }
 0x1ce   : > { %v944_v35 = vpop.f32.mrf.mxu0  ;;  %v1402_v38 = vpop.f32.mrf.mxu1 }
 0x1cf   : > { %v1624_v30 = vld [vmem:[#allocation2 + $0x160] sm:$0xff]  ;;  %1522 = vst.msk [vmem:[#allocation2 + $0x170] sm:$0xff] %vm1475_vm1, %v1457_v2  ;;  %1536 = vst.msk [vmem:[#allocation2 + $0x1e0] sm:$0xff] %vm1475_vm1, %v1471_v31  ;;  %v1328_v27 = vadd.f32 %v2985_v7, %v943_v19  ;;  %v1474_v1 = vmax.f32 %v1408_v36, 0.0  ;;  %v1403_v10 = vadd.f32 %v1402_v38, %v1018_v62 }
 0x1d0   : > { %v1628_v40 = vmax.f32 %v1620_v39, %v1624_v30  ;;  %v1652_v51 = vld [vmem:[#allocation2 + $0x1c0] sm:$0xff] }
 0x1d1   : > { %v1692_v50 = vld [vmem:[#allocation3 + $0xc0] ss:$2 sm:$0xff]  ;;  %v1724_v11 = vld [vmem:[#allocation3 + $0xc1] ss:$2 sm:$0xff]  ;;  %v1458_v48 = vmax.f32 %v1328_v27, 0.0  ;;  %1539 = vst.msk [vmem:[#allocation2 + $0x1f8] sm:$0xff] %vm1475_vm1, %v1474_v1 }
 0x1d2   : > { %v1743_v44 = vmax.f32 %v1692_v50, %v1724_v11  ;;  %1632 = vst.msk [vmem:[#allocation3 + $0xa0] sm:$0xff] %vm1475_vm1, %v1628_v40  ;;  %v1473_v6 = vmax.f32 %v1403_v10, 0.0  ;;  %v1655_v47 = vld [vmem:[#allocation2 + $0x1d8] sm:$0xff]  ;;  %v1654_v18 = vld [vmem:[#allocation2 + $0x1d0] sm:$0xff] }
 0x1d3   : > { %v1625_v52 = vld [vmem:[#allocation2 + $0x168] sm:$0xff]  ;;  %1523 = vst.msk [vmem:[#allocation2 + $0x178] sm:$0xff] %vm1475_vm1, %v1458_v48 }
 0x1d4   : > { %1759 = vst.msk [vmem:[%s2889_s26 + $0x60] sm:$0xff] %vm1475_vm1, %v1743_v44  ;;  %1538 = vst.msk [vmem:[#allocation2 + $0x1f0] sm:$0xff] %vm1475_vm1, %v1473_v6  ;;  %v1694_v7 = vld [vmem:[#allocation3 + $0xd0] ss:$2 sm:$0xff]  ;;  %v1726_v9 = vld [vmem:[#allocation3 + $0xd1] ss:$2 sm:$0xff]  ;;  %v1629_v33 = vmax.f32 %v1621_v21, %v1625_v52 }
 0x1d5   : > { %v1657_v55 = vld [vmem:[#allocation2 + $0x1e8] sm:$0xff]  ;;  %v1744_v0 = vmax.f32 %v1694_v7, %v1726_v9 }
 0x1d6   : > { %v1661_v59 = vmax.f32 %v1653_v3, %v1657_v55  ;;  %1633 = vst.msk [vmem:[#allocation3 + $0xa8] sm:$0xff] %vm1475_vm1, %v1629_v33  ;;  %v1626_v41 = vld [vmem:[#allocation2 + $0x170] sm:$0xff]  ;;  %v1656_v5 = vld [vmem:[#allocation2 + $0x1e0] sm:$0xff] }
 0x1d7   : > { %1760 = vst.msk [vmem:[%s2889_s26 + $0x68] sm:$0xff] %vm1475_vm1, %v1744_v0  ;;  %v1630_v29 = vmax.f32 %v1622_v46, %v1626_v41  ;;  %v1660_v58 = vmax.f32 %v1652_v51, %v1656_v5 }
 0x1d8   : > { %1665 = vst.msk [vmem:[#allocation3 + $0xe8] sm:$0xff] %vm1475_vm1, %v1661_v59  ;;  %v1659_v14 = vld [vmem:[#allocation2 + $0x1f8] sm:$0xff] }
 0x1d9   : > { %1634 = vst.msk [vmem:[#allocation3 + $0xb0] sm:$0xff] %vm1475_vm1, %v1630_v29  ;;  %1664 = vst.msk [vmem:[#allocation3 + $0xe0] sm:$0xff] %vm1475_vm1, %v1660_v58  ;;  %v1663_v60 = vmax.f32 %v1655_v47, %v1659_v14 }
 0x1da   : > { %v1627_v49 = vld [vmem:[#allocation2 + $0x178] sm:$0xff] }
 0x1db   : > { %v1658_v8 = vld [vmem:[#allocation2 + $0x1f0] sm:$0xff]  ;;  %v1631_v37 = vmax.f32 %v1623_v4, %v1627_v49  ;;  %1667 = vst.msk [vmem:[#allocation3 + $0xf8] sm:$0xff] %vm1475_vm1, %v1663_v60 }
 0x1dc   : > { %v1662_v32 = vmax.f32 %v1654_v18, %v1658_v8 }
 0x1dd   : > { %v1688_v17 = vld [vmem:[#allocation3 + $0xa0] ss:$2 sm:$0xff]  ;;  %v1720_v54 = vld [vmem:[#allocation3 + $0xa1] ss:$2 sm:$0xff]  ;;  %1635 = vst.msk [vmem:[#allocation3 + $0xb8] sm:$0xff] %vm1475_vm1, %v1631_v37 }
 0x1de   : > { %1666 = vst.msk [vmem:[#allocation3 + $0xf0] sm:$0xff] %vm1475_vm1, %v1662_v32  ;;  %v1741_v12 = vmax.f32 %v1688_v17, %v1720_v54 }
 0x1e0   : > { %1757 = vst.msk [vmem:[%s2889_s26 + $0x50] sm:$0xff] %vm1475_vm1, %v1741_v12  ;;  %v1696_v15 = vld [vmem:[#allocation3 + $0xe0] ss:$2 sm:$0xff]  ;;  %v1728_v26 = vld [vmem:[#allocation3 + $0xe1] ss:$2 sm:$0xff] }
 0x1e1   : > { %v1745_v45 = vmax.f32 %v1696_v15, %v1728_v26 }
 0x1e3   : > { %1761 = vst.msk [vmem:[%s2889_s26 + $0x70] sm:$0xff] %vm1475_vm1, %v1745_v45 }
 0x1e4   : > { %v1690_v16 = vld [vmem:[#allocation3 + $0xb0] ss:$2 sm:$0xff]  ;;  %v1722_v13 = vld [vmem:[#allocation3 + $0xb1] ss:$2 sm:$0xff] }
 0x1e5   : > { %v1698_v43 = vld [vmem:[#allocation3 + $0xf0] ss:$2 sm:$0xff]  ;;  %v1742_v23 = vmax.f32 %v1690_v16, %v1722_v13  ;;  %v1730_v57 = vld [vmem:[#allocation3 + $0xf1] ss:$2 sm:$0xff] }
 0x1e6   : > { %v1746_v63 = vmax.f32 %v1698_v43, %v1730_v57 }
 0x1e7   : > { %1758 = vst.msk [vmem:[%s2889_s26 + $0x58] sm:$0xff] %vm1475_vm1, %v1742_v23 }
 0x1e8   : > { %1762 = vst.msk [vmem:[%s2889_s26 + $0x78] sm:$0xff] %vm1475_vm1, %v1746_v63 }
 0x1e9 PF: > { %s13_s16 = sadd.s32 1, %s2251_s16   ;;  %s3117_s12 = smov %s2243_s14 }
 0x1ea   : > { %p10_p8 = scmp.ge.s32.totalorder %s13_s16, 6   ;;  %s3118_s13 = smov %s2247_s15 }
 0x1eb   : > { %s3119_s14 = smov %s3122_s17  ;;  %s3120_s15 = smov %s3126_s18 }
 0x1ec   :  { %12 = sbr.rel (!%p10_p8) target bundleno = 3 (0x3), region = 93 }

// kernel: anime_cnn_forward.5
= control target key start
LH: loop header
LB: loop body
LE: loop exit
PB: predicated region body
PF: predicated region fallthrough
CT: control target
= control target key end

     0   :  { %10 = vsyncpa [#allocation4], 0  ;;  %s1842_s18 = smov 0   ;;  %s1844_s19 = smov 0   ;;  %s2227_s0 = inlined_call_operand.vmem [shape: f32[2,16384], index: 0, kind: input, shape index: {}]   ;;  %s2228_s1 = inlined_call_operand.vmem [shape: f32[16384,128], index: 1, kind: input, shape index: {}]   ;;  %s2229_s2 = inlined_call_operand.vmem [shape: f32[1,128], index: 2, kind: input, shape index: {}]   ;;  %s2230_s3 = inlined_call_operand.vmem [shape: f32[128,2], index: 3, kind: input, shape index: {}]   ;;  %s2231_s4 = inlined_call_operand.vmem [shape: f32[1,2], index: 4, kind: input, shape index: {}]   ;;  %s2232_s5 = inlined_call_operand.hbm [shape: f32[2,2], index: 5, kind: output, shape index: {}]  }
   0x1   :  { %s1846_s20 = smov 0  }
   0x2 LB: > { %s1368_s21 = sadd.s32 4294967295, %s1805_s20   ;;  %s25_s22 = sadd.s32 1, %s1801_s19  ;;  %s1805_s20 = sphi %s1846_s20, %s16_s20   ;;  %s1801_s19 = sphi %s1844_s19, %s2235_s19   ;;  %s1797_s18 = sphi %s1842_s18, %s2234_s18  }
   0x3   : > { %p26_p0 = scmp.ge.s32.totalorder %s25_s22, 8  ;;  %p1371_p1 = scmp.ge.s32.totalorder %s1805_s20, 1 }
   0x4   : > { %p218_p2 = scmp.lt.s32.totalorder %s1805_s20, 9 }
   0x5   : > { %s2237_s22 = smov (%p26_p0, %s25_s22), 0 }
   0x6   : > { %p219_p3 = pnand %p1371_p1, %p218_p2 }
   0x7   : > { %s1372_s23 = sshll.u32 (!%p219_p3), %s1797_s18, 4  ;;  %s1374_s24 = sshll.u32 (!%p219_p3), %s1797_s18, 8 }
   0x8   : > { %222 = sbr.rel (%p219_p3) target bundleno = 608 (0x260), region = 40  ;;  %p253_p4 = scmp.lt.s32.totalorder (!%p219_p3), %s1372_s23, 127 }
   0x9   : > { %p261_p5 = scmp.lt.s32.totalorder (!%p219_p3), %s1374_s24, 2047  ;;  %p1376_p6 = scmp.ne.s32.totalorder (!%p219_p3), %s1797_s18, 0 }
   0xd   : > { %s2239_s23 = smov (!%p253_p4, %s1372_s23), 127  ;;  %s2241_s24 = smov (!%p261_p5, %s1374_s24), 2047 }
   0xe   : > { %s1373_s25 = sshll.u32 %s2239_s23, 1  ;;  %s1375_s29 = sshll.u32 %s2241_s24, 3 }
   0xf   : > { %s1868_s28 = scalar_lea.vmem %s2227_s0, %s1373_s25  ;;  %s1873_s7 = scalar_lea.vmem %s2228_s1, %s1375_s29 }
  0x10   : > { %269 = sbr.rel (%p1376_p6) target bundleno = 23 (0x17), region = 44 }
  0x15   : > { %v1807_v0 = vmov 0.0  }
  0x16   : > { %270 = vst [vmem:[#allocation2] sm:$0x3] %v1807_v0 }
  0x17 PF: > { %v307_v1 = vld [vmem:[%s1873_s7 + $0xf8] sm:$0xff]  ;;  %v306_v5 = vld [vmem:[%s1873_s7 + $0xf0] sm:$0xff]  ;;  %v305_v9 = vld [vmem:[%s1873_s7 + $0xe8] sm:$0xff]  ;;  %v1808_v31 = vmov 1983009808   ;;  %v540_v33 = vlaneseq  ;;  %p1377_p7 = scmp.ne.s32.totalorder %s1797_s18, 7 }
  0x18   : > { %v339_v2 = vld [vmem:[%s1873_s7 + $0x1f8] sm:$0xff]  ;;  %1384 = vmatprep.subr.mxu0 %v307_v1  ;;  %v338_v6 = vld [vmem:[%s1873_s7 + $0x1f0] sm:$0xff]  ;;  %v337_v10 = vld [vmem:[%s1873_s7 + $0x1e8] sm:$0xff]  ;;  %v538_v32 = vunpack.c.l.s4 %v1808_v31 }
  0x19   : > { %v291_v3 = vld [vmem:[%s1873_s7 + $0x78] sm:$0xff]  ;;  %1419 = vmatprep.subr.mxu1 %v339_v2  ;;  %v290_v7 = vld [vmem:[%s1873_s7 + $0x70] sm:$0xff]  ;;  %v289_v11 = vld [vmem:[%s1873_s7 + $0x68] sm:$0xff]  ;;  %v541_v43 = vshrl.u32 %v540_v33, 7 }
  0x1a   : > { %v323_v4 = vld [vmem:[%s1873_s7 + $0x178] sm:$0xff]  ;;  %1385 = vmatpush3.msra.mxu0 %v291_v3  ;;  %v322_v8 = vld [vmem:[%s1873_s7 + $0x170] sm:$0xff]  ;;  %v321_v12 = vld [vmem:[%s1873_s7 + $0x168] sm:$0xff]  ;;  %v539_v42 = vunpack.c.0.s8 %v538_v32 }
  0x1b   : > { %1420 = vmatpush3.msra.mxu1 %v323_v4  ;;  %1386 = vmatprep.subr.mxu0 %v306_v5  ;;  %v304_v13 = vld [vmem:[%s1873_s7 + $0xe0] sm:$0xff]  ;;  %v303_v17 = vld [vmem:[%s1873_s7 + $0xd8] sm:$0xff]  ;;  %v302_v21 = vld [vmem:[%s1873_s7 + $0xd0] sm:$0xff] }
  0x1c   : > { %1421 = vmatprep.subr.mxu1 %v338_v6  ;;  %1387 = vmatpush3.msra.mxu0 %v290_v7  ;;  %v336_v14 = vld [vmem:[%s1873_s7 + $0x1e0] sm:$0xff]  ;;  %v335_v18 = vld [vmem:[%s1873_s7 + $0x1d8] sm:$0xff]  ;;  %v334_v22 = vld [vmem:[%s1873_s7 + $0x1d0] sm:$0xff]  ;;  %v1922_v52 = vsub.s32 %v539_v42, %v541_v43 }
  0x1d   : > { %1422 = vmatpush3.msra.mxu1 %v322_v8  ;;  %1388 = vmatprep.subr.mxu0 %v305_v9  ;;  %v288_v15 = vld [vmem:[%s1873_s7 + $0x60] sm:$0xff]  ;;  %v287_v19 = vld [vmem:[%s1873_s7 + $0x58] sm:$0xff]  ;;  %v286_v23 = vld [vmem:[%s1873_s7 + $0x50] sm:$0xff] }
  0x1e   : > { %1423 = vmatprep.subr.mxu1 %v337_v10  ;;  %v320_v16 = vld [vmem:[%s1873_s7 + $0x160] sm:$0xff]  ;;  %1389 = vmatpush3.msra.mxu0 %v289_v11  ;;  %v319_v20 = vld [vmem:[%s1873_s7 + $0x158] sm:$0xff]  ;;  %v318_v24 = vld [vmem:[%s1873_s7 + $0x150] sm:$0xff] }
  0x1f   : > { %1424 = vmatpush3.msra.mxu1 %v321_v12  ;;  %1390 = vmatprep.subr.mxu0 %v304_v13  ;;  %v301_v25 = vld [vmem:[%s1873_s7 + $0xc8] sm:$0xff]  ;;  %v300_v29 = vld [vmem:[%s1873_s7 + $0xc0] sm:$0xff]  ;;  %v299_v36 = vld [vmem:[%s1873_s7 + $0xb8] sm:$0xff] }
  0x20   : > { %1425 = vmatprep.subr.mxu1 %v336_v14  ;;  %1391 = vmatpush3.msra.mxu0 %v288_v15  ;;  %v333_v26 = vld [vmem:[%s1873_s7 + $0x1c8] sm:$0xff]  ;;  %v332_v30 = vld [vmem:[%s1873_s7 + $0x1c0] sm:$0xff]  ;;  %v331_v37 = vld [vmem:[%s1873_s7 + $0x1b8] sm:$0xff] }
  0x21   : > { %1426 = vmatpush3.msra.mxu1 %v320_v16  ;;  %1392 = vmatprep.subr.mxu0 %v303_v17  ;;  %v285_v27 = vld [vmem:[%s1873_s7 + $0x48] sm:$0xff]  ;;  %v284_v34 = vld [vmem:[%s1873_s7 + $0x40] sm:$0xff]  ;;  %v283_v38 = vld [vmem:[%s1873_s7 + $0x38] sm:$0xff] }
  0x22   : > { %1427 = vmatprep.subr.mxu1 %v335_v18  ;;  %1393 = vmatpush3.msra.mxu0 %v287_v19  ;;  %v317_v28 = vld [vmem:[%s1873_s7 + $0x148] sm:$0xff]  ;;  %v316_v35 = vld [vmem:[%s1873_s7 + $0x140] sm:$0xff]  ;;  %v315_v39 = vld [vmem:[%s1873_s7 + $0x138] sm:$0xff] }
  0x23   : > { %1428 = vmatpush3.msra.mxu1 %v319_v20  ;;  %1394 = vmatprep.subr.mxu0 %v302_v21  ;;  %v298_v40 = vld [vmem:[%s1873_s7 + $0xb0] sm:$0xff]  ;;  %v297_v46 = vld [vmem:[%s1873_s7 + $0xa8] sm:$0xff]  ;;  %v296_v50 = vld [vmem:[%s1873_s7 + $0xa0] sm:$0xff] }
  0x24   : > { %1429 = vmatprep.subr.mxu1 %v334_v22  ;;  %1395 = vmatpush3.msra.mxu0 %v286_v23  ;;  %v330_v41 = vld [vmem:[%s1873_s7 + $0x1b0] sm:$0xff]  ;;  %v329_v47 = vld [vmem:[%s1873_s7 + $0x1a8] sm:$0xff]  ;;  %v328_v51 = vld [vmem:[%s1873_s7 + $0x1a0] sm:$0xff] }
  0x25   : > { %1430 = vmatpush3.msra.mxu1 %v318_v24  ;;  %1396 = vmatprep.subr.mxu0 %v301_v25  ;;  %v282_v44 = vld [vmem:[%s1873_s7 + $0x30] sm:$0xff]  ;;  %v281_v48 = vld [vmem:[%s1873_s7 + $0x28] sm:$0xff]  ;;  %v280_v53 = vld [vmem:[%s1873_s7 + $0x20] sm:$0xff] }
  0x26   : > { %1431 = vmatprep.subr.mxu1 %v333_v26  ;;  %1397 = vmatpush3.msra.mxu0 %v285_v27  ;;  %v314_v45 = vld [vmem:[%s1873_s7 + $0x130] sm:$0xff]  ;;  %v313_v49 = vld [vmem:[%s1873_s7 + $0x128] sm:$0xff]  ;;  %v312_v54 = vld [vmem:[%s1873_s7 + $0x120] sm:$0xff] }
  0x27   : > { %1432 = vmatpush3.msra.mxu1 %v317_v28  ;;  %1398 = vmatprep.subr.mxu0 %v300_v29  ;;  %v272_v55 = vld [vmem:[%s1868_s28] sm:$0xff]  ;;  %v295_v56 = vld [vmem:[%s1873_s7 + $0x98] sm:$0xff]  ;;  %v294_v61 = vld [vmem:[%s1873_s7 + $0x90] sm:$0xff] }
  0x28   : > { %1433 = vmatprep.subr.mxu1 %v332_v30  ;;  %1399 = vmatpush3.msra.mxu0 %v284_v34  ;;  %v327_v57 = vld [vmem:[%s1873_s7 + $0x198] sm:$0xff]  ;;  %v536_v58 = vcombine.high %v272_v55, %v272_v55  ;;  %v326_v62 = vld [vmem:[%s1873_s7 + $0x190] sm:$0xff]  ;;  %v543_v63 = vrot.slane %v272_v55, %v1922_v52  ;;  %v293_v3 = vld [vmem:[%s1873_s7 + $0x88] sm:$0xff] }
  0x29   : > { %1434 = vmatpush3.msra.mxu1 %v316_v35  ;;  %1400 = vmatprep.subr.mxu0 %v299_v36  ;;  %v279_v59 = vld [vmem:[%s1873_s7 + $0x18] sm:$0xff]  ;;  %v278_v0 = vld [vmem:[%s1873_s7 + $0x10] sm:$0xff]  ;;  %v325_v4 = vld [vmem:[%s1873_s7 + $0x188] sm:$0xff] }
  0x2a   : > { %1435 = vmatprep.subr.mxu1 %v331_v37  ;;  %1401 = vmatpush3.msra.mxu0 %v283_v38  ;;  %v311_v60 = vld [vmem:[%s1873_s7 + $0x118] sm:$0xff]  ;;  %v310_v1 = vld [vmem:[%s1873_s7 + $0x110] sm:$0xff]  ;;  %v550_v2 = vrot.slane %v536_v58, %v1922_v52  ;;  %v277_v5 = vld [vmem:[%s1873_s7 + $0x8] sm:$0xff]  ;;  %v551_v9 = vcombine.high %v543_v63, %v543_v63 }
  0x2b   : > { %1436 = vmatpush3.msra.mxu1 %v315_v39  ;;  %1402 = vmatprep.subr.mxu0 %v298_v40  ;;  %v309_v6 = vld [vmem:[%s1873_s7 + $0x108] sm:$0xff]  ;;  %v292_v7 = vld [vmem:[%s1873_s7 + $0x80] sm:$0xff]  ;;  %v371_v13 = vld [vmem:[%s1873_s7 + $0x2f8] sm:$0xff] }
  0x2c   : > { %1437 = vmatprep.subr.mxu1 %v330_v41  ;;  %1403 = vmatpush3.msra.mxu0 %v282_v44  ;;  %v324_v8 = vld [vmem:[%s1873_s7 + $0x180] sm:$0xff]  ;;  %v552_v11 = vcombine.high %v550_v2, %v550_v2  ;;  %v403_v14 = vld [vmem:[%s1873_s7 + $0x3f8] sm:$0xff]  ;;  %v370_v17 = vld [vmem:[%s1873_s7 + $0x2f0] sm:$0xff] }
  0x2d   : > { %1438 = vmatpush3.msra.mxu1 %v314_v45  ;;  %1404 = vmatprep.subr.mxu0 %v297_v46  ;;  %v276_v10 = vld [vmem:[%s1873_s7] sm:$0xff]  ;;  %v355_v15 = vld [vmem:[%s1873_s7 + $0x278] sm:$0xff]  ;;  %v402_v18 = vld [vmem:[%s1873_s7 + $0x3f0] sm:$0xff] }
  0x2e   : > { %1439 = vmatprep.subr.mxu1 %v329_v47  ;;  %1405 = vmatpush3.msra.mxu0 %v281_v48  ;;  %v308_v12 = vld [vmem:[%s1873_s7 + $0x100] sm:$0xff]  ;;  %v387_v16 = vld [vmem:[%s1873_s7 + $0x378] sm:$0xff]  ;;  %v354_v19 = vld [vmem:[%s1873_s7 + $0x270] sm:$0xff] }
  0x2f   : > { %1440 = vmatpush3.msra.mxu1 %v313_v49  ;;  %1406 = vmatprep.subr.mxu0 %v296_v50  ;;  %v386_v20 = vld [vmem:[%s1873_s7 + $0x370] sm:$0xff]  ;;  %v369_v21 = vld [vmem:[%s1873_s7 + $0x2e8] sm:$0xff]  ;;  %v368_v25 = vld [vmem:[%s1873_s7 + $0x2e0] sm:$0xff] }
  0x30   : > { %1441 = vmatprep.subr.mxu1 %v328_v51  ;;  %1407 = vmatpush3.msra.mxu0 %v280_v53  ;;  %v401_v22 = vld [vmem:[%s1873_s7 + $0x3e8] sm:$0xff]  ;;  %v400_v26 = vld [vmem:[%s1873_s7 + $0x3e0] sm:$0xff]  ;;  %v367_v29 = vld [vmem:[%s1873_s7 + $0x2d8] sm:$0xff] }
  0x31   : > { %1442 = vmatpush3.msra.mxu1 %v312_v54  ;;  %1408 = vmatprep.subr.mxu0 %v295_v56  ;;  %v353_v23 = vld [vmem:[%s1873_s7 + $0x268] sm:$0xff]  ;;  %v352_v27 = vld [vmem:[%s1873_s7 + $0x260] sm:$0xff]  ;;  %v399_v30 = vld [vmem:[%s1873_s7 + $0x3d8] sm:$0xff] }
  0x32   : > { %1443 = vmatprep.subr.mxu1 %v327_v57  ;;  %1409 = vmatpush3.msra.mxu0 %v279_v59  ;;  %v385_v24 = vld [vmem:[%s1873_s7 + $0x368] sm:$0xff]  ;;  %v384_v28 = vld [vmem:[%s1873_s7 + $0x360] sm:$0xff]  ;;  %v351_v31 = vld [vmem:[%s1873_s7 + $0x258] sm:$0xff] }
  0x33   : > { %1444 = vmatpush3.msra.mxu1 %v311_v60  ;;  %1410 = vmatprep.subr.mxu0 %v294_v61  ;;  %v383_v32 = vld [vmem:[%s1873_s7 + $0x358] sm:$0xff]  ;;  %v366_v33 = vld [vmem:[%s1873_s7 + $0x2d0] sm:$0xff]  ;;  %v365_v37 = vld [vmem:[%s1873_s7 + $0x2c8] sm:$0xff] }
  0x34   : > { %1445 = vmatprep.subr.mxu1 %v326_v62  ;;  %1411 = vmatpush3.msra.mxu0 %v278_v0  ;;  %v398_v34 = vld [vmem:[%s1873_s7 + $0x3d0] sm:$0xff]  ;;  %v397_v38 = vld [vmem:[%s1873_s7 + $0x3c8] sm:$0xff]  ;;  %v364_v41 = vld [vmem:[%s1873_s7 + $0x2c0] sm:$0xff] }
  0x35   : > { %1446 = vmatpush3.msra.mxu1 %v310_v1  ;;  %1412 = vmatprep.subr.mxu0 %v293_v3  ;;  %v350_v35 = vld [vmem:[%s1873_s7 + $0x250] sm:$0xff]  ;;  %v349_v39 = vld [vmem:[%s1873_s7 + $0x248] sm:$0xff]  ;;  %v396_v42 = vld [vmem:[%s1873_s7 + $0x3c0] sm:$0xff] }
  0x36   : > { %1447 = vmatprep.subr.mxu1 %v325_v4  ;;  %1413 = vmatpush3.msra.mxu0 %v277_v5  ;;  %v382_v36 = vld [vmem:[%s1873_s7 + $0x350] sm:$0xff]  ;;  %v381_v40 = vld [vmem:[%s1873_s7 + $0x348] sm:$0xff]  ;;  %v348_v43 = vld [vmem:[%s1873_s7 + $0x240] sm:$0xff] }
  0x37   : > { %1448 = vmatpush3.msra.mxu1 %v309_v6  ;;  %1414 = vmatprep.subr.mxu0 %v292_v7  ;;  %v380_v44 = vld [vmem:[%s1873_s7 + $0x340] sm:$0xff]  ;;  %v363_v45 = vld [vmem:[%s1873_s7 + $0x2b8] sm:$0xff]  ;;  %v362_v49 = vld [vmem:[%s1873_s7 + $0x2b0] sm:$0xff] }
  0x38   : > { %1449 = vmatprep.subr.mxu1 %v324_v8  ;;  %1415 = vmatpush3.msra.mxu0 %v276_v10  ;;  %v395_v46 = vld [vmem:[%s1873_s7 + $0x3b8] sm:$0xff]  ;;  %v394_v50 = vld [vmem:[%s1873_s7 + $0x3b0] sm:$0xff]  ;;  %v361_v54 = vld [vmem:[%s1873_s7 + $0x2a8] sm:$0xff] }
  0x39   : > { %684 = vmatprep.mubr.f32.mxu0 %v551_v9  ;;  %1450 = vmatpush3.msra.mxu1 %v308_v12  ;;  %v347_v47 = vld [vmem:[%s1873_s7 + $0x238] sm:$0xff]  ;;  %v346_v51 = vld [vmem:[%s1873_s7 + $0x230] sm:$0xff]  ;;  %v393_v55 = vld [vmem:[%s1873_s7 + $0x3a8] sm:$0xff] }
  0x3a   : > { %754 = vmatprep.mubr.f32.mxu1 %v552_v11  ;;  %685 = vmatmul.mubr.f32.vlgmr.msra.gmra.mxu0 %v543_v63  ;;  %v379_v48 = vld [vmem:[%s1873_s7 + $0x338] sm:$0xff]  ;;  %v378_v53 = vld [vmem:[%s1873_s7 + $0x330] sm:$0xff]  ;;  %v345_v56 = vld [vmem:[%s1873_s7 + $0x228] sm:$0xff] }
  0x3b   : > { %755 = vmatmul.mubr.f32.vlgmr.msra.gmra.mxu1 %v550_v2  ;;  %1454 = vmatprep.subr.mxu0 %v371_v13  ;;  %v377_v57 = vld [vmem:[%s1873_s7 + $0x328] sm:$0xff]  ;;  %v360_v59 = vld [vmem:[%s1873_s7 + $0x2a0] sm:$0xff]  ;;  %v359_v63 = vld [vmem:[%s1873_s7 + $0x298] sm:$0xff] }
  0x3c   : > { %1489 = vmatprep.subr.mxu1 %v403_v14  ;;  %1455 = vmatpush3.msra.mxu0 %v355_v15  ;;  %v273_v58 = vld [vmem:[%s1868_s28 + $0x8] sm:$0xff]  ;;  %v392_v60 = vld [vmem:[%s1873_s7 + $0x3a0] sm:$0xff]  ;;  %v391_v0 = vld [vmem:[%s1873_s7 + $0x398] sm:$0xff] }
  0x3d   : > { %1490 = vmatpush3.msra.mxu1 %v387_v16  ;;  %1456 = vmatprep.subr.mxu0 %v370_v17  ;;  %v344_v61 = vld [vmem:[%s1873_s7 + $0x220] sm:$0xff]  ;;  %v553_v1 = vcombine.high %v273_v58, %v273_v58  ;;  %v343_v2 = vld [vmem:[%s1873_s7 + $0x218] sm:$0xff]  ;;  %v358_v4 = vld [vmem:[%s1873_s7 + $0x290] sm:$0xff]  ;;  %v560_v6 = vrot.slane %v273_v58, %v1922_v52 }
  0x3e   : > { %1491 = vmatprep.subr.mxu1 %v402_v18  ;;  %1457 = vmatpush3.msra.mxu0 %v354_v19  ;;  %v376_v62 = vld [vmem:[%s1873_s7 + $0x320] sm:$0xff]  ;;  %v375_v3 = vld [vmem:[%s1873_s7 + $0x318] sm:$0xff]  ;;  %v390_v5 = vld [vmem:[%s1873_s7 + $0x390] sm:$0xff] }
  0x3f   : > { %1492 = vmatpush3.msra.mxu1 %v386_v20  ;;  %1458 = vmatprep.subr.mxu0 %v369_v21  ;;  %v342_v7 = vld [vmem:[%s1873_s7 + $0x210] sm:$0xff]  ;;  %v357_v9 = vld [vmem:[%s1873_s7 + $0x288] sm:$0xff]  ;;  %v567_v11 = vrot.slane %v553_v1, %v1922_v52  ;;  %v356_v14 = vld [vmem:[%s1873_s7 + $0x280] sm:$0xff]  ;;  %v568_v16 = vcombine.high %v560_v6, %v560_v6 }
  0x40   : > { %1493 = vmatprep.subr.mxu1 %v401_v22  ;;  %1459 = vmatpush3.msra.mxu0 %v353_v23  ;;  %v374_v8 = vld [vmem:[%s1873_s7 + $0x310] sm:$0xff]  ;;  %v389_v10 = vld [vmem:[%s1873_s7 + $0x388] sm:$0xff]  ;;  %v388_v15 = vld [vmem:[%s1873_s7 + $0x380] sm:$0xff] }
  0x41   : > { %1494 = vmatpush3.msra.mxu1 %v385_v24  ;;  %1460 = vmatprep.subr.mxu0 %v368_v25  ;;  %v341_v12 = vld [vmem:[%s1873_s7 + $0x208] sm:$0xff]  ;;  %v340_v17 = vld [vmem:[%s1873_s7 + $0x200] sm:$0xff]  ;;  %v569_v19 = vcombine.high %v567_v11, %v567_v11  ;;  %v435_v20 = vld [vmem:[%s1873_s7 + $0x4f8] sm:$0xff] }
  0x42   : > { %1495 = vmatprep.subr.mxu1 %v400_v26  ;;  %1461 = vmatpush3.msra.mxu0 %v352_v27  ;;  %v373_v13 = vld [vmem:[%s1873_s7 + $0x308] sm:$0xff]  ;;  %v372_v18 = vld [vmem:[%s1873_s7 + $0x300] sm:$0xff]  ;;  %v467_v21 = vld [vmem:[%s1873_s7 + $0x5f8] sm:$0xff] }
  0x43   : > { %1496 = vmatpush3.msra.mxu1 %v384_v28  ;;  %1462 = vmatprep.subr.mxu0 %v367_v29  ;;  %v419_v22 = vld [vmem:[%s1873_s7 + $0x478] sm:$0xff]  ;;  %v434_v24 = vld [vmem:[%s1873_s7 + $0x4f0] sm:$0xff]  ;;  %v433_v28 = vld [vmem:[%s1873_s7 + $0x4e8] sm:$0xff] }
  0x44   : > { %1497 = vmatprep.subr.mxu1 %v399_v30  ;;  %1463 = vmatpush3.msra.mxu0 %v351_v31  ;;  %v451_v23 = vld [vmem:[%s1873_s7 + $0x578] sm:$0xff]  ;;  %v466_v25 = vld [vmem:[%s1873_s7 + $0x5f0] sm:$0xff]  ;;  %v465_v29 = vld [vmem:[%s1873_s7 + $0x5e8] sm:$0xff] }
  0x45   : > { %1498 = vmatpush3.msra.mxu1 %v383_v32  ;;  %1464 = vmatprep.subr.mxu0 %v366_v33  ;;  %v418_v26 = vld [vmem:[%s1873_s7 + $0x470] sm:$0xff]  ;;  %v417_v30 = vld [vmem:[%s1873_s7 + $0x468] sm:$0xff]  ;;  %v432_v32 = vld [vmem:[%s1873_s7 + $0x4e0] sm:$0xff] }
  0x46   : > { %1499 = vmatprep.subr.mxu1 %v398_v34  ;;  %1465 = vmatpush3.msra.mxu0 %v350_v35  ;;  %v450_v27 = vld [vmem:[%s1873_s7 + $0x570] sm:$0xff]  ;;  %v449_v31 = vld [vmem:[%s1873_s7 + $0x568] sm:$0xff]  ;;  %v464_v33 = vld [vmem:[%s1873_s7 + $0x5e0] sm:$0xff] }
  0x47   : > { %1500 = vmatpush3.msra.mxu1 %v382_v36  ;;  %1466 = vmatprep.subr.mxu0 %v365_v37  ;;  %v416_v34 = vld [vmem:[%s1873_s7 + $0x460] sm:$0xff]  ;;  %v431_v36 = vld [vmem:[%s1873_s7 + $0x4d8] sm:$0xff]  ;;  %v458_v58 = vld [vmem:[%s1873_s7 + $0x5b0] sm:$0xff] }
  0x48   : > { %1501 = vmatprep.subr.mxu1 %v397_v38  ;;  %1467 = vmatpush3.msra.mxu0 %v349_v39  ;;  %v448_v35 = vld [vmem:[%s1873_s7 + $0x560] sm:$0xff]  ;;  %v463_v37 = vld [vmem:[%s1873_s7 + $0x5d8] sm:$0xff]  ;;  %v274_v1 = vld [vmem:[%s1868_s28 + $0x10] sm:$0xff] }
  0x49   : > { %1502 = vmatpush3.msra.mxu1 %v381_v40  ;;  %1468 = vmatprep.subr.mxu0 %v364_v41  ;;  %v415_v38 = vld [vmem:[%s1873_s7 + $0x458] sm:$0xff]  ;;  %v430_v40 = vld [vmem:[%s1873_s7 + $0x4d0] sm:$0xff] }
  0x4a   : > { %1503 = vmatprep.subr.mxu1 %v396_v42  ;;  %1469 = vmatpush3.msra.mxu0 %v348_v43  ;;  %v447_v39 = vld [vmem:[%s1873_s7 + $0x558] sm:$0xff]  ;;  %v462_v41 = vld [vmem:[%s1873_s7 + $0x5d0] sm:$0xff] }
  0x4b   : > { %1504 = vmatpush3.msra.mxu1 %v380_v44  ;;  %1470 = vmatprep.subr.mxu0 %v363_v45  ;;  %v414_v42 = vld [vmem:[%s1873_s7 + $0x450] sm:$0xff]  ;;  %v429_v44 = vld [vmem:[%s1873_s7 + $0x4c8] sm:$0xff] }
  0x4c   : > { %1505 = vmatprep.subr.mxu1 %v395_v46  ;;  %1471 = vmatpush3.msra.mxu0 %v347_v47  ;;  %v446_v43 = vld [vmem:[%s1873_s7 + $0x550] sm:$0xff]  ;;  %v461_v45 = vld [vmem:[%s1873_s7 + $0x5c8] sm:$0xff] }
  0x4d   : > { %1506 = vmatpush3.msra.mxu1 %v379_v48  ;;  %1472 = vmatprep.subr.mxu0 %v362_v49  ;;  %v413_v46 = vld [vmem:[%s1873_s7 + $0x448] sm:$0xff]  ;;  %v428_v48 = vld [vmem:[%s1873_s7 + $0x4c0] sm:$0xff] }
  0x4e   : > { %1507 = vmatprep.subr.mxu1 %v394_v50  ;;  %1473 = vmatpush3.msra.mxu0 %v346_v51  ;;  %v445_v47 = vld [vmem:[%s1873_s7 + $0x548] sm:$0xff]  ;;  %v460_v49 = vld [vmem:[%s1873_s7 + $0x5c0] sm:$0xff] }
  0x4f   : > { %1508 = vmatpush3.msra.mxu1 %v378_v53  ;;  %1474 = vmatprep.subr.mxu0 %v361_v54  ;;  %v412_v50 = vld [vmem:[%s1873_s7 + $0x440] sm:$0xff]  ;;  %v427_v53 = vld [vmem:[%s1873_s7 + $0x4b8] sm:$0xff] }
  0x50   : > { %1509 = vmatprep.subr.mxu1 %v393_v55  ;;  %1475 = vmatpush3.msra.mxu0 %v345_v56  ;;  %v444_v51 = vld [vmem:[%s1873_s7 + $0x540] sm:$0xff]  ;;  %v459_v54 = vld [vmem:[%s1873_s7 + $0x5b8] sm:$0xff] }
  0x51   : > { %1510 = vmatpush3.msra.mxu1 %v377_v57  ;;  %1476 = vmatprep.subr.mxu0 %v360_v59  ;;  %v411_v55 = vld [vmem:[%s1873_s7 + $0x438] sm:$0xff]  ;;  %v426_v57 = vld [vmem:[%s1873_s7 + $0x4b0] sm:$0xff] }
  0x52   : > { %1511 = vmatprep.subr.mxu1 %v392_v60  ;;  %1477 = vmatpush3.msra.mxu0 %v344_v61  ;;  %v443_v56 = vld [vmem:[%s1873_s7 + $0x538] sm:$0xff]  ;;  %v410_v59 = vld [vmem:[%s1873_s7 + $0x430] sm:$0xff]  ;;  %v425_v61 = vld [vmem:[%s1873_s7 + $0x4a8] sm:$0xff] }
  0x53   : > { %1512 = vmatpush3.msra.mxu1 %v376_v62  ;;  %1478 = vmatprep.subr.mxu0 %v359_v63  ;;  %v442_v60 = vld [vmem:[%s1873_s7 + $0x530] sm:$0xff]  ;;  %v457_v62 = vld [vmem:[%s1873_s7 + $0x5a8] sm:$0xff] }
  0x54   : > { %1513 = vmatprep.subr.mxu1 %v391_v0  ;;  %1479 = vmatpush3.msra.mxu0 %v343_v2  ;;  %v409_v63 = vld [vmem:[%s1873_s7 + $0x428] sm:$0xff]  ;;  %v424_v2 = vld [vmem:[%s1873_s7 + $0x4a0] sm:$0xff] }
  0x55   : > { %1514 = vmatpush3.msra.mxu1 %v375_v3  ;;  %1480 = vmatprep.subr.mxu0 %v358_v4  ;;  %v441_v0 = vld [vmem:[%s1873_s7 + $0x528] sm:$0xff]  ;;  %v456_v3 = vld [vmem:[%s1873_s7 + $0x5a0] sm:$0xff] }
  0x56   : > { %1515 = vmatprep.subr.mxu1 %v390_v5  ;;  %1481 = vmatpush3.msra.mxu0 %v342_v7  ;;  %v408_v4 = vld [vmem:[%s1873_s7 + $0x420] sm:$0xff]  ;;  %v455_v7 = vld [vmem:[%s1873_s7 + $0x598] sm:$0xff] }
  0x57   : > { %1516 = vmatpush3.msra.mxu1 %v374_v8  ;;  %1482 = vmatprep.subr.mxu0 %v357_v9  ;;  %v440_v5 = vld [vmem:[%s1873_s7 + $0x520] sm:$0xff]  ;;  %v570_v8 = vcombine.high %v274_v1, %v274_v1  ;;  %v407_v9 = vld [vmem:[%s1873_s7 + $0x418] sm:$0xff] }
  0x58   : > { %1517 = vmatprep.subr.mxu1 %v389_v10  ;;  %1483 = vmatpush3.msra.mxu0 %v341_v12  ;;  %v439_v10 = vld [vmem:[%s1873_s7 + $0x518] sm:$0xff]  ;;  %v454_v12 = vld [vmem:[%s1873_s7 + $0x590] sm:$0xff] }
  0x59   : > { %1518 = vmatpush3.msra.mxu1 %v373_v13  ;;  %1484 = vmatprep.subr.mxu0 %v356_v14  ;;  %v577_v13 = vrot.slane %v274_v1, %v1922_v52  ;;  %v406_v14 = vld [vmem:[%s1873_s7 + $0x410] sm:$0xff] }
  0x5a   : > { %1519 = vmatprep.subr.mxu1 %v388_v15  ;;  %1485 = vmatpush3.msra.mxu0 %v340_v17  ;;  %v438_v15 = vld [vmem:[%s1873_s7 + $0x510] sm:$0xff]  ;;  %v453_v17 = vld [vmem:[%s1873_s7 + $0x588] sm:$0xff] }
  0x5b   : > { %824 = vmatprep.mubr.f32.mxu0 %v568_v16  ;;  %1520 = vmatpush3.msra.mxu1 %v372_v18  ;;  %v421_v16 = vld [vmem:[%s1873_s7 + $0x488] sm:$0xff]  ;;  %v584_v18 = vrot.slane %v570_v8, %v1922_v52  ;;  %v522_v1 = vld [vmem:[%s1873_s7 + $0x7b0] sm:$0xff] }
  0x5c   : > { %825 = vmatmul.mubr.f32.vlgmr.msra.gmra.mxu0 %v560_v6  ;;  %894 = vmatprep.mubr.f32.mxu1 %v569_v19  ;;  %v423_v6 = vld [vmem:[%s1873_s7 + $0x498] sm:$0xff]  ;;  %v405_v19 = vld [vmem:[%s1873_s7 + $0x408] sm:$0xff] }
  0x5d   : > { %1524 = vmatprep.subr.mxu0 %v435_v20  ;;  %1559 = vmatprep.subr.mxu1 %v467_v21  ;;  %v437_v20 = vld [vmem:[%s1873_s7 + $0x508] sm:$0xff]  ;;  %v420_v21 = vld [vmem:[%s1873_s7 + $0x480] sm:$0xff] }
  0x5e   : > { %895 = vmatmul.mubr.f32.vlgmr.msra.gmra.mxu1 %v567_v11  ;;  %1525 = vmatpush3.msra.mxu0 %v419_v22  ;;  %v422_v11 = vld [vmem:[%s1873_s7 + $0x490] sm:$0xff]  ;;  %v452_v22 = vld [vmem:[%s1873_s7 + $0x580] sm:$0xff]  ;;  %v505_v8 = vld [vmem:[%s1873_s7 + $0x728] sm:$0xff] }
  0x5f   : > { %1560 = vmatpush3.msra.mxu1 %v451_v23  ;;  %1526 = vmatprep.subr.mxu0 %v434_v24  ;;  %v585_v23 = vcombine.high %v577_v13, %v577_v13  ;;  %v404_v24 = vld [vmem:[%s1873_s7 + $0x400] sm:$0xff] }
  0x60   : > { %1561 = vmatprep.subr.mxu1 %v466_v25  ;;  %1527 = vmatpush3.msra.mxu0 %v418_v26  ;;  %v436_v25 = vld [vmem:[%s1873_s7 + $0x500] sm:$0xff]  ;;  %v586_v26 = vcombine.high %v584_v18, %v584_v18 }
  0x61   : > { %1562 = vmatpush3.msra.mxu1 %v450_v27  ;;  %1528 = vmatprep.subr.mxu0 %v433_v28  ;;  %v499_v27 = vld [vmem:[%s1873_s7 + $0x6f8] sm:$0xff] }
  0x62   : > { %1563 = vmatprep.subr.mxu1 %v465_v29  ;;  %1529 = vmatpush3.msra.mxu0 %v417_v30  ;;  %v531_v28 = vld [vmem:[%s1873_s7 + $0x7f8] sm:$0xff] }
  0x63   : > { %1564 = vmatpush3.msra.mxu1 %v449_v31  ;;  %1530 = vmatprep.subr.mxu0 %v432_v32  ;;  %v483_v29 = vld [vmem:[%s1873_s7 + $0x678] sm:$0xff]  ;;  %v498_v31 = vld [vmem:[%s1873_s7 + $0x6f0] sm:$0xff] }
  0x64   : > { %1565 = vmatprep.subr.mxu1 %v464_v33  ;;  %1531 = vmatpush3.msra.mxu0 %v416_v34  ;;  %v515_v30 = vld [vmem:[%s1873_s7 + $0x778] sm:$0xff]  ;;  %v530_v32 = vld [vmem:[%s1873_s7 + $0x7f0] sm:$0xff] }
  0x65   : > { %1566 = vmatpush3.msra.mxu1 %v448_v35  ;;  %1532 = vmatprep.subr.mxu0 %v431_v36  ;;  %v482_v33 = vld [vmem:[%s1873_s7 + $0x670] sm:$0xff]  ;;  %v497_v35 = vld [vmem:[%s1873_s7 + $0x6e8] sm:$0xff] }
  0x66   : > { %1567 = vmatprep.subr.mxu1 %v463_v37  ;;  %1533 = vmatpush3.msra.mxu0 %v415_v38  ;;  %v514_v34 = vld [vmem:[%s1873_s7 + $0x770] sm:$0xff]  ;;  %v529_v36 = vld [vmem:[%s1873_s7 + $0x7e8] sm:$0xff] }
  0x67   : > { %1568 = vmatpush3.msra.mxu1 %v447_v39  ;;  %1534 = vmatprep.subr.mxu0 %v430_v40  ;;  %v481_v37 = vld [vmem:[%s1873_s7 + $0x668] sm:$0xff]  ;;  %v496_v39 = vld [vmem:[%s1873_s7 + $0x6e0] sm:$0xff] }
  0x68   : > { %1569 = vmatprep.subr.mxu1 %v462_v41  ;;  %1535 = vmatpush3.msra.mxu0 %v414_v42  ;;  %v513_v38 = vld [vmem:[%s1873_s7 + $0x768] sm:$0xff]  ;;  %v528_v40 = vld [vmem:[%s1873_s7 + $0x7e0] sm:$0xff] }
  0x69   : > { %1570 = vmatpush3.msra.mxu1 %v446_v43  ;;  %1536 = vmatprep.subr.mxu0 %v429_v44  ;;  %v480_v41 = vld [vmem:[%s1873_s7 + $0x660] sm:$0xff]  ;;  %v495_v43 = vld [vmem:[%s1873_s7 + $0x6d8] sm:$0xff] }
  0x6a   : > { %1571 = vmatprep.subr.mxu1 %v461_v45  ;;  %1537 = vmatpush3.msra.mxu0 %v413_v46  ;;  %v512_v42 = vld [vmem:[%s1873_s7 + $0x760] sm:$0xff]  ;;  %v527_v44 = vld [vmem:[%s1873_s7 + $0x7d8] sm:$0xff] }
  0x6b   : > { %1572 = vmatpush3.msra.mxu1 %v445_v47  ;;  %1538 = vmatprep.subr.mxu0 %v428_v48  ;;  %v479_v45 = vld [vmem:[%s1873_s7 + $0x658] sm:$0xff]  ;;  %v494_v47 = vld [vmem:[%s1873_s7 + $0x6d0] sm:$0xff] }
  0x6c   : > { %1573 = vmatprep.subr.mxu1 %v460_v49  ;;  %1539 = vmatpush3.msra.mxu0 %v412_v50  ;;  %v511_v46 = vld [vmem:[%s1873_s7 + $0x758] sm:$0xff]  ;;  %v526_v48 = vld [vmem:[%s1873_s7 + $0x7d0] sm:$0xff] }
  0x6d   : > { %1574 = vmatpush3.msra.mxu1 %v444_v51  ;;  %1540 = vmatprep.subr.mxu0 %v427_v53  ;;  %v478_v49 = vld [vmem:[%s1873_s7 + $0x650] sm:$0xff]  ;;  %v493_v51 = vld [vmem:[%s1873_s7 + $0x6c8] sm:$0xff] }
  0x6e   : > { %1575 = vmatprep.subr.mxu1 %v459_v54  ;;  %1541 = vmatpush3.msra.mxu0 %v411_v55  ;;  %v510_v50 = vld [vmem:[%s1873_s7 + $0x750] sm:$0xff]  ;;  %v525_v53 = vld [vmem:[%s1873_s7 + $0x7c8] sm:$0xff] }
  0x6f   : > { %1576 = vmatpush3.msra.mxu1 %v443_v56  ;;  %1542 = vmatprep.subr.mxu0 %v426_v57  ;;  %v477_v54 = vld [vmem:[%s1873_s7 + $0x648] sm:$0xff]  ;;  %v492_v56 = vld [vmem:[%s1873_s7 + $0x6c0] sm:$0xff] }
  0x70   : > { %1577 = vmatprep.subr.mxu1 %v458_v58  ;;  %1543 = vmatpush3.msra.mxu0 %v410_v59  ;;  %v509_v55 = vld [vmem:[%s1873_s7 + $0x748] sm:$0xff]  ;;  %v524_v57 = vld [vmem:[%s1873_s7 + $0x7c0] sm:$0xff] }
  0x71   : > { %1578 = vmatpush3.msra.mxu1 %v442_v60  ;;  %1544 = vmatprep.subr.mxu0 %v425_v61  ;;  %v476_v58 = vld [vmem:[%s1873_s7 + $0x640] sm:$0xff]  ;;  %v491_v60 = vld [vmem:[%s1873_s7 + $0x6b8] sm:$0xff] }
  0x72   : > { %1579 = vmatprep.subr.mxu1 %v457_v62  ;;  %1545 = vmatpush3.msra.mxu0 %v409_v63  ;;  %v508_v59 = vld [vmem:[%s1873_s7 + $0x740] sm:$0xff]  ;;  %v523_v61 = vld [vmem:[%s1873_s7 + $0x7b8] sm:$0xff] }
  0x73   : > { %1580 = vmatpush3.msra.mxu1 %v441_v0  ;;  %1546 = vmatprep.subr.mxu0 %v424_v2  ;;  %v475_v62 = vld [vmem:[%s1873_s7 + $0x638] sm:$0xff]  ;;  %v490_v0 = vld [vmem:[%s1873_s7 + $0x6b0] sm:$0xff] }
  0x74   : > { %1581 = vmatprep.subr.mxu1 %v456_v3  ;;  %1547 = vmatpush3.msra.mxu0 %v408_v4  ;;  %v507_v63 = vld [vmem:[%s1873_s7 + $0x738] sm:$0xff]  ;;  %v474_v2 = vld [vmem:[%s1873_s7 + $0x630] sm:$0xff]  ;;  %v489_v4 = vld [vmem:[%s1873_s7 + $0x6a8] sm:$0xff] }
  0x75   : > { %1582 = vmatpush3.msra.mxu1 %v440_v5  ;;  %1548 = vmatprep.subr.mxu0 %v423_v6  ;;  %v506_v3 = vld [vmem:[%s1873_s7 + $0x730] sm:$0xff]  ;;  %v521_v5 = vld [vmem:[%s1873_s7 + $0x7a8] sm:$0xff]  ;;  %v275_v6 = vld [vmem:[%s1868_s28 + $0x18] sm:$0xff] }
  0x76   : > { %1583 = vmatprep.subr.mxu1 %v455_v7  ;;  %1549 = vmatpush3.msra.mxu0 %v407_v9  ;;  %v473_v7 = vld [vmem:[%s1873_s7 + $0x628] sm:$0xff]  ;;  %v488_v9 = vld [vmem:[%s1873_s7 + $0x6a0] sm:$0xff] }
  0x77   : > { %1584 = vmatpush3.msra.mxu1 %v439_v10  ;;  %1550 = vmatprep.subr.mxu0 %v422_v11  ;;  %v520_v10 = vld [vmem:[%s1873_s7 + $0x7a0] sm:$0xff] }
  0x78   : > { %1585 = vmatprep.subr.mxu1 %v454_v12  ;;  %1551 = vmatpush3.msra.mxu0 %v406_v14  ;;  %v472_v11 = vld [vmem:[%s1873_s7 + $0x620] sm:$0xff]  ;;  %v487_v14 = vld [vmem:[%s1873_s7 + $0x698] sm:$0xff] }
  0x79   : > { %1586 = vmatpush3.msra.mxu1 %v438_v15  ;;  %1552 = vmatprep.subr.mxu0 %v421_v16  ;;  %v504_v12 = vld [vmem:[%s1873_s7 + $0x720] sm:$0xff]  ;;  %v519_v15 = vld [vmem:[%s1873_s7 + $0x798] sm:$0xff] }
  0x7a   : > { %1587 = vmatprep.subr.mxu1 %v453_v17  ;;  %1553 = vmatpush3.msra.mxu0 %v405_v19  ;;  %v471_v16 = vld [vmem:[%s1873_s7 + $0x618] sm:$0xff]  ;;  %v518_v19 = vld [vmem:[%s1873_s7 + $0x790] sm:$0xff] }
  0x7b   : > { %1588 = vmatpush3.msra.mxu1 %v437_v20  ;;  %1554 = vmatprep.subr.mxu0 %v420_v21  ;;  %v503_v17 = vld [vmem:[%s1873_s7 + $0x718] sm:$0xff]  ;;  %v594_v20 = vrot.slane %v275_v6, %v1922_v52  ;;  %v470_v21 = vld [vmem:[%s1873_s7 + $0x610] sm:$0xff] }
  0x7c   : > { %1589 = vmatprep.subr.mxu1 %v452_v22  ;;  %1555 = vmatpush3.msra.mxu0 %v404_v24  ;;  %v502_v22 = vld [vmem:[%s1873_s7 + $0x710] sm:$0xff]  ;;  %v485_v24 = vld [vmem:[%s1873_s7 + $0x688] sm:$0xff] }
  0x7d   : > { %964 = vmatprep.mubr.f32.mxu0 %v585_v23  ;;  %1590 = vmatpush3.msra.mxu1 %v436_v25  ;;  %v517_v25 = vld [vmem:[%s1873_s7 + $0x788] sm:$0xff] }
  0x7e   : > { %965 = vmatmul.mubr.f32.vlgmr.msra.gmra.mxu0 %v577_v13  ;;  %1034 = vmatprep.mubr.f32.mxu1 %v586_v26  ;;  %v587_v13 = vcombine.high %v275_v6, %v275_v6  ;;  %v469_v26 = vld [vmem:[%s1873_s7 + $0x608] sm:$0xff] }
  0x7f   : > { %1594 = vmatprep.subr.mxu0 %v499_v27  ;;  %1629 = vmatprep.subr.mxu1 %v531_v28  ;;  %v501_v27 = vld [vmem:[%s1873_s7 + $0x708] sm:$0xff]  ;;  %v484_v28 = vld [vmem:[%s1873_s7 + $0x680] sm:$0xff] }
  0x80   : > { %1035 = vmatmul.mubr.f32.vlgmr.msra.gmra.mxu1 %v584_v18  ;;  %1595 = vmatpush3.msra.mxu0 %v483_v29  ;;  %v486_v18 = vld [vmem:[%s1873_s7 + $0x690] sm:$0xff]  ;;  %v601_v23 = vrot.slane %v587_v13, %v1922_v52  ;;  %v516_v29 = vld [vmem:[%s1873_s7 + $0x780] sm:$0xff] }
  0x81   : > { %1630 = vmatpush3.msra.mxu1 %v515_v30  ;;  %1596 = vmatprep.subr.mxu0 %v498_v31  ;;  %v602_v30 = vcombine.high %v594_v20, %v594_v20  ;;  %v468_v31 = vld [vmem:[%s1873_s7 + $0x600] sm:$0xff] }
  0x82   : > { %1631 = vmatprep.subr.mxu1 %v530_v32  ;;  %1597 = vmatpush3.msra.mxu0 %v482_v33  ;;  %v603_v32 = vcombine.high %v601_v23, %v601_v23  ;;  %v500_v52 = vld [vmem:[%s1873_s7 + $0x700] sm:$0xff] }
  0x83   : > { %1632 = vmatpush3.msra.mxu1 %v514_v34  ;;  %1598 = vmatprep.subr.mxu0 %v497_v35 }
  0x84   : > { %1633 = vmatprep.subr.mxu1 %v529_v36  ;;  %1599 = vmatpush3.msra.mxu0 %v481_v37 }
  0x85   : > { %1634 = vmatpush3.msra.mxu1 %v513_v38  ;;  %1600 = vmatprep.subr.mxu0 %v496_v39 }
  0x86   : > { %1635 = vmatprep.subr.mxu1 %v528_v40  ;;  %1601 = vmatpush3.msra.mxu0 %v480_v41 }
  0x87   : > { %1636 = vmatpush3.msra.mxu1 %v512_v42  ;;  %1602 = vmatprep.subr.mxu0 %v495_v43 }
  0x88   : > { %1637 = vmatprep.subr.mxu1 %v527_v44  ;;  %1603 = vmatpush3.msra.mxu0 %v479_v45 }
  0x89   : > { %1638 = vmatpush3.msra.mxu1 %v511_v46  ;;  %1604 = vmatprep.subr.mxu0 %v494_v47 }
  0x8a   : > { %1639 = vmatprep.subr.mxu1 %v526_v48  ;;  %1605 = vmatpush3.msra.mxu0 %v478_v49 }
  0x8b   : > { %1640 = vmatpush3.msra.mxu1 %v510_v50  ;;  %1606 = vmatprep.subr.mxu0 %v493_v51 }
  0x8c   : > { %1641 = vmatprep.subr.mxu1 %v525_v53  ;;  %1607 = vmatpush3.msra.mxu0 %v477_v54 }
  0x8d   : > { %1642 = vmatpush3.msra.mxu1 %v509_v55  ;;  %1608 = vmatprep.subr.mxu0 %v492_v56 }
  0x8e   : > { %1643 = vmatprep.subr.mxu1 %v524_v57  ;;  %1609 = vmatpush3.msra.mxu0 %v476_v58 }
  0x8f   : > { %1644 = vmatpush3.msra.mxu1 %v508_v59  ;;  %1610 = vmatprep.subr.mxu0 %v491_v60 }
  0x90   : > { %1645 = vmatprep.subr.mxu1 %v523_v61  ;;  %1611 = vmatpush3.msra.mxu0 %v475_v62 }
  0x91   : > { %1646 = vmatpush3.msra.mxu1 %v507_v63  ;;  %1612 = vmatprep.subr.mxu0 %v490_v0  ;;  %v271_v0 = vld [vmem:[#allocation2] sm:$0x3] }
  0x92   : > { %1647 = vmatprep.subr.mxu1 %v522_v1  ;;  %1613 = vmatpush3.msra.mxu0 %v474_v2 }
  0x93   : > { %1648 = vmatpush3.msra.mxu1 %v506_v3  ;;  %1614 = vmatprep.subr.mxu0 %v489_v4 }
  0x94   : > { %1649 = vmatprep.subr.mxu1 %v521_v5  ;;  %1615 = vmatpush3.msra.mxu0 %v473_v7 }
  0x95   : > { %1650 = vmatpush3.msra.mxu1 %v505_v8  ;;  %1616 = vmatprep.subr.mxu0 %v488_v9 }
  0x96   : > { %1651 = vmatprep.subr.mxu1 %v520_v10  ;;  %1617 = vmatpush3.msra.mxu0 %v472_v11 }
  0x97   : > { %1652 = vmatpush3.msra.mxu1 %v504_v12  ;;  %1618 = vmatprep.subr.mxu0 %v487_v14 }
  0x98   : > { %1653 = vmatprep.subr.mxu1 %v519_v15  ;;  %1619 = vmatpush3.msra.mxu0 %v471_v16 }
  0x99   : > { %1654 = vmatpush3.msra.mxu1 %v503_v17  ;;  %1620 = vmatprep.subr.mxu0 %v486_v18 }
  0x9a   : > { %1655 = vmatprep.subr.mxu1 %v518_v19  ;;  %1621 = vmatpush3.msra.mxu0 %v470_v21 }
  0x9b   : > { %1656 = vmatpush3.msra.mxu1 %v502_v22  ;;  %1622 = vmatprep.subr.mxu0 %v485_v24 }
  0x9c   : > { %1657 = vmatprep.subr.mxu1 %v517_v25  ;;  %1623 = vmatpush3.msra.mxu0 %v469_v26 }
  0x9d   : > { %1658 = vmatpush3.msra.mxu1 %v501_v27  ;;  %1624 = vmatprep.subr.mxu0 %v484_v28 }
  0x9e   : > { %1659 = vmatprep.subr.mxu1 %v516_v29  ;;  %1625 = vmatpush3.msra.mxu0 %v468_v31 }
  0x9f   : > { %1104 = vmatprep.mubr.f32.mxu0 %v602_v30  ;;  %1660 = vmatpush3.msra.mxu1 %v500_v52 }
  0xa0   : > { %1174 = vmatprep.mubr.f32.mxu1 %v603_v32  ;;  %1105 = vmatmul.mubr.f32.vlgmr.msra.gmra.mxu0 %v594_v20 }
  0xa1   : > { %1175 = vmatmul.mubr.f32.vlgmr.msra.gmra.mxu1 %v601_v23 }
  0xfa   : > { %v1416_v33 = vpop.f32.mrf.mxu0 }
  0xfb   : > { %v1451_v34 = vpop.f32.mrf.mxu1 }
  0xfc   : > { %v1417_v35 = vpop.f32.mrf.mxu0 }
  0xfd   : > { %v1452_v37 = vpop.f32.mrf.mxu1  ;;  %v1418_v40 = vadd.f32 %v1417_v35, %v1416_v33 }
  0xfe   : > { %v1453_v41 = vadd.f32 %v1452_v37, %v1451_v34 }
 0x100   : > { %v757_v45 = vadd.f32 %v1453_v41, %v1418_v40 }
 0x11c   : > { %v1486_v36 = vpop.f32.mrf.mxu0 }
 0x11e   : > { %v1521_v38 = vpop.f32.mrf.mxu1  ;;  %v1487_v39 = vpop.f32.mrf.mxu0 }
 0x11f   : > { %v1488_v43 = vadd.f32 %v1487_v39, %v1486_v36 }
 0x120   : > { %v1522_v44 = vpop.f32.mrf.mxu1 }
 0x121   : > { %v827_v48 = vadd.f32 %v1488_v43, %v757_v45  ;;  %v1523_v49 = vadd.f32 %v1522_v44, %v1521_v38 }
 0x123   : > { %v897_v53 = vadd.f32 %v1523_v49, %v827_v48 }
 0x13e   : > { %v1556_v42 = vpop.f32.mrf.mxu0 }
 0x140   : > { %v1591_v46 = vpop.f32.mrf.mxu1  ;;  %v1557_v47 = vpop.f32.mrf.mxu0 }
 0x141   : > { %v1558_v50 = vadd.f32 %v1557_v47, %v1556_v42 }
 0x142   : > { %v1592_v51 = vpop.f32.mrf.mxu1 }
 0x143   : > { %v967_v54 = vadd.f32 %v1558_v50, %v897_v53  ;;  %v1593_v55 = vadd.f32 %v1592_v51, %v1591_v46 }
 0x145   : > { %v1037_v60 = vadd.f32 %v1593_v55, %v967_v54 }
 0x160   : > { %v1626_v56 = vpop.f32.mrf.mxu0 }
 0x161   : > { %v1661_v57 = vpop.f32.mrf.mxu1 }
 0x162   : > { %v1627_v58 = vpop.f32.mrf.mxu0 }
 0x163   : > { %v1662_v59 = vpop.f32.mrf.mxu1  ;;  %v1628_v61 = vadd.f32 %v1627_v58, %v1626_v56 }
 0x164   : > { %v1663_v63 = vadd.f32 %v1662_v59, %v1661_v57 }
 0x165   : > { %v1107_v62 = vadd.f32 %v1628_v61, %v1037_v60 }
 0x167   : > { %v1177_v1 = vadd.f32 %v1663_v63, %v1107_v62  ;;  %1185 = sbr.rel (%p1377_p7) target bundleno = 593 (0x251), region = 48 }
 0x169   : > { %v1180_v2 = vadd.f32 %v1177_v1, %v271_v0 }
 0x16b   : > { %1181 = vst [vmem:[#allocation2] sm:$0x3] %v1180_v2 }
 0x16c   : > { %v1211_v3 = vld [vmem:[%s2230_s3 + $0x78] sm:$0xff]  ;;  %v1809_v4 = vmov 0.0   ;;  %v1210_v5 = vld [vmem:[%s2230_s3 + $0x70] sm:$0xff]  ;;  %vm1810_vm0 = vmmov 0   ;;  %v1209_v6 = vld [vmem:[%s2230_s3 + $0x68] sm:$0xff]  ;;  %vm1289_vm1 = vcmask 9216  }
 0x16d   : > { %1681 = vmatprep.subr.mxu0 %v1809_v4  ;;  %1713 = vmatprep.mubr.msk.f32.mxu0 %vm1810_vm0, %v1809_v4  ;;  %v1208_v7 = vld [vmem:[%s2230_s3 + $0x60] sm:$0xff]  ;;  %v1207_v8 = vld [vmem:[%s2230_s3 + $0x58] sm:$0xff]  ;;  %v1206_v9 = vld [vmem:[%s2230_s3 + $0x50] sm:$0xff] }
 0x16e   : > { %1682 = vmatpush3.msra.mxu0 %v1211_v3  ;;  %v1205_v10 = vld [vmem:[%s2230_s3 + $0x48] sm:$0xff]  ;;  %v1204_v11 = vld [vmem:[%s2230_s3 + $0x40] sm:$0xff]  ;;  %v1203_v12 = vld [vmem:[%s2230_s3 + $0x38] sm:$0xff] }
 0x16f   : > { %1683 = vmatprep.subr.mxu0 %v1809_v4  ;;  %v1202_v13 = vld [vmem:[%s2230_s3 + $0x30] sm:$0xff]  ;;  %v1201_v14 = vld [vmem:[%s2230_s3 + $0x28] sm:$0xff]  ;;  %v1200_v15 = vld [vmem:[%s2230_s3 + $0x20] sm:$0xff] }
 0x170   : > { %1684 = vmatpush3.msra.mxu0 %v1210_v5  ;;  %v1378_v17 = vld [vmem:[%s2229_s2] ss:$0 sm:$0xff]  ;;  %v1199_v18 = vld [vmem:[%s2230_s3 + $0x18] sm:$0xff]  ;;  %v1198_v19 = vld [vmem:[%s2230_s3 + $0x10] sm:$0xff] }
 0x171   : > { %1685 = vmatprep.subr.mxu0 %v1809_v4  ;;  %v1197_v21 = vld [vmem:[%s2230_s3 + $0x8] sm:$0xff]  ;;  %v1196_v22 = vld [vmem:[%s2230_s3] sm:$0xff] }
 0x172   : > { %1686 = vmatpush3.msra.mxu0 %v1209_v6  ;;  %v1186_v16 = vld [vmem:[#allocation2] sm:$0x3] }
 0x173   : > { %1687 = vmatprep.subr.mxu0 %v1809_v4  ;;  %v1194_v20 = vadd.f32 %v1378_v17, %v1186_v16  ;;  %v1379_v24 = vld [vmem:[%s2231_s4] ss:$0 sm:$0xff] }
 0x174   : > { %1688 = vmatpush3.msra.mxu0 %v1208_v7 }
 0x175   : > { %1689 = vmatprep.subr.mxu0 %v1809_v4  ;;  %v1195_v23 = vmax.f32 %v1194_v20, 0.0 }
 0x176   : > { %1690 = vmatpush3.msra.mxu0 %v1207_v8 }
 0x177   : > { %1691 = vmatprep.subr.mxu0 %v1809_v4 }
 0x178   : > { %1692 = vmatpush3.msra.mxu0 %v1206_v9 }
 0x179   : > { %1693 = vmatprep.subr.mxu0 %v1809_v4 }
 0x17a   : > { %1694 = vmatpush3.msra.mxu0 %v1205_v10 }
 0x17b   : > { %1695 = vmatprep.subr.mxu0 %v1809_v4 }
 0x17c   : > { %1696 = vmatpush3.msra.mxu0 %v1204_v11 }
 0x17d   : > { %1697 = vmatprep.subr.mxu0 %v1809_v4 }
 0x17e   : > { %1698 = vmatpush3.msra.mxu0 %v1203_v12 }
 0x17f   : > { %1699 = vmatprep.subr.mxu0 %v1809_v4 }
 0x180   : > { %1700 = vmatpush3.msra.mxu0 %v1202_v13 }
 0x181   : > { %1701 = vmatprep.subr.mxu0 %v1809_v4 }
 0x182   : > { %1702 = vmatpush3.msra.mxu0 %v1201_v14 }
 0x183   : > { %1703 = vmatprep.subr.mxu0 %v1809_v4 }
 0x184   : > { %1704 = vmatpush3.msra.mxu0 %v1200_v15 }
 0x185   : > { %1705 = vmatprep.subr.mxu0 %v1809_v4 }
 0x186   : > { %1706 = vmatpush3.msra.mxu0 %v1199_v18 }
 0x187   : > { %1707 = vmatprep.subr.mxu0 %v1809_v4 }
 0x188   : > { %1708 = vmatpush3.msra.mxu0 %v1198_v19 }
 0x189   : > { %1709 = vmatprep.subr.mxu0 %v1809_v4 }
 0x18a   : > { %1710 = vmatpush3.msra.mxu0 %v1197_v21 }
 0x18b   : > { %1711 = vmatprep.subr.mxu0 %v1809_v4 }
 0x18c   : > { %1712 = vmatpush3.msra.mxu0 %v1196_v22 }
 0x18d   : > { %1714 = vmatmul.mubr.f32.vlgmr.msra.gmra.mxu0 %v1195_v23 }
 0x24d   : > { %v1285_v25 = vpop.f32.mrf.mxu0 }
 0x24e   : > { %v1286_v26 = vadd.f32 %v1379_v24, %v1285_v25 }
 0x24f   : > { %v1715_v27 = vpop.f32.mrf.mxu0 }
 0x250   : > { %1290 = vst.msk [vmem:[#allocation3] sm:$0x3] %vm1289_vm1, %v1286_v26 }
 0x251 PF: > { %p2203_p8 = scmp.eq.s32.totalorder %s1368_s21, 7  ;;  %s1811_s28 = smov [#allocation3]  }
 0x252   : > { %s1300_s29 = sshll.u32 %s1811_s28, 4  ;;  %s1301_s29 = int_to_ptr.vmem [resolvable:$true] %s1300_s29 }
 0x253   : > { %s1755_s30 = scalar_lea.vmem %s1301_s29, 32  ;;  %p1762_p12 = scmp.lt.s32.totalorder %s1301_s29, %s1301_s29 }
 0x254   : > { %p1756_p9 = scmp.ne.s32.totalorder %s1301_s29, %s1755_s30  ;;  %p1763_p13 = scmp.lt.s32.totalorder %s1755_s30, %s1755_s30 }
 0x256   : > { %p1757_p10 = pnand %p1756_p9, %p2203_p8  ;;  %p1764_p0 = por %p1763_p13, %p1762_p12 }
 0x258   : > { %p1758_p11 = pneg %p1757_p10 }
 0x25a   : > { %p1765_p1 = pnand %p1764_p0, %p1758_p11 }
 0x25c   : > { %1768 = shalt.err (!%p1765_p1)
}
 0x25d   : > { %1717 = dma.vmem_to_hbm [thread:$0]  (%p2203_p8), %s1301_s29, 32, %s2232_s5, [#allocation4]  }
 0x25e   : > { %1792 = dma.done.wait (%p2203_p8), [#allocation4], 32  }
 0x25f   : > { %1794 = vsyncadd (%p2203_p8), [#allocation4], 4294967264 }
 0x260 PF: > { %s16_s20 = sadd.s32 1, %s1805_s20   ;;  %s2234_s18 = smov %s1801_s19 }
 0x261   : > { %p13_p2 = scmp.ge.s32.totalorder %s16_s20, 10   ;;  %s2235_s19 = smov %s2237_s22 }
 0x263   :  { %15 = sbr.rel (!%p13_p2) target bundleno = 2 (0x2), region = 79 }
 0x268   :  { %1313 = vsyncpa [#allocation4], 1 }
 0x269   :  { %1315 = vsyncpa [#allocation4 + $0x1], 1 }

</bundles_post_ra>
